<compile_context>
chip_gen: v7x
topology: tpu7x:2x2x1
jax: 0.10.0
libtpu: 0.0.40
codegen_flags: <defaults>
</compile_context>

<pallas_src>
import math

import jax
import jax.numpy as jnp
from jax import lax
from jax.experimental import pallas as pl
from jax.experimental.pallas import tpu as pltpu

HIDDEN = 32      # LSTM hidden size
B_TILE = 128     # batch rows per grid tile (lane width of one tile)


def _leaky_relu(z, slope=0.2):
    return jnp.where(z >= 0, z, slope * z)


def net_lstm_kernel(x_ref, freq_ref,
                    wih_ref, whh_ref, blstm_ref,
                    w1_ref, b1_ref, w2_ref, b2_ref, w3_ref, b3_ref,
                    w4_ref, b4_ref, w5_ref, b5_ref, w6_ref, b6_ref,
                    out_ref, xw_ref):
    """One batch tile; all activations carry batch on the LANE axis.

      x_ref    : (T, Bt)       time-major, lane-dense
      freq_ref : (1, Bt)
      out_ref  : (1, Bt)
      weights  : PyTorch-native (out_features, in_features) layouts
      xw_ref   : (T, 4H, Bt)   VMEM scratch: precomputed input projection
    """
    T, Bt = x_ref.shape
    H = whh_ref.shape[1]

    wih = wih_ref[...]        # (4H, 1)   == weight_ih_l0
    whh = whh_ref[...]        # (4H, H)   == weight_hh_l0
    blstm = blstm_ref[...]    # (4H, 1)   == b_ih + b_hh

    # ---- Hoist the input projection out of the recurrence ------------------
    # input_size == 1  =>  x_t @ W_ih^T is a rank-1 outer product: pure VPU
    # broadcast.  Precompute for every timestep so the serial h->h chain only
    # contains one MXU matmul + gate math per step.
    @pl.loop(0, T)
    def _(t):
        xt = x_ref[pl.ds(t, 1), :]                 # (1, Bt) lane-dense row
        xw_ref[t] = xt * wih + blstm               # (4H, Bt)

    # ---- Recurrence (fully unrolled; T is small & static) ------------------
    def step(t, carry):
        h, c = carry                               # (H, Bt) each
        gates = xw_ref[t] + jnp.dot(
            whh, h, preferred_element_type=jnp.float32)       # (4H, Bt)
        # PyTorch gate order i, f, g, o; each slice is a full-sublane slab.
        i = jax.nn.sigmoid(gates[0:H, :])
        f = jax.nn.sigmoid(gates[H:2 * H, :])
        g = jnp.tanh(gates[2 * H:3 * H, :])
        o = jax.nn.sigmoid(gates[3 * H:4 * H, :])
        c_new = f * c + i * g
        h_new = o * jnp.tanh(c_new)
        return (h_new, c_new)

    h0 = jnp.zeros((H, Bt), jnp.float32)
    c0 = jnp.zeros((H, Bt), jnp.float32)
    h_last, _ = lax.fori_loop(0, T, step, (h0, c0), unroll=True)

    # ---- MLP head, batch-on-lanes:  act_next = W @ act + b -----------------
    # (bf16 for these matmuls would be possible on v6e/v7x; kept f32 for
    #  bit-accuracy against the reference.)
    def affine(w_ref, b_ref, act):
        return jnp.dot(w_ref[...], act,
                       preferred_element_type=jnp.float32) + b_ref[...]

    a1 = _leaky_relu(affine(w1_ref, b1_ref, h_last))     # (16, Bt)
    a2 = _leaky_relu(affine(w2_ref, b2_ref, a1))         # (16, Bt)
    x15 = affine(w3_ref, b3_ref, a2)                     # (15, Bt)

    # fc2 on concat([x15, freq]): split w4 columns; the freq column is a
    # (16,1)x(1,Bt) broadcast multiply (VPU) instead of a K=1 matmul.
    freq = freq_ref[...]                                 # (1, Bt)
    w4 = w4_ref[...]                                     # (16, 16)
    z1 = _leaky_relu(
        jnp.dot(w4[:, 0:15], x15, preferred_element_type=jnp.float32)
        + w4[:, 15:16] * freq
        + b4_ref[...])
    z2 = _leaky_relu(affine(w5_ref, b5_ref, z1))         # (16, Bt)
    out_ref[...] = affine(w6_ref, b6_ref, z2)            # (1, Bt) dense store


def net_lstm_forward(x, freq, params, *, b_tile=B_TILE):
    """x: (B, T, 1) batch-first (PyTorch convention), freq: (B, 1) -> (B, 1)."""
    B, T, _ = x.shape
    H = HIDDEN
    n_tiles = pl.cdiv(B, b_tile)
    Bp = n_tiles * b_tile

    # Lane-dense, time-major input and lane-dense freq row; pad batch to tile.
    x_tb = jnp.pad(jnp.transpose(x[:, :, 0].astype(jnp.float32), (1, 0)),
                   ((0, 0), (0, Bp - B)))                    # (T, Bp)
    freq_row = jnp.pad(freq[:, 0].astype(jnp.float32),
                       (0, Bp - B))[None, :]                 # (1, Bp)

    col = lambda b: b[:, None]
    b_lstm = col(params["b_ih"] + params["b_hh"])            # (4H, 1)
    weights = (params["w_ih"], params["w_hh"], b_lstm,
               params["w1"], col(params["b1"]),
               params["w2"], col(params["b2"]),
               params["w3"], col(params["b3"]),
               params["w4"], col(params["b4"]),
               params["w5"], col(params["b5"]),
               params["w6"], col(params["b6"]))

    def wspec(a):
        # full-array block, constant index map (weight resident across tiles)
        return pl.BlockSpec(a.shape, lambda i: (0, 0))

    grid_spec = pltpu.PrefetchScalarGridSpec(
        num_scalar_prefetch=0,
        grid=(n_tiles,),
        in_specs=[pl.BlockSpec((T, b_tile), lambda i: (0, i)),    # x
                  pl.BlockSpec((1, b_tile), lambda i: (0, i))]    # freq
                 + [wspec(w) for w in weights],
        out_specs=pl.BlockSpec((1, b_tile), lambda i: (0, i)),
        scratch_shapes=[pltpu.VMEM((T, 4 * H, b_tile), jnp.float32)],
    )

    out = pl.pallas_call(
        net_lstm_kernel,
        out_shape=jax.ShapeDtypeStruct((1, Bp), jnp.float32),
        grid_spec=grid_spec,
        compiler_params=pltpu.CompilerParams(
            dimension_semantics=("parallel",)),   # batch tiles -> both TCs on v7x
    )(x_tb, freq_row, *weights)

    return out[0, :B][:, None]                               # (B, 1)


def init_params(key):
    """Deterministic synthetic init mirroring PyTorch default uniform bounds.

    All tensors use PyTorch-native layouts: LSTM weight_ih (4H,1),
    weight_hh (4H,H), biases (4H,); Linear weights (out,in), biases (out,).
    """
    H = HIDDEN
    keys = jax.random.split(key, 16)

    def u(kk, shape, bound):
        return jax.random.uniform(kk, shape, jnp.float32, -bound, bound)

    k_lstm = 1.0 / math.sqrt(H)
    p = dict(
        w_ih=u(keys[0], (4 * H, 1), k_lstm),
        w_hh=u(keys[1], (4 * H, H), k_lstm),
        b_ih=u(keys[2], (4 * H,), k_lstm),
        b_hh=u(keys[3], (4 * H,), k_lstm),
    )

    def linear(kw, kb, fan_in, fan_out):
        bound = 1.0 / math.sqrt(fan_in)
        return u(kw, (fan_out, fan_in), bound), u(kb, (fan_out,), bound)

    p["w1"], p["b1"] = linear(keys[4], keys[5], 32, 16)
    p["w2"], p["b2"] = linear(keys[6], keys[7], 16, 16)
    p["w3"], p["b3"] = linear(keys[8], keys[9], 16, 15)
    p["w4"], p["b4"] = linear(keys[10], keys[11], 16, 16)
    p["w5"], p["b5"] = linear(keys[12], keys[13], 16, 16)
    p["w6"], p["b6"] = linear(keys[14], keys[15], 16, 1)
    return p


def reference_forward(x, freq, p):
    """Pure-JAX reference (mirrors PyTorch forward exactly)."""
    B, T, _ = x.shape
    H = HIDDEN
    h = jnp.zeros((B, H), jnp.float32)
    c = jnp.zeros((B, H), jnp.float32)
    w_ih_t, w_hh_t = p["w_ih"].T, p["w_hh"].T
    b = p["b_ih"] + p["b_hh"]
    for t in range(T):
        gates = x[:, t, :] @ w_ih_t + h @ w_hh_t + b
        i = jax.nn.sigmoid(gates[:, :H])
        f = jax.nn.sigmoid(gates[:, H:2 * H])
        g = jnp.tanh(gates[:, 2 * H:3 * H])
        o = jax.nn.sigmoid(gates[:, 3 * H:])
        c = f * c + i * g
        h = o * jnp.tanh(c)
    lr = lambda z: jnp.where(z >= 0, z, 0.2 * z)
    a = lr(h @ p["w1"].T + p["b1"])
    a = lr(a @ p["w2"].T + p["b2"])
    x15 = a @ p["w3"].T + p["b3"]
    cat = jnp.concatenate([x15, freq], axis=1)
    z = lr(cat @ p["w4"].T + p["b4"])
    z = lr(z @ p["w5"].T + p["b5"])
    return z @ p["w6"].T + p["b6"]


if __name__ == "__main__":
    B, T = 2, 8
    key = jax.random.PRNGKey(0)
    k_x, k_f, k_p = jax.random.split(key, 3)

    x = jax.random.normal(k_x, (B, T, 1), jnp.float32)
    freq = jax.random.normal(k_f, (B, 1), jnp.float32)
    params = init_params(k_p)

    y = net_lstm_forward(x, freq, params)
    y = jax.block_until_ready(y)

    y_ref = reference_forward(x, freq, params)
    assert y.shape == (B, 1)
    assert jnp.allclose(y, y_ref, atol=2e-5, rtol=2e-5), (y, y_ref)

    print("KERNEL_OK")
</pallas_src>

<mosaic_0001>
module attributes {stable_mosaic.version = 11 : i64} {
  func.func @net_lstm_kernel(%arg0: i32, %arg1: memref<8x128xf32, #tpu.memory_space<vmem>>, %arg2: memref<1x128xf32, #tpu.memory_space<vmem>>, %arg3: memref<128x1xf32, #tpu.memory_space<vmem>>, %arg4: memref<128x32xf32, #tpu.memory_space<vmem>>, %arg5: memref<128x1xf32, #tpu.memory_space<vmem>>, %arg6: memref<16x32xf32, #tpu.memory_space<vmem>>, %arg7: memref<16x1xf32, #tpu.memory_space<vmem>>, %arg8: memref<16x16xf32, #tpu.memory_space<vmem>>, %arg9: memref<16x1xf32, #tpu.memory_space<vmem>>, %arg10: memref<15x16xf32, #tpu.memory_space<vmem>>, %arg11: memref<15x1xf32, #tpu.memory_space<vmem>>, %arg12: memref<16x16xf32, #tpu.memory_space<vmem>>, %arg13: memref<16x1xf32, #tpu.memory_space<vmem>>, %arg14: memref<16x16xf32, #tpu.memory_space<vmem>>, %arg15: memref<16x1xf32, #tpu.memory_space<vmem>>, %arg16: memref<1x16xf32, #tpu.memory_space<vmem>>, %arg17: memref<1x1xf32, #tpu.memory_space<vmem>>, %arg18: memref<1x128xf32, #tpu.memory_space<vmem>>, %arg19: memref<8x128x128xf32, #tpu.memory_space<vmem>>) attributes {dimension_semantics = [#tpu.dimension_semantics<parallel>], iteration_bounds = array<i64: 1>, scalar_prefetch = 0 : i64, scratch_operands = 1 : i64, tpu.core_type = #tpu.core_type<tc>, window_params = [{transform_indices = @transform_0, window_bounds = array<i64: 8, 128>}, {transform_indices = @transform_1, window_bounds = array<i64: 1, 128>}, {pipeline_mode = #tpu.pipeline_mode<synchronous>, transform_indices = @transform_2, window_bounds = array<i64: 128, 1>}, {pipeline_mode = #tpu.pipeline_mode<synchronous>, transform_indices = @transform_3, window_bounds = array<i64: 128, 32>}, {pipeline_mode = #tpu.pipeline_mode<synchronous>, transform_indices = @transform_4, window_bounds = array<i64: 128, 1>}, {pipeline_mode = #tpu.pipeline_mode<synchronous>, transform_indices = @transform_5, window_bounds = array<i64: 16, 32>}, {pipeline_mode = #tpu.pipeline_mode<synchronous>, transform_indices = @transform_6, window_bounds = array<i64: 16, 1>}, {pipeline_mode = #tpu.pipeline_mode<synchronous>, transform_indices = @transform_7, window_bounds = array<i64: 16, 16>}, {pipeline_mode = #tpu.pipeline_mode<synchronous>, transform_indices = @transform_8, window_bounds = array<i64: 16, 1>}, {pipeline_mode = #tpu.pipeline_mode<synchronous>, transform_indices = @transform_9, window_bounds = array<i64: 15, 16>}, {pipeline_mode = #tpu.pipeline_mode<synchronous>, transform_indices = @transform_10, window_bounds = array<i64: 15, 1>}, {pipeline_mode = #tpu.pipeline_mode<synchronous>, transform_indices = @transform_11, window_bounds = array<i64: 16, 16>}, {pipeline_mode = #tpu.pipeline_mode<synchronous>, transform_indices = @transform_12, window_bounds = array<i64: 16, 1>}, {pipeline_mode = #tpu.pipeline_mode<synchronous>, transform_indices = @transform_13, window_bounds = array<i64: 16, 16>}, {pipeline_mode = #tpu.pipeline_mode<synchronous>, transform_indices = @transform_14, window_bounds = array<i64: 16, 1>}, {pipeline_mode = #tpu.pipeline_mode<synchronous>, transform_indices = @transform_15, window_bounds = array<i64: 1, 16>}, {pipeline_mode = #tpu.pipeline_mode<synchronous>, transform_indices = @transform_16, window_bounds = array<i64: 1, 1>}, {transform_indices = @transform_17, window_bounds = array<i64: 1, 128>}]} {
    %c0 = arith.constant 0 : index
    %c0_0 = arith.constant 0 : index
    %0 = vector.load %arg3[%c0, %c0_0] : memref<128x1xf32, #tpu.memory_space<vmem>>, vector<128x1xf32>
    %c0_1 = arith.constant 0 : index
    %c0_2 = arith.constant 0 : index
    %1 = vector.load %arg4[%c0_1, %c0_2] : memref<128x32xf32, #tpu.memory_space<vmem>>, vector<128x32xf32>
    %c0_3 = arith.constant 0 : index
    %c0_4 = arith.constant 0 : index
    %2 = vector.load %arg5[%c0_3, %c0_4] : memref<128x1xf32, #tpu.memory_space<vmem>>, vector<128x1xf32>
    %c0_i32 = arith.constant 0 : i32
    %c8_i32 = arith.constant 8 : i32
    %3 = arith.addi %c0_i32, %c8_i32 : i32
    %c1_i32 = arith.constant 1 : i32
    scf.for %arg20 = %c0_i32 to %3 step %c1_i32  : i32 {
      %c1_i32_100 = arith.constant 1 : i32
      %304 = arith.muli %arg20, %c1_i32_100 : i32
      %c0_i32_101 = arith.constant 0 : i32
      %305 = arith.addi %c0_i32_101, %304 : i32
      %306 = arith.index_cast %305 : i32 to index
      %c0_102 = arith.constant 0 : index
      %307 = vector.load %arg1[%306, %c0_102] : memref<8x128xf32, #tpu.memory_space<vmem>>, vector<1x128xf32>
      %308 = vector.broadcast %307 : vector<1x128xf32> to vector<128x128xf32>
      %309 = vector.broadcast %0 : vector<128x1xf32> to vector<128x128xf32>
      %310 = arith.mulf %308, %309 : vector<128x128xf32>
      %311 = vector.broadcast %2 : vector<128x1xf32> to vector<128x128xf32>
      %312 = arith.addf %310, %311 : vector<128x128xf32>
      %313 = arith.index_cast %305 : i32 to index
      %c0_103 = arith.constant 0 : index
      %c0_104 = arith.constant 0 : index
      %314 = vector.load %arg19[%313, %c0_103, %c0_104] : memref<8x128x128xf32, #tpu.memory_space<vmem>>, vector<1x128x128xf32>
      %315 = vector.shape_cast %314 : vector<1x128x128xf32> to vector<128x128xf32>
      %316 = vector.shape_cast %312 : vector<128x128xf32> to vector<1x128x128xf32>
      tpu.vector_store %arg19[%313, %c0_103, %c0_104], %316 {strides = array<i32>} : memref<8x128x128xf32, #tpu.memory_space<vmem>>, vector<1x128x128xf32>,
    }
    %c8_i32_5 = arith.constant 8 : i32
    %cst = arith.constant 0.000000e+00 : f32
    %4 = vector.broadcast %cst : f32 to vector<32x128xf32>
    %cst_6 = arith.constant 0.000000e+00 : f32
    %5 = vector.broadcast %cst_6 : f32 to vector<32x128xf32>
    %c0_i32_7 = arith.constant 0 : i32
    %6 = arith.index_cast %c0_i32_7 : i32 to index
    %c0_8 = arith.constant 0 : index
    %c0_9 = arith.constant 0 : index
    %7 = vector.load %arg19[%6, %c0_8, %c0_9] : memref<8x128x128xf32, #tpu.memory_space<vmem>>, vector<1x128x128xf32>
    %8 = vector.shape_cast %7 : vector<1x128x128xf32> to vector<128x128xf32>
    %cst_10 = arith.constant dense<0.000000e+00> : vector<128x128xf32>
    %9 = tpu.matmul %1, %4, %cst_10 {dimension_numbers = #tpu.dot_dimension_numbers<[1], [0], [0], [1], [0, 0, 1, 1], [], []>} : vector<128x32xf32>, vector<32x128xf32>, vector<128x128xf32> -> vector<128x128xf32>
    %10 = arith.addf %8, %9 : vector<128x128xf32>
    %11 = vector.extract_strided_slice %10 {offsets = [0, 0], sizes = [32, 128], strides = [1, 1]} : vector<128x128xf32> to vector<32x128xf32>
    %12 = arith.negf %11 : vector<32x128xf32>
    %13 = math.exp %12 : vector<32x128xf32>
    %cst_11 = arith.constant 1.000000e+00 : f32
    %14 = vector.broadcast %cst_11 : f32 to vector<32x128xf32>
    %15 = arith.addf %14, %13 : vector<32x128xf32>
    %16 = arith.divf %14, %15 : vector<32x128xf32>
    %17 = vector.extract_strided_slice %10 {offsets = [32, 0], sizes = [32, 128], strides = [1, 1]} : vector<128x128xf32> to vector<32x128xf32>
    %18 = arith.negf %17 : vector<32x128xf32>
    %19 = math.exp %18 : vector<32x128xf32>
    %cst_12 = arith.constant 1.000000e+00 : f32
    %20 = vector.broadcast %cst_12 : f32 to vector<32x128xf32>
    %21 = arith.addf %20, %19 : vector<32x128xf32>
    %22 = arith.divf %20, %21 : vector<32x128xf32>
    %23 = vector.extract_strided_slice %10 {offsets = [64, 0], sizes = [32, 128], strides = [1, 1]} : vector<128x128xf32> to vector<32x128xf32>
    %24 = math.tanh %23 : vector<32x128xf32>
    %25 = vector.extract_strided_slice %10 {offsets = [96, 0], sizes = [32, 128], strides = [1, 1]} : vector<128x128xf32> to vector<32x128xf32>
    %26 = arith.negf %25 : vector<32x128xf32>
    %27 = math.exp %26 : vector<32x128xf32>
    %cst_13 = arith.constant 1.000000e+00 : f32
    %28 = vector.broadcast %cst_13 : f32 to vector<32x128xf32>
    %29 = arith.addf %28, %27 : vector<32x128xf32>
    %30 = arith.divf %28, %29 : vector<32x128xf32>
    %31 = arith.mulf %22, %5 : vector<32x128xf32>
    %32 = arith.mulf %16, %24 : vector<32x128xf32>
    %33 = arith.addf %31, %32 : vector<32x128xf32>
    %34 = math.tanh %33 : vector<32x128xf32>
    %35 = arith.mulf %30, %34 : vector<32x128xf32>
    %c1_i32_14 = arith.constant 1 : i32
    %36 = arith.index_cast %c1_i32_14 : i32 to index
    %c0_15 = arith.constant 0 : index
    %c0_16 = arith.constant 0 : index
    %37 = vector.load %arg19[%36, %c0_15, %c0_16] : memref<8x128x128xf32, #tpu.memory_space<vmem>>, vector<1x128x128xf32>
    %38 = vector.shape_cast %37 : vector<1x128x128xf32> to vector<128x128xf32>
    %cst_17 = arith.constant dense<0.000000e+00> : vector<128x128xf32>
    %39 = tpu.matmul %1, %35, %cst_17 {dimension_numbers = #tpu.dot_dimension_numbers<[1], [0], [0], [1], [0, 0, 1, 1], [], []>} : vector<128x32xf32>, vector<32x128xf32>, vector<128x128xf32> -> vector<128x128xf32>
    %40 = arith.addf %38, %39 : vector<128x128xf32>
    %41 = vector.extract_strided_slice %40 {offsets = [0, 0], sizes = [32, 128], strides = [1, 1]} : vector<128x128xf32> to vector<32x128xf32>
    %42 = arith.negf %41 : vector<32x128xf32>
    %43 = math.exp %42 : vector<32x128xf32>
    %cst_18 = arith.constant 1.000000e+00 : f32
    %44 = vector.broadcast %cst_18 : f32 to vector<32x128xf32>
    %45 = arith.addf %44, %43 : vector<32x128xf32>
    %46 = arith.divf %44, %45 : vector<32x128xf32>
    %47 = vector.extract_strided_slice %40 {offsets = [32, 0], sizes = [32, 128], strides = [1, 1]} : vector<128x128xf32> to vector<32x128xf32>
    %48 = arith.negf %47 : vector<32x128xf32>
    %49 = math.exp %48 : vector<32x128xf32>
    %cst_19 = arith.constant 1.000000e+00 : f32
    %50 = vector.broadcast %cst_19 : f32 to vector<32x128xf32>
    %51 = arith.addf %50, %49 : vector<32x128xf32>
    %52 = arith.divf %50, %51 : vector<32x128xf32>
    %53 = vector.extract_strided_slice %40 {offsets = [64, 0], sizes = [32, 128], strides = [1, 1]} : vector<128x128xf32> to vector<32x128xf32>
    %54 = math.tanh %53 : vector<32x128xf32>
    %55 = vector.extract_strided_slice %40 {offsets = [96, 0], sizes = [32, 128], strides = [1, 1]} : vector<128x128xf32> to vector<32x128xf32>
    %56 = arith.negf %55 : vector<32x128xf32>
    %57 = math.exp %56 : vector<32x128xf32>
    %cst_20 = arith.constant 1.000000e+00 : f32
    %58 = vector.broadcast %cst_20 : f32 to vector<32x128xf32>
    %59 = arith.addf %58, %57 : vector<32x128xf32>
    %60 = arith.divf %58, %59 : vector<32x128xf32>
    %61 = arith.mulf %52, %33 : vector<32x128xf32>
    %62 = arith.mulf %46, %54 : vector<32x128xf32>
    %63 = arith.addf %61, %62 : vector<32x128xf32>
    %64 = math.tanh %63 : vector<32x128xf32>
    %65 = arith.mulf %60, %64 : vector<32x128xf32>
    %c2_i32 = arith.constant 2 : i32
    %66 = arith.index_cast %c2_i32 : i32 to index
    %c0_21 = arith.constant 0 : index
    %c0_22 = arith.constant 0 : index
    %67 = vector.load %arg19[%66, %c0_21, %c0_22] : memref<8x128x128xf32, #tpu.memory_space<vmem>>, vector<1x128x128xf32>
    %68 = vector.shape_cast %67 : vector<1x128x128xf32> to vector<128x128xf32>
    %cst_23 = arith.constant dense<0.000000e+00> : vector<128x128xf32>
    %69 = tpu.matmul %1, %65, %cst_23 {dimension_numbers = #tpu.dot_dimension_numbers<[1], [0], [0], [1], [0, 0, 1, 1], [], []>} : vector<128x32xf32>, vector<32x128xf32>, vector<128x128xf32> -> vector<128x128xf32>
    %70 = arith.addf %68, %69 : vector<128x128xf32>
    %71 = vector.extract_strided_slice %70 {offsets = [0, 0], sizes = [32, 128], strides = [1, 1]} : vector<128x128xf32> to vector<32x128xf32>
    %72 = arith.negf %71 : vector<32x128xf32>
    %73 = math.exp %72 : vector<32x128xf32>
    %cst_24 = arith.constant 1.000000e+00 : f32
    %74 = vector.broadcast %cst_24 : f32 to vector<32x128xf32>
    %75 = arith.addf %74, %73 : vector<32x128xf32>
    %76 = arith.divf %74, %75 : vector<32x128xf32>
    %77 = vector.extract_strided_slice %70 {offsets = [32, 0], sizes = [32, 128], strides = [1, 1]} : vector<128x128xf32> to vector<32x128xf32>
    %78 = arith.negf %77 : vector<32x128xf32>
    %79 = math.exp %78 : vector<32x128xf32>
    %cst_25 = arith.constant 1.000000e+00 : f32
    %80 = vector.broadcast %cst_25 : f32 to vector<32x128xf32>
    %81 = arith.addf %80, %79 : vector<32x128xf32>
    %82 = arith.divf %80, %81 : vector<32x128xf32>
    %83 = vector.extract_strided_slice %70 {offsets = [64, 0], sizes = [32, 128], strides = [1, 1]} : vector<128x128xf32> to vector<32x128xf32>
    %84 = math.tanh %83 : vector<32x128xf32>
    %85 = vector.extract_strided_slice %70 {offsets = [96, 0], sizes = [32, 128], strides = [1, 1]} : vector<128x128xf32> to vector<32x128xf32>
    %86 = arith.negf %85 : vector<32x128xf32>
    %87 = math.exp %86 : vector<32x128xf32>
    %cst_26 = arith.constant 1.000000e+00 : f32
    %88 = vector.broadcast %cst_26 : f32 to vector<32x128xf32>
    %89 = arith.addf %88, %87 : vector<32x128xf32>
    %90 = arith.divf %88, %89 : vector<32x128xf32>
    %91 = arith.mulf %82, %63 : vector<32x128xf32>
    %92 = arith.mulf %76, %84 : vector<32x128xf32>
    %93 = arith.addf %91, %92 : vector<32x128xf32>
    %94 = math.tanh %93 : vector<32x128xf32>
    %95 = arith.mulf %90, %94 : vector<32x128xf32>
    %c3_i32 = arith.constant 3 : i32
    %96 = arith.index_cast %c3_i32 : i32 to index
    %c0_27 = arith.constant 0 : index
    %c0_28 = arith.constant 0 : index
    %97 = vector.load %arg19[%96, %c0_27, %c0_28] : memref<8x128x128xf32, #tpu.memory_space<vmem>>, vector<1x128x128xf32>
    %98 = vector.shape_cast %97 : vector<1x128x128xf32> to vector<128x128xf32>
    %cst_29 = arith.constant dense<0.000000e+00> : vector<128x128xf32>
    %99 = tpu.matmul %1, %95, %cst_29 {dimension_numbers = #tpu.dot_dimension_numbers<[1], [0], [0], [1], [0, 0, 1, 1], [], []>} : vector<128x32xf32>, vector<32x128xf32>, vector<128x128xf32> -> vector<128x128xf32>
    %100 = arith.addf %98, %99 : vector<128x128xf32>
    %101 = vector.extract_strided_slice %100 {offsets = [0, 0], sizes = [32, 128], strides = [1, 1]} : vector<128x128xf32> to vector<32x128xf32>
    %102 = arith.negf %101 : vector<32x128xf32>
    %103 = math.exp %102 : vector<32x128xf32>
    %cst_30 = arith.constant 1.000000e+00 : f32
    %104 = vector.broadcast %cst_30 : f32 to vector<32x128xf32>
    %105 = arith.addf %104, %103 : vector<32x128xf32>
    %106 = arith.divf %104, %105 : vector<32x128xf32>
    %107 = vector.extract_strided_slice %100 {offsets = [32, 0], sizes = [32, 128], strides = [1, 1]} : vector<128x128xf32> to vector<32x128xf32>
    %108 = arith.negf %107 : vector<32x128xf32>
    %109 = math.exp %108 : vector<32x128xf32>
    %cst_31 = arith.constant 1.000000e+00 : f32
    %110 = vector.broadcast %cst_31 : f32 to vector<32x128xf32>
    %111 = arith.addf %110, %109 : vector<32x128xf32>
    %112 = arith.divf %110, %111 : vector<32x128xf32>
    %113 = vector.extract_strided_slice %100 {offsets = [64, 0], sizes = [32, 128], strides = [1, 1]} : vector<128x128xf32> to vector<32x128xf32>
    %114 = math.tanh %113 : vector<32x128xf32>
    %115 = vector.extract_strided_slice %100 {offsets = [96, 0], sizes = [32, 128], strides = [1, 1]} : vector<128x128xf32> to vector<32x128xf32>
    %116 = arith.negf %115 : vector<32x128xf32>
    %117 = math.exp %116 : vector<32x128xf32>
    %cst_32 = arith.constant 1.000000e+00 : f32
    %118 = vector.broadcast %cst_32 : f32 to vector<32x128xf32>
    %119 = arith.addf %118, %117 : vector<32x128xf32>
    %120 = arith.divf %118, %119 : vector<32x128xf32>
    %121 = arith.mulf %112, %93 : vector<32x128xf32>
    %122 = arith.mulf %106, %114 : vector<32x128xf32>
    %123 = arith.addf %121, %122 : vector<32x128xf32>
    %124 = math.tanh %123 : vector<32x128xf32>
    %125 = arith.mulf %120, %124 : vector<32x128xf32>
    %c4_i32 = arith.constant 4 : i32
    %126 = arith.index_cast %c4_i32 : i32 to index
    %c0_33 = arith.constant 0 : index
    %c0_34 = arith.constant 0 : index
    %127 = vector.load %arg19[%126, %c0_33, %c0_34] : memref<8x128x128xf32, #tpu.memory_space<vmem>>, vector<1x128x128xf32>
    %128 = vector.shape_cast %127 : vector<1x128x128xf32> to vector<128x128xf32>
    %cst_35 = arith.constant dense<0.000000e+00> : vector<128x128xf32>
    %129 = tpu.matmul %1, %125, %cst_35 {dimension_numbers = #tpu.dot_dimension_numbers<[1], [0], [0], [1], [0, 0, 1, 1], [], []>} : vector<128x32xf32>, vector<32x128xf32>, vector<128x128xf32> -> vector<128x128xf32>
    %130 = arith.addf %128, %129 : vector<128x128xf32>
    %131 = vector.extract_strided_slice %130 {offsets = [0, 0], sizes = [32, 128], strides = [1, 1]} : vector<128x128xf32> to vector<32x128xf32>
    %132 = arith.negf %131 : vector<32x128xf32>
    %133 = math.exp %132 : vector<32x128xf32>
    %cst_36 = arith.constant 1.000000e+00 : f32
    %134 = vector.broadcast %cst_36 : f32 to vector<32x128xf32>
    %135 = arith.addf %134, %133 : vector<32x128xf32>
    %136 = arith.divf %134, %135 : vector<32x128xf32>
    %137 = vector.extract_strided_slice %130 {offsets = [32, 0], sizes = [32, 128], strides = [1, 1]} : vector<128x128xf32> to vector<32x128xf32>
    %138 = arith.negf %137 : vector<32x128xf32>
    %139 = math.exp %138 : vector<32x128xf32>
    %cst_37 = arith.constant 1.000000e+00 : f32
    %140 = vector.broadcast %cst_37 : f32 to vector<32x128xf32>
    %141 = arith.addf %140, %139 : vector<32x128xf32>
    %142 = arith.divf %140, %141 : vector<32x128xf32>
    %143 = vector.extract_strided_slice %130 {offsets = [64, 0], sizes = [32, 128], strides = [1, 1]} : vector<128x128xf32> to vector<32x128xf32>
    %144 = math.tanh %143 : vector<32x128xf32>
    %145 = vector.extract_strided_slice %130 {offsets = [96, 0], sizes = [32, 128], strides = [1, 1]} : vector<128x128xf32> to vector<32x128xf32>
    %146 = arith.negf %145 : vector<32x128xf32>
    %147 = math.exp %146 : vector<32x128xf32>
    %cst_38 = arith.constant 1.000000e+00 : f32
    %148 = vector.broadcast %cst_38 : f32 to vector<32x128xf32>
    %149 = arith.addf %148, %147 : vector<32x128xf32>
    %150 = arith.divf %148, %149 : vector<32x128xf32>
    %151 = arith.mulf %142, %123 : vector<32x128xf32>
    %152 = arith.mulf %136, %144 : vector<32x128xf32>
    %153 = arith.addf %151, %152 : vector<32x128xf32>
    %154 = math.tanh %153 : vector<32x128xf32>
    %155 = arith.mulf %150, %154 : vector<32x128xf32>
    %c5_i32 = arith.constant 5 : i32
    %156 = arith.index_cast %c5_i32 : i32 to index
    %c0_39 = arith.constant 0 : index
    %c0_40 = arith.constant 0 : index
    %157 = vector.load %arg19[%156, %c0_39, %c0_40] : memref<8x128x128xf32, #tpu.memory_space<vmem>>, vector<1x128x128xf32>
    %158 = vector.shape_cast %157 : vector<1x128x128xf32> to vector<128x128xf32>
    %cst_41 = arith.constant dense<0.000000e+00> : vector<128x128xf32>
    %159 = tpu.matmul %1, %155, %cst_41 {dimension_numbers = #tpu.dot_dimension_numbers<[1], [0], [0], [1], [0, 0, 1, 1], [], []>} : vector<128x32xf32>, vector<32x128xf32>, vector<128x128xf32> -> vector<128x128xf32>
    %160 = arith.addf %158, %159 : vector<128x128xf32>
    %161 = vector.extract_strided_slice %160 {offsets = [0, 0], sizes = [32, 128], strides = [1, 1]} : vector<128x128xf32> to vector<32x128xf32>
    %162 = arith.negf %161 : vector<32x128xf32>
    %163 = math.exp %162 : vector<32x128xf32>
    %cst_42 = arith.constant 1.000000e+00 : f32
    %164 = vector.broadcast %cst_42 : f32 to vector<32x128xf32>
    %165 = arith.addf %164, %163 : vector<32x128xf32>
    %166 = arith.divf %164, %165 : vector<32x128xf32>
    %167 = vector.extract_strided_slice %160 {offsets = [32, 0], sizes = [32, 128], strides = [1, 1]} : vector<128x128xf32> to vector<32x128xf32>
    %168 = arith.negf %167 : vector<32x128xf32>
    %169 = math.exp %168 : vector<32x128xf32>
    %cst_43 = arith.constant 1.000000e+00 : f32
    %170 = vector.broadcast %cst_43 : f32 to vector<32x128xf32>
    %171 = arith.addf %170, %169 : vector<32x128xf32>
    %172 = arith.divf %170, %171 : vector<32x128xf32>
    %173 = vector.extract_strided_slice %160 {offsets = [64, 0], sizes = [32, 128], strides = [1, 1]} : vector<128x128xf32> to vector<32x128xf32>
    %174 = math.tanh %173 : vector<32x128xf32>
    %175 = vector.extract_strided_slice %160 {offsets = [96, 0], sizes = [32, 128], strides = [1, 1]} : vector<128x128xf32> to vector<32x128xf32>
    %176 = arith.negf %175 : vector<32x128xf32>
    %177 = math.exp %176 : vector<32x128xf32>
    %cst_44 = arith.constant 1.000000e+00 : f32
    %178 = vector.broadcast %cst_44 : f32 to vector<32x128xf32>
    %179 = arith.addf %178, %177 : vector<32x128xf32>
    %180 = arith.divf %178, %179 : vector<32x128xf32>
    %181 = arith.mulf %172, %153 : vector<32x128xf32>
    %182 = arith.mulf %166, %174 : vector<32x128xf32>
    %183 = arith.addf %181, %182 : vector<32x128xf32>
    %184 = math.tanh %183 : vector<32x128xf32>
    %185 = arith.mulf %180, %184 : vector<32x128xf32>
    %c6_i32 = arith.constant 6 : i32
    %186 = arith.index_cast %c6_i32 : i32 to index
    %c0_45 = arith.constant 0 : index
    %c0_46 = arith.constant 0 : index
    %187 = vector.load %arg19[%186, %c0_45, %c0_46] : memref<8x128x128xf32, #tpu.memory_space<vmem>>, vector<1x128x128xf32>
    %188 = vector.shape_cast %187 : vector<1x128x128xf32> to vector<128x128xf32>
    %cst_47 = arith.constant dense<0.000000e+00> : vector<128x128xf32>
    %189 = tpu.matmul %1, %185, %cst_47 {dimension_numbers = #tpu.dot_dimension_numbers<[1], [0], [0], [1], [0, 0, 1, 1], [], []>} : vector<128x32xf32>, vector<32x128xf32>, vector<128x128xf32> -> vector<128x128xf32>
    %190 = arith.addf %188, %189 : vector<128x128xf32>
    %191 = vector.extract_strided_slice %190 {offsets = [0, 0], sizes = [32, 128], strides = [1, 1]} : vector<128x128xf32> to vector<32x128xf32>
    %192 = arith.negf %191 : vector<32x128xf32>
    %193 = math.exp %192 : vector<32x128xf32>
    %cst_48 = arith.constant 1.000000e+00 : f32
    %194 = vector.broadcast %cst_48 : f32 to vector<32x128xf32>
    %195 = arith.addf %194, %193 : vector<32x128xf32>
    %196 = arith.divf %194, %195 : vector<32x128xf32>
    %197 = vector.extract_strided_slice %190 {offsets = [32, 0], sizes = [32, 128], strides = [1, 1]} : vector<128x128xf32> to vector<32x128xf32>
    %198 = arith.negf %197 : vector<32x128xf32>
    %199 = math.exp %198 : vector<32x128xf32>
    %cst_49 = arith.constant 1.000000e+00 : f32
    %200 = vector.broadcast %cst_49 : f32 to vector<32x128xf32>
    %201 = arith.addf %200, %199 : vector<32x128xf32>
    %202 = arith.divf %200, %201 : vector<32x128xf32>
    %203 = vector.extract_strided_slice %190 {offsets = [64, 0], sizes = [32, 128], strides = [1, 1]} : vector<128x128xf32> to vector<32x128xf32>
    %204 = math.tanh %203 : vector<32x128xf32>
    %205 = vector.extract_strided_slice %190 {offsets = [96, 0], sizes = [32, 128], strides = [1, 1]} : vector<128x128xf32> to vector<32x128xf32>
    %206 = arith.negf %205 : vector<32x128xf32>
    %207 = math.exp %206 : vector<32x128xf32>
    %cst_50 = arith.constant 1.000000e+00 : f32
    %208 = vector.broadcast %cst_50 : f32 to vector<32x128xf32>
    %209 = arith.addf %208, %207 : vector<32x128xf32>
    %210 = arith.divf %208, %209 : vector<32x128xf32>
    %211 = arith.mulf %202, %183 : vector<32x128xf32>
    %212 = arith.mulf %196, %204 : vector<32x128xf32>
    %213 = arith.addf %211, %212 : vector<32x128xf32>
    %214 = math.tanh %213 : vector<32x128xf32>
    %215 = arith.mulf %210, %214 : vector<32x128xf32>
    %c7_i32 = arith.constant 7 : i32
    %216 = arith.index_cast %c7_i32 : i32 to index
    %c0_51 = arith.constant 0 : index
    %c0_52 = arith.constant 0 : index
    %217 = vector.load %arg19[%216, %c0_51, %c0_52] : memref<8x128x128xf32, #tpu.memory_space<vmem>>, vector<1x128x128xf32>
    %218 = vector.shape_cast %217 : vector<1x128x128xf32> to vector<128x128xf32>
    %cst_53 = arith.constant dense<0.000000e+00> : vector<128x128xf32>
    %219 = tpu.matmul %1, %215, %cst_53 {dimension_numbers = #tpu.dot_dimension_numbers<[1], [0], [0], [1], [0, 0, 1, 1], [], []>} : vector<128x32xf32>, vector<32x128xf32>, vector<128x128xf32> -> vector<128x128xf32>
    %220 = arith.addf %218, %219 : vector<128x128xf32>
    %221 = vector.extract_strided_slice %220 {offsets = [0, 0], sizes = [32, 128], strides = [1, 1]} : vector<128x128xf32> to vector<32x128xf32>
    %222 = arith.negf %221 : vector<32x128xf32>
    %223 = math.exp %222 : vector<32x128xf32>
    %cst_54 = arith.constant 1.000000e+00 : f32
    %224 = vector.broadcast %cst_54 : f32 to vector<32x128xf32>
    %225 = arith.addf %224, %223 : vector<32x128xf32>
    %226 = arith.divf %224, %225 : vector<32x128xf32>
    %227 = vector.extract_strided_slice %220 {offsets = [32, 0], sizes = [32, 128], strides = [1, 1]} : vector<128x128xf32> to vector<32x128xf32>
    %228 = arith.negf %227 : vector<32x128xf32>
    %229 = math.exp %228 : vector<32x128xf32>
    %cst_55 = arith.constant 1.000000e+00 : f32
    %230 = vector.broadcast %cst_55 : f32 to vector<32x128xf32>
    %231 = arith.addf %230, %229 : vector<32x128xf32>
    %232 = arith.divf %230, %231 : vector<32x128xf32>
    %233 = vector.extract_strided_slice %220 {offsets = [64, 0], sizes = [32, 128], strides = [1, 1]} : vector<128x128xf32> to vector<32x128xf32>
    %234 = math.tanh %233 : vector<32x128xf32>
    %235 = vector.extract_strided_slice %220 {offsets = [96, 0], sizes = [32, 128], strides = [1, 1]} : vector<128x128xf32> to vector<32x128xf32>
    %236 = arith.negf %235 : vector<32x128xf32>
    %237 = math.exp %236 : vector<32x128xf32>
    %cst_56 = arith.constant 1.000000e+00 : f32
    %238 = vector.broadcast %cst_56 : f32 to vector<32x128xf32>
    %239 = arith.addf %238, %237 : vector<32x128xf32>
    %240 = arith.divf %238, %239 : vector<32x128xf32>
    %241 = arith.mulf %232, %213 : vector<32x128xf32>
    %242 = arith.mulf %226, %234 : vector<32x128xf32>
    %243 = arith.addf %241, %242 : vector<32x128xf32>
    %244 = math.tanh %243 : vector<32x128xf32>
    %245 = arith.mulf %240, %244 : vector<32x128xf32>
    %c8_i32_57 = arith.constant 8 : i32
    %c0_58 = arith.constant 0 : index
    %c0_59 = arith.constant 0 : index
    %246 = vector.load %arg6[%c0_58, %c0_59] : memref<16x32xf32, #tpu.memory_space<vmem>>, vector<16x32xf32>
    %cst_60 = arith.constant dense<0.000000e+00> : vector<16x128xf32>
    %247 = tpu.matmul %246, %245, %cst_60 {dimension_numbers = #tpu.dot_dimension_numbers<[1], [0], [0], [1], [0, 0, 1, 1], [], []>} : vector<16x32xf32>, vector<32x128xf32>, vector<16x128xf32> -> vector<16x128xf32>
    %c0_61 = arith.constant 0 : index
    %c0_62 = arith.constant 0 : index
    %248 = vector.load %arg7[%c0_61, %c0_62] : memref<16x1xf32, #tpu.memory_space<vmem>>, vector<16x1xf32>
    %249 = vector.broadcast %248 : vector<16x1xf32> to vector<16x128xf32>
    %250 = arith.addf %247, %249 : vector<16x128xf32>
    %cst_63 = arith.constant 0.000000e+00 : f32
    %251 = vector.broadcast %cst_63 : f32 to vector<16x128xf32>
    %252 = arith.cmpf oge, %250, %251 : vector<16x128xf32>
    %cst_64 = arith.constant 2.000000e-01 : f32
    %253 = vector.broadcast %cst_64 : f32 to vector<16x128xf32>
    %254 = arith.mulf %253, %250 : vector<16x128xf32>
    %255 = arith.select %252, %250, %254 : vector<16x128xi1>, vector<16x128xf32>
    %c0_65 = arith.constant 0 : index
    %c0_66 = arith.constant 0 : index
    %256 = vector.load %arg8[%c0_65, %c0_66] : memref<16x16xf32, #tpu.memory_space<vmem>>, vector<16x16xf32>
    %cst_67 = arith.constant dense<0.000000e+00> : vector<16x128xf32>
    %257 = tpu.matmul %256, %255, %cst_67 {dimension_numbers = #tpu.dot_dimension_numbers<[1], [0], [0], [1], [0, 0, 1, 1], [], []>} : vector<16x16xf32>, vector<16x128xf32>, vector<16x128xf32> -> vector<16x128xf32>
    %c0_68 = arith.constant 0 : index
    %c0_69 = arith.constant 0 : index
    %258 = vector.load %arg9[%c0_68, %c0_69] : memref<16x1xf32, #tpu.memory_space<vmem>>, vector<16x1xf32>
    %259 = vector.broadcast %258 : vector<16x1xf32> to vector<16x128xf32>
    %260 = arith.addf %257, %259 : vector<16x128xf32>
    %cst_70 = arith.constant 0.000000e+00 : f32
    %261 = vector.broadcast %cst_70 : f32 to vector<16x128xf32>
    %262 = arith.cmpf oge, %260, %261 : vector<16x128xf32>
    %cst_71 = arith.constant 2.000000e-01 : f32
    %263 = vector.broadcast %cst_71 : f32 to vector<16x128xf32>
    %264 = arith.mulf %263, %260 : vector<16x128xf32>
    %265 = arith.select %262, %260, %264 : vector<16x128xi1>, vector<16x128xf32>
    %c0_72 = arith.constant 0 : index
    %c0_73 = arith.constant 0 : index
    %266 = vector.load %arg10[%c0_72, %c0_73] : memref<15x16xf32, #tpu.memory_space<vmem>>, vector<15x16xf32>
    %cst_74 = arith.constant dense<0.000000e+00> : vector<15x128xf32>
    %267 = tpu.matmul %266, %265, %cst_74 {dimension_numbers = #tpu.dot_dimension_numbers<[1], [0], [0], [1], [0, 0, 1, 1], [], []>} : vector<15x16xf32>, vector<16x128xf32>, vector<15x128xf32> -> vector<15x128xf32>
    %c0_75 = arith.constant 0 : index
    %c0_76 = arith.constant 0 : index
    %268 = vector.load %arg11[%c0_75, %c0_76] : memref<15x1xf32, #tpu.memory_space<vmem>>, vector<15x1xf32>
    %269 = vector.broadcast %268 : vector<15x1xf32> to vector<15x128xf32>
    %270 = arith.addf %267, %269 : vector<15x128xf32>
    %c0_77 = arith.constant 0 : index
    %c0_78 = arith.constant 0 : index
    %271 = vector.load %arg2[%c0_77, %c0_78] : memref<1x128xf32, #tpu.memory_space<vmem>>, vector<1x128xf32>
    %c0_79 = arith.constant 0 : index
    %c0_80 = arith.constant 0 : index
    %272 = vector.load %arg12[%c0_79, %c0_80] : memref<16x16xf32, #tpu.memory_space<vmem>>, vector<16x16xf32>
    %273 = vector.extract_strided_slice %272 {offsets = [0, 0], sizes = [16, 15], strides = [1, 1]} : vector<16x16xf32> to vector<16x15xf32>
    %cst_81 = arith.constant dense<0.000000e+00> : vector<16x128xf32>
    %274 = tpu.matmul %273, %270, %cst_81 {dimension_numbers = #tpu.dot_dimension_numbers<[1], [0], [0], [1], [0, 0, 1, 1], [], []>} : vector<16x15xf32>, vector<15x128xf32>, vector<16x128xf32> -> vector<16x128xf32>
    %275 = vector.extract_strided_slice %272 {offsets = [0, 15], sizes = [16, 1], strides = [1, 1]} : vector<16x16xf32> to vector<16x1xf32>
    %276 = vector.broadcast %275 : vector<16x1xf32> to vector<16x128xf32>
    %277 = vector.broadcast %271 : vector<1x128xf32> to vector<16x128xf32>
    %278 = arith.mulf %276, %277 : vector<16x128xf32>
    %279 = arith.addf %274, %278 : vector<16x128xf32>
    %c0_82 = arith.constant 0 : index
    %c0_83 = arith.constant 0 : index
    %280 = vector.load %arg13[%c0_82, %c0_83] : memref<16x1xf32, #tpu.memory_space<vmem>>, vector<16x1xf32>
    %281 = vector.broadcast %280 : vector<16x1xf32> to vector<16x128xf32>
    %282 = arith.addf %279, %281 : vector<16x128xf32>
    %cst_84 = arith.constant 0.000000e+00 : f32
    %283 = vector.broadcast %cst_84 : f32 to vector<16x128xf32>
    %284 = arith.cmpf oge, %282, %283 : vector<16x128xf32>
    %cst_85 = arith.constant 2.000000e-01 : f32
    %285 = vector.broadcast %cst_85 : f32 to vector<16x128xf32>
    %286 = arith.mulf %285, %282 : vector<16x128xf32>
    %287 = arith.select %284, %282, %286 : vector<16x128xi1>, vector<16x128xf32>
    %c0_86 = arith.constant 0 : index
    %c0_87 = arith.constant 0 : index
    %288 = vector.load %arg14[%c0_86, %c0_87] : memref<16x16xf32, #tpu.memory_space<vmem>>, vector<16x16xf32>
    %cst_88 = arith.constant dense<0.000000e+00> : vector<16x128xf32>
    %289 = tpu.matmul %288, %287, %cst_88 {dimension_numbers = #tpu.dot_dimension_numbers<[1], [0], [0], [1], [0, 0, 1, 1], [], []>} : vector<16x16xf32>, vector<16x128xf32>, vector<16x128xf32> -> vector<16x128xf32>
    %c0_89 = arith.constant 0 : index
    %c0_90 = arith.constant 0 : index
    %290 = vector.load %arg15[%c0_89, %c0_90] : memref<16x1xf32, #tpu.memory_space<vmem>>, vector<16x1xf32>
    %291 = vector.broadcast %290 : vector<16x1xf32> to vector<16x128xf32>
    %292 = arith.addf %289, %291 : vector<16x128xf32>
    %cst_91 = arith.constant 0.000000e+00 : f32
    %293 = vector.broadcast %cst_91 : f32 to vector<16x128xf32>
    %294 = arith.cmpf oge, %292, %293 : vector<16x128xf32>
    %cst_92 = arith.constant 2.000000e-01 : f32
    %295 = vector.broadcast %cst_92 : f32 to vector<16x128xf32>
    %296 = arith.mulf %295, %292 : vector<16x128xf32>
    %297 = arith.select %294, %292, %296 : vector<16x128xi1>, vector<16x128xf32>
    %c0_93 = arith.constant 0 : index
    %c0_94 = arith.constant 0 : index
    %298 = vector.load %arg16[%c0_93, %c0_94] : memref<1x16xf32, #tpu.memory_space<vmem>>, vector<1x16xf32>
    %cst_95 = arith.constant dense<0.000000e+00> : vector<1x128xf32>
    %299 = tpu.matmul %298, %297, %cst_95 {dimension_numbers = #tpu.dot_dimension_numbers<[1], [0], [0], [1], [0, 0, 1, 1], [], []>} : vector<1x16xf32>, vector<16x128xf32>, vector<1x128xf32> -> vector<1x128xf32>
    %c0_96 = arith.constant 0 : index
    %c0_97 = arith.constant 0 : index
    %300 = vector.load %arg17[%c0_96, %c0_97] : memref<1x1xf32, #tpu.memory_space<vmem>>, vector<1x1xf32>
    %301 = vector.broadcast %300 : vector<1x1xf32> to vector<1x128xf32>
    %302 = arith.addf %299, %301 : vector<1x128xf32>
    %c0_98 = arith.constant 0 : index
    %c0_99 = arith.constant 0 : index
    %303 = vector.load %arg18[%c0_98, %c0_99] : memref<1x128xf32, #tpu.memory_space<vmem>>, vector<1x128xf32>
    tpu.vector_store %arg18[%c0_98, %c0_99], %302 {strides = array<i32>} : memref<1x128xf32, #tpu.memory_space<vmem>>, vector<1x128xf32>,
    return
  }
  func.func @transform_0(%arg0: i32) -> (i32, i32) {
    %c0_i32 = arith.constant 0 : i32
    %c0_i32_0 = arith.constant 0 : i32
    return %c0_i32, %arg0 : i32, i32
  }
  func.func @transform_1(%arg0: i32) -> (i32, i32) {
    %c0_i32 = arith.constant 0 : i32
    %c0_i32_0 = arith.constant 0 : i32
    return %c0_i32, %arg0 : i32, i32
  }
  func.func @transform_2(%arg0: i32) -> (i32, i32) {
    %c0_i32 = arith.constant 0 : i32
    %c0_i32_0 = arith.constant 0 : i32
    %c0_i32_1 = arith.constant 0 : i32
    return %c0_i32, %c0_i32_0 : i32, i32
  }
  func.func @transform_3(%arg0: i32) -> (i32, i32) {
    %c0_i32 = arith.constant 0 : i32
    %c0_i32_0 = arith.constant 0 : i32
    %c0_i32_1 = arith.constant 0 : i32
    return %c0_i32, %c0_i32_0 : i32, i32
  }
  func.func @transform_4(%arg0: i32) -> (i32, i32) {
    %c0_i32 = arith.constant 0 : i32
    %c0_i32_0 = arith.constant 0 : i32
    %c0_i32_1 = arith.constant 0 : i32
    return %c0_i32, %c0_i32_0 : i32, i32
  }
  func.func @transform_5(%arg0: i32) -> (i32, i32) {
    %c0_i32 = arith.constant 0 : i32
    %c0_i32_0 = arith.constant 0 : i32
    %c0_i32_1 = arith.constant 0 : i32
    return %c0_i32, %c0_i32_0 : i32, i32
  }
  func.func @transform_6(%arg0: i32) -> (i32, i32) {
    %c0_i32 = arith.constant 0 : i32
    %c0_i32_0 = arith.constant 0 : i32
    %c0_i32_1 = arith.constant 0 : i32
    return %c0_i32, %c0_i32_0 : i32, i32
  }
  func.func @transform_7(%arg0: i32) -> (i32, i32) {
    %c0_i32 = arith.constant 0 : i32
    %c0_i32_0 = arith.constant 0 : i32
    %c0_i32_1 = arith.constant 0 : i32
    return %c0_i32, %c0_i32_0 : i32, i32
  }
  func.func @transform_8(%arg0: i32) -> (i32, i32) {
    %c0_i32 = arith.constant 0 : i32
    %c0_i32_0 = arith.constant 0 : i32
    %c0_i32_1 = arith.constant 0 : i32
    return %c0_i32, %c0_i32_0 : i32, i32
  }
  func.func @transform_9(%arg0: i32) -> (i32, i32) {
    %c0_i32 = arith.constant 0 : i32
    %c0_i32_0 = arith.constant 0 : i32
    %c0_i32_1 = arith.constant 0 : i32
    return %c0_i32, %c0_i32_0 : i32, i32
  }
  func.func @transform_10(%arg0: i32) -> (i32, i32) {
    %c0_i32 = arith.constant 0 : i32
    %c0_i32_0 = arith.constant 0 : i32
    %c0_i32_1 = arith.constant 0 : i32
    return %c0_i32, %c0_i32_0 : i32, i32
  }
  func.func @transform_11(%arg0: i32) -> (i32, i32) {
    %c0_i32 = arith.constant 0 : i32
    %c0_i32_0 = arith.constant 0 : i32
    %c0_i32_1 = arith.constant 0 : i32
    return %c0_i32, %c0_i32_0 : i32, i32
  }
  func.func @transform_12(%arg0: i32) -> (i32, i32) {
    %c0_i32 = arith.constant 0 : i32
    %c0_i32_0 = arith.constant 0 : i32
    %c0_i32_1 = arith.constant 0 : i32
    return %c0_i32, %c0_i32_0 : i32, i32
  }
  func.func @transform_13(%arg0: i32) -> (i32, i32) {
    %c0_i32 = arith.constant 0 : i32
    %c0_i32_0 = arith.constant 0 : i32
    %c0_i32_1 = arith.constant 0 : i32
    return %c0_i32, %c0_i32_0 : i32, i32
  }
  func.func @transform_14(%arg0: i32) -> (i32, i32) {
    %c0_i32 = arith.constant 0 : i32
    %c0_i32_0 = arith.constant 0 : i32
    %c0_i32_1 = arith.constant 0 : i32
    return %c0_i32, %c0_i32_0 : i32, i32
  }
  func.func @transform_15(%arg0: i32) -> (i32, i32) {
    %c0_i32 = arith.constant 0 : i32
    %c0_i32_0 = arith.constant 0 : i32
    %c0_i32_1 = arith.constant 0 : i32
    return %c0_i32, %c0_i32_0 : i32, i32
  }
  func.func @transform_16(%arg0: i32) -> (i32, i32) {
    %c0_i32 = arith.constant 0 : i32
    %c0_i32_0 = arith.constant 0 : i32
    %c0_i32_1 = arith.constant 0 : i32
    return %c0_i32, %c0_i32_0 : i32, i32
  }
  func.func @transform_17(%arg0: i32) -> (i32, i32) {
    %c0_i32 = arith.constant 0 : i32
    %c0_i32_0 = arith.constant 0 : i32
    return %c0_i32, %arg0 : i32, i32
  }
}

</mosaic_0001>

<bundles_post_ra>
// kernel: tpu_custom_call.1
= control target key start
LH: loop header
LB: loop body
LE: loop exit
PB: predicated region body
PF: predicated region fallthrough
CT: control target
= control target key end

     0   :  { %s5438_s0 = inlined_call_operand.vmem [shape: f32[8,128], index: 0, kind: input, shape index: {}]   ;;  %s5439_s1 = inlined_call_operand.vmem [shape: f32[1,128], index: 1, kind: input, shape index: {}]   ;;  %s5440_s2 = inlined_call_operand.vmem [shape: f32[128,1], index: 2, kind: input, shape index: {}]   ;;  %s5441_s3 = inlined_call_operand.vmem [shape: f32[128,32], index: 3, kind: input, shape index: {}]   ;;  %s5442_s4 = inlined_call_operand.vmem [shape: f32[128,1], index: 4, kind: input, shape index: {}]   ;;  %s5443_s5 = inlined_call_operand.vmem [shape: f32[16,32], index: 5, kind: input, shape index: {}]   ;;  %s5444_s6 = inlined_call_operand.vmem [shape: f32[16,1], index: 6, kind: input, shape index: {}]   ;;  %s5445_s7 = inlined_call_operand.vmem [shape: f32[16,16], index: 7, kind: input, shape index: {}]   ;;  %s5446_s8 = inlined_call_operand.vmem [shape: f32[16,1], index: 8, kind: input, shape index: {}]   ;;  %s5447_s9 = inlined_call_operand.vmem [shape: f32[15,16], index: 9, kind: input, shape index: {}]   ;;  %s5448_s10 = inlined_call_operand.vmem [shape: f32[15,1], index: 10, kind: input, shape index: {}]   ;;  %s5449_s11 = inlined_call_operand.vmem [shape: f32[16,16], index: 11, kind: input, shape index: {}]   ;;  %s5450_s12 = inlined_call_operand.vmem [shape: f32[16,1], index: 12, kind: input, shape index: {}]   ;;  %s5451_s13 = inlined_call_operand.vmem [shape: f32[16,16], index: 13, kind: input, shape index: {}]   ;;  %s5452_s14 = inlined_call_operand.vmem [shape: f32[16,1], index: 14, kind: input, shape index: {}]   ;;  %s5453_s15 = inlined_call_operand.vmem [shape: f32[1,16], index: 15, kind: input, shape index: {}]   ;;  %s5454_s16 = inlined_call_operand.<no memory space> [shape: f32[1,1], index: 16, kind: input, shape index: {}]   ;;  %s5455_s17 = inlined_call_operand.hbm [shape: f32[1,128], index: 17, kind: output, shape index: {}]  }
   0x1   :  { %5456 = sst [smem:[#allocation20_spill]] %s5438_s0  ;;  %v22_v0 = vstv %s5454_s16 }
   0x2   :  { %5457 = sst [smem:[#allocation21_spill]] %s5439_s1  ;;  %23 = vst [vmem:[#allocation3] sm:$0x1] %v22_v0 }
   0x3   :  { %24 = vsyncpa [#allocation5], 0  ;;  %v4674_v1 = vld [vmem:[%s5440_s2] sm:$0xff]  ;;  %v4679_v2 = vld [vmem:[%s5440_s2 + $0x8] sm:$0xff]  ;;  %s4911_s20 = smov 0  }
   0x4   :  { %5458 = vst [vmem:[#allocation7_spill] sm:$0xff] %v4674_v1  ;;  %5459 = vst [vmem:[#allocation8_spill] sm:$0xff] %v4679_v2  ;;  %v4684_v3 = vld [vmem:[%s5440_s2 + $0x10] sm:$0xff]  ;;  %v4689_v4 = vld [vmem:[%s5440_s2 + $0x18] sm:$0xff] }
   0x5   :  { %5460 = vst [vmem:[#allocation9_spill] sm:$0xff] %v4684_v3  ;;  %5461 = vst [vmem:[#allocation10_spill] sm:$0xff] %v4689_v4  ;;  %v4694_v5 = vld [vmem:[%s5440_s2 + $0x20] sm:$0xff]  ;;  %v4699_v6 = vld [vmem:[%s5440_s2 + $0x28] sm:$0xff] }
   0x6   :  { %5462 = vst [vmem:[#allocation11_spill] sm:$0xff] %v4694_v5  ;;  %5463 = vst [vmem:[#allocation12_spill] sm:$0xff] %v4699_v6  ;;  %v4704_v7 = vld [vmem:[%s5440_s2 + $0x30] sm:$0xff]  ;;  %v4709_v8 = vld [vmem:[%s5440_s2 + $0x38] sm:$0xff] }
   0x7   :  { %5464 = vst [vmem:[#allocation13_spill] sm:$0xff] %v4704_v7  ;;  %5465 = vst [vmem:[#allocation14_spill] sm:$0xff] %v4709_v8  ;;  %v4714_v9 = vld [vmem:[%s5440_s2 + $0x40] sm:$0xff]  ;;  %v4719_v10 = vld [vmem:[%s5440_s2 + $0x48] sm:$0xff] }
   0x8   :  { %5466 = vst [vmem:[#allocation15_spill] sm:$0xff] %v4714_v9  ;;  %5467 = vst [vmem:[#allocation16_spill] sm:$0xff] %v4719_v10  ;;  %v4724_v11 = vld [vmem:[%s5440_s2 + $0x50] sm:$0xff]  ;;  %v4729_v12 = vld [vmem:[%s5440_s2 + $0x58] sm:$0xff] }
   0x9   :  { %5468 = vst [vmem:[#allocation17_spill] sm:$0xff] %v4724_v11  ;;  %5469 = vst [vmem:[#allocation18_spill] sm:$0xff] %v4729_v12  ;;  %v4734_v13 = vld [vmem:[%s5440_s2 + $0x60] sm:$0xff]  ;;  %v4739_v14 = vld [vmem:[%s5440_s2 + $0x68] sm:$0xff] }
   0xa   :  { %5470 = vst [vmem:[#allocation19_spill] sm:$0xff] %v4734_v13  ;;  %v4744_v15 = vld [vmem:[%s5440_s2 + $0x70] sm:$0xff]  ;;  %v4749_v16 = vld [vmem:[%s5440_s2 + $0x78] sm:$0xff]  ;;  %v4754_v17 = vld [vmem:[%s5441_s3] sm:$0xff] }
   0xb   :  { %v4759_v18 = vld [vmem:[%s5441_s3 + $0x8] sm:$0xff]  ;;  %v4764_v19 = vld [vmem:[%s5441_s3 + $0x10] sm:$0xff]  ;;  %v4769_v20 = vld [vmem:[%s5441_s3 + $0x18] sm:$0xff] }
   0xc   :  { %v4774_v21 = vld [vmem:[%s5441_s3 + $0x20] sm:$0xff]  ;;  %v4779_v22 = vld [vmem:[%s5441_s3 + $0x28] sm:$0xff]  ;;  %v4784_v23 = vld [vmem:[%s5441_s3 + $0x30] sm:$0xff] }
   0xd   :  { %v4789_v24 = vld [vmem:[%s5441_s3 + $0x38] sm:$0xff]  ;;  %v4794_v25 = vld [vmem:[%s5441_s3 + $0x40] sm:$0xff]  ;;  %v4799_v26 = vld [vmem:[%s5441_s3 + $0x48] sm:$0xff] }
   0xe   :  { %v4804_v27 = vld [vmem:[%s5441_s3 + $0x50] sm:$0xff]  ;;  %v4809_v28 = vld [vmem:[%s5441_s3 + $0x58] sm:$0xff]  ;;  %v4814_v29 = vld [vmem:[%s5441_s3 + $0x60] sm:$0xff] }
   0xf   :  { %v4819_v30 = vld [vmem:[%s5441_s3 + $0x68] sm:$0xff]  ;;  %v4824_v31 = vld [vmem:[%s5441_s3 + $0x70] sm:$0xff]  ;;  %v4829_v32 = vld [vmem:[%s5441_s3 + $0x78] sm:$0xff] }
  0x10   :  { %v4834_v33 = vld [vmem:[%s5442_s4] sm:$0xff]  ;;  %v4839_v34 = vld [vmem:[%s5442_s4 + $0x8] sm:$0xff]  ;;  %v4844_v35 = vld [vmem:[%s5442_s4 + $0x10] sm:$0xff] }
  0x11   :  { %v4849_v36 = vld [vmem:[%s5442_s4 + $0x18] sm:$0xff]  ;;  %v4854_v37 = vld [vmem:[%s5442_s4 + $0x20] sm:$0xff]  ;;  %v4859_v38 = vld [vmem:[%s5442_s4 + $0x28] sm:$0xff] }
  0x12   :  { %v4864_v39 = vld [vmem:[%s5442_s4 + $0x30] sm:$0xff]  ;;  %v4869_v40 = vld [vmem:[%s5442_s4 + $0x38] sm:$0xff]  ;;  %v4874_v41 = vld [vmem:[%s5442_s4 + $0x40] sm:$0xff] }
  0x13   :  { %v4879_v42 = vld [vmem:[%s5442_s4 + $0x48] sm:$0xff]  ;;  %v4884_v43 = vld [vmem:[%s5442_s4 + $0x50] sm:$0xff]  ;;  %v4889_v44 = vld [vmem:[%s5442_s4 + $0x58] sm:$0xff] }
  0x14   :  { %v4894_v45 = vld [vmem:[%s5442_s4 + $0x60] sm:$0xff]  ;;  %v4899_v46 = vld [vmem:[%s5442_s4 + $0x68] sm:$0xff]  ;;  %v4904_v47 = vld [vmem:[%s5442_s4 + $0x70] sm:$0xff] }
  0x15   :  { %v4909_v48 = vld [vmem:[%s5442_s4 + $0x78] sm:$0xff] }
  0x16 LB: > { %v4570_v49 = vmov 0   ;;  %v5471_v3 = vld [vmem:[#allocation9_spill] sm:$0xff]  ;;  %v5472_v1 = vld [vmem:[#allocation7_spill] sm:$0xff]  ;;  %v5473_v4 = vld [vmem:[#allocation10_spill] sm:$0xff]  ;;  %s5484_s22 = sld [smem:[#allocation20_spill]]  ;;  %s3201_s24 = sshll.u32 %s4568_s20, 7  ;;  %s4568_s20 = sphi %s4911_s20, %s112_s20  }
  0x17   : > { %4019 = vset.pattern.permute.xlu1 %v4570_v49  ;;  %4018 = vset.pattern.permute.xlu0 %v4570_v49  ;;  %v5474_v2 = vld [vmem:[#allocation8_spill] sm:$0xff]  ;;  %v5476_v5 = vld [vmem:[#allocation11_spill] sm:$0xff]  ;;  %v5477_v8 = vld [vmem:[#allocation14_spill] sm:$0xff]  ;;  %s4953_s25 = scalar_lea.vmem [#allocation2], %s3201_s24 }
  0x18   : > { %131 = vperm.xlu1 %4019, %v5471_v3   ;;  %121 = vperm.xlu0 %4018, %v5472_v1   ;;  %v5475_v6 = vld [vmem:[#allocation12_spill] sm:$0xff]  ;;  %v5478_v7 = vld [vmem:[#allocation13_spill] sm:$0xff]  ;;  %v5480_v9 = vld [vmem:[#allocation15_spill] sm:$0xff] }
  0x19   : > { %v5479_v10 = vld [vmem:[#allocation16_spill] sm:$0xff]  ;;  %v5481_v12 = vld [vmem:[#allocation18_spill] sm:$0xff]  ;;  %v5482_v11 = vld [vmem:[#allocation17_spill] sm:$0xff] }
  0x1a   : > { %v5483_v13 = vld [vmem:[#allocation19_spill] sm:$0xff] }
  0x1c   : > { %136 = vperm.xlu1 %4019, %v5473_v4   ;;  %126 = vperm.xlu0 %4018, %v5474_v2   ;;  %s113_s23 = scalar_lea.vmem %s5484_s22, %s4568_s20  ;;  %s112_s20 = sadd.s32 1, %s4568_s20  }
  0x1d   : > { %v3200_v0 = vld [vmem:[%s113_s23] ss:$0 sm:$0xff]  ;;  %p109_p0 = scmp.ge.s32.totalorder %s112_s20, 8  }
  0x1e   :  { %vm345_vm0 = vcmask (%p109_p0), 261120   ;;  %vm2684_vm1 = vcmask (%p109_p0), 130048   ;;  %vm2888_vm6 = vcmask (%p109_p0), 121856   ;;  %vm2893_vm7 = vcmask (%p109_p0), 1046528   ;;  %s5485_s1 = sld [smem:[#allocation21_spill]] (%p109_p0) }
  0x1f   :  { %3623 = vmatprep.mubr.msk.f32.mxu0 (%p109_p0), %vm345_vm0, %v4754_v17  ;;  %3655 = vmatprep.mubr.msk.f32.mxu1 (%p109_p0), %vm345_vm0, %v4754_v17  ;;  %vm4574_vm8 = vmmov (%p109_p0), 1   ;;  %vm4576_vm12 = vmmov (%p109_p0), 0  }
  0x20   : > { %146 = vperm.xlu1 %4019, %v5475_v6   ;;  %141 = vperm.xlu0 %4018, %v5476_v5   ;;  %vm3990_vm9 = vmpackc.low (%p109_p0), %vm2893_vm7, %vm4574_vm8 }
  0x24   : > { %156 = vperm.xlu1 %4019, %v5477_v8   ;;  %151 = vperm.xlu0 %4018, %v5478_v7  }
  0x28   : > { %166 = vperm.xlu1 %4019, %v5479_v10   ;;  %161 = vperm.xlu0 %4018, %v5480_v9  }
  0x2c   : > { %176 = vperm.xlu1 %4019, %v5481_v12   ;;  %171 = vperm.xlu0 %4018, %v5482_v11  }
  0x30   : > { %186 = vperm.xlu1 %4019, %v4739_v14   ;;  %181 = vperm.xlu0 %4018, %v5483_v13  }
  0x34   : > { %196 = vperm.xlu1 %4019, %v4749_v16   ;;  %191 = vperm.xlu0 %4018, %v4744_v15  }
  0x38   : > { %222 = vperm.xlu1 %4019, %v4839_v34   ;;  %217 = vperm.xlu0 %4018, %v4834_v33  }
  0x3c   : > { %232 = vperm.xlu1 %4019, %v4849_v36   ;;  %227 = vperm.xlu0 %4018, %v4844_v35  }
  0x40   : > { %242 = vperm.xlu1 %4019, %v4859_v38   ;;  %237 = vperm.xlu0 %4018, %v4854_v37  }
  0x44   : > { %252 = vperm.xlu1 %4019, %v4869_v40   ;;  %247 = vperm.xlu0 %4018, %v4864_v39  }
  0x48   : > { %262 = vperm.xlu1 %4019, %v4879_v42   ;;  %257 = vperm.xlu0 %4018, %v4874_v41  }
  0x4c   : > { %272 = vperm.xlu1 %4019, %v4889_v44   ;;  %267 = vperm.xlu0 %4018, %v4884_v43  }
  0x50   : > { %282 = vperm.xlu1 %4019, %v4899_v46   ;;  %277 = vperm.xlu0 %4018, %v4894_v45  }
  0x54   : > { %292 = vperm.xlu1 %4019, %v4909_v48   ;;  %287 = vperm.xlu0 %4018, %v4904_v47  }
  0x97   : > { %v132_v50 = vpop.permute.xlu1 %131  ;;  %v122_v51 = vpop.permute.xlu0 %121 }
  0x98   : > { %v199_v2 = vmul.f32 %v3200_v0, %v122_v51  ;;  %v201_v8 = vmul.f32 %v3200_v0, %v132_v50 }
  0x9b   : > { %v137_v52 = vpop.permute.xlu1 %136  ;;  %v127_v53 = vpop.permute.xlu0 %126 }
  0x9c   : > { %v200_v3 = vmul.f32 %v3200_v0, %v127_v53  ;;  %v202_v9 = vmul.f32 %v3200_v0, %v137_v52 }
  0x9f   : > { %v147_v54 = vpop.permute.xlu1 %146  ;;  %v142_v55 = vpop.permute.xlu0 %141 }
  0xa0   : > { %v204_v12 = vmul.f32 %v3200_v0, %v147_v54  ;;  %v203_v13 = vmul.f32 %v3200_v0, %v142_v55 }
  0xa3   : > { %v157_v56 = vpop.permute.xlu1 %156  ;;  %v152_v57 = vpop.permute.xlu0 %151 }
  0xa4   : > { %v206_v50 = vmul.f32 %v3200_v0, %v157_v56  ;;  %v205_v52 = vmul.f32 %v3200_v0, %v152_v57 }
  0xa7   : > { %v167_v58 = vpop.permute.xlu1 %166  ;;  %v162_v59 = vpop.permute.xlu0 %161 }
  0xab   : > { %v177_v60 = vpop.permute.xlu1 %176  ;;  %v172_v61 = vpop.permute.xlu0 %171 }
  0xac   : > { %v210_v56 = vmul.f32 %v3200_v0, %v177_v60  ;;  %v209_v57 = vmul.f32 %v3200_v0, %v172_v61 }
  0xaf   : > { %v187_v62 = vpop.permute.xlu1 %186  ;;  %v182_v63 = vpop.permute.xlu0 %181 }
  0xb3   : > { %v197_v49 = vpop.permute.xlu1 %196  ;;  %v192_v1 = vpop.permute.xlu0 %191 }
  0xb4   : > { %v214_v60 = vmul.f32 %v3200_v0, %v197_v49  ;;  %v213_v61 = vmul.f32 %v3200_v0, %v192_v1 }
  0xb7   : > { %v223_v4 = vpop.permute.xlu1 %222  ;;  %v218_v5 = vpop.permute.xlu0 %217 }
  0xb8   : > { %v296_v6 = vadd.f32 %v223_v4, %v200_v3  ;;  %v295_v7 = vadd.f32 %v218_v5, %v199_v2 }
  0xba   : > { %314 = vst [vmem:[%s4953_s25 + $0x8] sm:$0xff] %v296_v6  ;;  %313 = vst [vmem:[%s4953_s25] sm:$0xff] %v295_v7 }
  0xbb   : > { %v233_v10 = vpop.permute.xlu1 %232  ;;  %v228_v11 = vpop.permute.xlu0 %227 }
  0xbc   : > { %v298_v51 = vadd.f32 %v233_v10, %v202_v9  ;;  %v297_v53 = vadd.f32 %v228_v11, %v201_v8  ;;  %v208_v10 = vmul.f32 %v3200_v0, %v167_v58  ;;  %v207_v11 = vmul.f32 %v3200_v0, %v162_v59 }
  0xbd   : > { %v212_v58 = vmul.f32 %v3200_v0, %v187_v62  ;;  %v211_v59 = vmul.f32 %v3200_v0, %v182_v63  ;;  %v4571_v62 = vmov (%p109_p0), 0.0  }
  0xbe   : > { %316 = vst [vmem:[%s4953_s25 + $0x18] sm:$0xff] %v298_v51  ;;  %315 = vst [vmem:[%s4953_s25 + $0x10] sm:$0xff] %v297_v53  ;;  %3621 = vmatprep.subr.mxu0 (%p109_p0), %v4571_v62 }
  0xbf   : > { %v243_v2 = vpop.permute.xlu1 %242  ;;  %v238_v3 = vpop.permute.xlu0 %237  ;;  %3622 = vmatpush3.msra.mxu0 (%p109_p0), %v4571_v62 }
  0xc0   : > { %v300_v4 = vadd.f32 %v243_v2, %v204_v12  ;;  %v299_v5 = vadd.f32 %v238_v3, %v203_v13  ;;  %3624 = vmatmul.mubr.msk.f32.vlgmr.msra.gmra.mrb[0].mxu0 (%p109_p0), %vm345_vm0, %v4759_v18 }
  0xc1   :  { %3626 = vmatprep.mubr.msk.f32.mxu0 (%p109_p0), %vm345_vm0, %v4764_v19 }
  0xc2   : > { %318 = vst [vmem:[%s4953_s25 + $0x28] sm:$0xff] %v300_v4  ;;  %317 = vst [vmem:[%s4953_s25 + $0x20] sm:$0xff] %v299_v5 }
  0xc3   : > { %v253_v6 = vpop.permute.xlu1 %252  ;;  %v248_v7 = vpop.permute.xlu0 %247 }
  0xc4   : > { %v302_v9 = vadd.f32 %v253_v6, %v206_v50  ;;  %v301_v8 = vadd.f32 %v248_v7, %v205_v52  ;;  %3627 = vmatmul.mubr.msk.f32.gmra.mrb[2].mxu0 (%p109_p0), %vm345_vm0, %v4769_v20 }
  0xc5   :  { %3629 = vmatprep.mubr.msk.f32.mxu0 (%p109_p0), %vm345_vm0, %v4774_v21 }
  0xc6   : > { %320 = vst [vmem:[%s4953_s25 + $0x38] sm:$0xff] %v302_v9  ;;  %319 = vst [vmem:[%s4953_s25 + $0x30] sm:$0xff] %v301_v8 }
  0xc7   : > { %v263_v54 = vpop.permute.xlu1 %262  ;;  %v258_v55 = vpop.permute.xlu0 %257 }
  0xc8   : > { %v304_v12 = vadd.f32 %v263_v54, %v208_v10  ;;  %v303_v13 = vadd.f32 %v258_v55, %v207_v11  ;;  %3630 = vmatmul.mubr.msk.f32.gmra.mrb[4].mxu0 (%p109_p0), %vm345_vm0, %v4779_v22 }
  0xc9   :  { %3632 = vmatprep.mubr.msk.f32.mxu0 (%p109_p0), %vm345_vm0, %v4784_v23 }
  0xca   : > { %322 = vst [vmem:[%s4953_s25 + $0x48] sm:$0xff] %v304_v12  ;;  %321 = vst [vmem:[%s4953_s25 + $0x40] sm:$0xff] %v303_v13 }
  0xcb   : > { %v273_v51 = vpop.permute.xlu1 %272  ;;  %v268_v53 = vpop.permute.xlu0 %267 }
  0xcc   : > { %v306_v2 = vadd.f32 %v273_v51, %v210_v56  ;;  %v305_v3 = vadd.f32 %v268_v53, %v209_v57  ;;  %3633 = vmatmul.mubr.msk.f32.gmra.mrb[6].mxu0 (%p109_p0), %vm345_vm0, %v4789_v24 }
  0xcd   :  { %3635 = vmatprep.mubr.msk.f32.mxu0 (%p109_p0), %vm345_vm0, %v4794_v25 }
  0xce   : > { %324 = vst [vmem:[%s4953_s25 + $0x58] sm:$0xff] %v306_v2  ;;  %323 = vst [vmem:[%s4953_s25 + $0x50] sm:$0xff] %v305_v3 }
  0xcf   : > { %v283_v4 = vpop.permute.xlu1 %282  ;;  %v278_v5 = vpop.permute.xlu0 %277 }
  0xd0   : > { %v308_v50 = vadd.f32 %v283_v4, %v212_v58  ;;  %v307_v52 = vadd.f32 %v278_v5, %v211_v59  ;;  %111 = sbr.rel (!%p109_p0) target bundleno = 22 (0x16), region = 104  ;;  %3636 = vmatmul.mubr.msk.f32.gmra.mrb[8].mxu0 (%p109_p0), %vm345_vm0, %v4799_v26 }
  0xd1   :  { %3638 = vmatprep.mubr.msk.f32.mxu0 (%p109_p0), %vm345_vm0, %v4804_v27 }
  0xd2   : > { %326 = vst [vmem:[%s4953_s25 + $0x68] sm:$0xff] %v308_v50  ;;  %325 = vst [vmem:[%s4953_s25 + $0x60] sm:$0xff] %v307_v52 }
  0xd3   : > { %v293_v6 = vpop.permute.xlu1 %292  ;;  %v288_v7 = vpop.permute.xlu0 %287 }
  0xd4   : > { %v310_v9 = vadd.f32 %v293_v6, %v214_v60  ;;  %v309_v8 = vadd.f32 %v288_v7, %v213_v61  ;;  %3639 = vmatmul.mubr.msk.f32.gmra.mrb[10].mxu0 (%p109_p0), %vm345_vm0, %v4809_v28 }
  0xd5   :  { %3641 = vmatprep.mubr.msk.f32.mxu0 (%p109_p0), %vm345_vm0, %v4814_v29 }
  0xd6   : > { %328 = vst [vmem:[%s4953_s25 + $0x78] sm:$0xff] %v310_v9  ;;  %327 = vst [vmem:[%s4953_s25 + $0x70] sm:$0xff] %v309_v8 }
  0xd8   :  { %3642 = vmatmul.mubr.msk.f32.gmra.mrb[12].mxu0 %vm345_vm0, %v4819_v30 }
  0xd9   :  { %3644 = vmatprep.mubr.msk.f32.mxu0 %vm345_vm0, %v4824_v31 }
  0xdc   :  { %3645 = vmatmul.mubr.msk.f32.gmra.mrb[14].mxu0 %vm345_vm0, %v4829_v32 }
  0xdd   :  { %3687 = vmatprep.mubr.msk.f32.mxu0 %vm345_vm0, %v4754_v17  ;;  %v330_v1 = vld [vmem:[#allocation2 + $0x8] sm:$0xff]  ;;  %v329_v14 = vld [vmem:[#allocation2] sm:$0xff]  ;;  %v332_v35 = vld [vmem:[#allocation2 + $0x18] sm:$0xff] }
  0xde   :  { %v331_v37 = vld [vmem:[#allocation2 + $0x10] sm:$0xff]  ;;  %v334_v43 = vld [vmem:[#allocation2 + $0x28] sm:$0xff]  ;;  %v333_v45 = vld [vmem:[#allocation2 + $0x20] sm:$0xff] }
  0xdf   :  { %v336_v49 = vld [vmem:[#allocation2 + $0x38] sm:$0xff]  ;;  %v335_v11 = vld [vmem:[#allocation2 + $0x30] sm:$0xff]  ;;  %v338_v57 = vld [vmem:[#allocation2 + $0x48] sm:$0xff] }
  0xe0   :  { %v337_v50 = vld [vmem:[#allocation2 + $0x40] sm:$0xff]  ;;  %v340_v60 = vld [vmem:[#allocation2 + $0x58] sm:$0xff] }
 0x193   :  { %v3625_v15 = vpop.f32.mrb[0].mxu0 }
 0x194   :  { %v540_v16 = vadd.f32 %v3625_v15, %v330_v1  ;;  %v460_v33 = vpop.f32.mrb[1].mxu0  ;;  %v339_v15 = vld [vmem:[#allocation2 + $0x50] sm:$0xff] }
 0x195   :  { %v539_v34 = vadd.f32 %v460_v33, %v329_v14  ;;  %v342_v33 = vld [vmem:[#allocation2 + $0x68] sm:$0xff] }
 0x196   :  { %v3219_v36 = vmul.f32 -1.442695, %v540_v16 }
 0x197   :  { %v3218_v38 = vmul.f32 -1.442695, %v539_v34  ;;  %v3628_v39 = vpop.f32.mrb[2].mxu0 }
 0x198   :  { %4026 = vpow2.f32 %v3219_v36  ;;  %v542_v40 = vadd.f32 %v3628_v39, %v332_v35  ;;  %v470_v41 = vpop.f32.mrb[3].mxu0  ;;  %v341_v35 = vld [vmem:[#allocation2 + $0x60] sm:$0xff] }
 0x199   :  { %4028 = vpow2.f32 %v3218_v38  ;;  %v541_v42 = vadd.f32 %v470_v41, %v331_v37 }
 0x19a   :  { %v3221_v44 = vmul.f32 -1.442695, %v542_v40 }
 0x19b   :  { %v3220_v46 = vmul.f32 -1.442695, %v541_v42  ;;  %v3631_v47 = vpop.f32.mrb[4].mxu0 }
 0x19c   :  { %4030 = vpow2.f32 %v3221_v44  ;;  %v544_v48 = vadd.f32 %v3631_v47, %v334_v43  ;;  %v480_v63 = vpop.f32.mrb[5].mxu0  ;;  %v344_v44 = vld [vmem:[#allocation2 + $0x78] sm:$0xff]  ;;  %v343_v47 = vld [vmem:[#allocation2 + $0x70] sm:$0xff] }
 0x19d   :  { %4032 = vpow2.f32 %v3220_v46  ;;  %v543_v0 = vadd.f32 %v480_v63, %v333_v45 }
 0x19e   :  { %v3223_v10 = vmul.f32 -1.442695, %v544_v48 }
 0x19f   :  { %v3222_v54 = vmul.f32 -1.442695, %v543_v0  ;;  %v3634_v55 = vpop.f32.mrb[6].mxu0 }
 0x1a0   :  { %4034 = vpow2.f32 %v3223_v10  ;;  %v546_v12 = vadd.f32 %v3634_v55, %v336_v49  ;;  %v490_v13 = vpop.f32.mrb[7].mxu0 }
 0x1a1   :  { %4036 = vpow2.f32 %v3222_v54  ;;  %v545_v56 = vadd.f32 %v490_v13, %v335_v11 }
 0x1a2   :  { %v4027_v51 = vpop.eup %4026  ;;  %v3225_v53 = vmul.f32 -1.442695, %v546_v12 }
 0x1a3   :  { %v4029_v2 = vpop.eup %4028  ;;  %v568_v3 = vadd.f32 1.0, %v4027_v51  ;;  %v3224_v58 = vmul.f32 -1.442695, %v545_v56  ;;  %v3637_v59 = vpop.f32.mrb[8].mxu0 }
 0x1a4   :  { %v567_v4 = vadd.f32 1.0, %v4029_v2  ;;  %4038 = vpow2.f32 %v3225_v53  ;;  %v548_v5 = vadd.f32 %v3637_v59, %v338_v57  ;;  %v500_v52 = vpop.f32.mrb[9].mxu0 }
 0x1a5   :  { %4040 = vrcp.f32 %v568_v3  ;;  %v547_v9 = vadd.f32 %v500_v52, %v337_v50 }
 0x1a6   :  { %v4031_v61 = vpop.eup %4030  ;;  %4042 = vrcp.f32 %v567_v4 }
 0x1a7   :  { %v4033_v6 = vpop.eup %4032  ;;  %v570_v7 = vadd.f32 1.0, %v4031_v61  ;;  %4044 = vpow2.f32 %v3224_v58  ;;  %v3640_v8 = vpop.f32.mrb[10].mxu0 }
 0x1a8   :  { %v569_v1 = vadd.f32 1.0, %v4033_v6  ;;  %4046 = vtanh.f32 %v548_v5  ;;  %v550_v14 = vadd.f32 %v3640_v8, %v340_v60  ;;  %v510_v16 = vpop.f32.mrb[11].mxu0 }
 0x1a9   :  { %4048 = vrcp.f32 %v570_v7  ;;  %v549_v38 = vadd.f32 %v510_v16, %v339_v15 }
 0x1aa   :  { %v4035_v34 = vpop.eup %4034  ;;  %4050 = vrcp.f32 %v569_v1 }
 0x1ab   :  { %v4037_v36 = vpop.eup %4036  ;;  %v592_v37 = vadd.f32 1.0, %v4035_v34  ;;  %4052 = vtanh.f32 %v547_v9  ;;  %v3643_v39 = vpop.f32.mrb[12].mxu0 }
 0x1ac   :  { %v591_v40 = vadd.f32 1.0, %v4037_v36  ;;  %4054 = vtanh.f32 %v550_v14  ;;  %v552_v41 = vadd.f32 %v3643_v39, %v342_v33  ;;  %v520_v42 = vpop.f32.mrb[13].mxu0 }
 0x1ad   :  { %4056 = vrcp.f32 %v592_v37  ;;  %v551_v43 = vadd.f32 %v520_v42, %v341_v35 }
 0x1ae   :  { %v4039_v45 = vpop.eup %4038  ;;  %4058 = vrcp.f32 %v591_v40  ;;  %v3227_v46 = vmul.f32 -1.442695, %v552_v41 }
 0x1af   :  { %v4041_v48 = vpop.eup %4040  ;;  %v594_v63 = vadd.f32 1.0, %v4039_v45  ;;  %4060 = vtanh.f32 %v549_v38  ;;  %v3226_v0 = vmul.f32 -1.442695, %v551_v43  ;;  %v3646_v49 = vpop.f32.mrb[14].mxu0 }
 0x1b0   :  { %v4043_v10 = vpop.eup %4042  ;;  %4062 = vpow2.f32 %v3227_v46  ;;  %v554_v11 = vadd.f32 %v3646_v49, %v344_v44  ;;  %v530_v54 = vpop.f32.mrb[15].mxu0 }
 0x1b1   :  { %v4045_v55 = vpop.eup %4044  ;;  %4064 = vrcp.f32 %v594_v63  ;;  %v553_v12 = vadd.f32 %v530_v54, %v343_v47 }
 0x1b2   :  { %v4047_v13 = vpop.eup %4046  ;;  %v593_v56 = vadd.f32 1.0, %v4045_v55  ;;  %4066 = vpow2.f32 %v3226_v0  ;;  %v3229_v57 = vmul.f32 -1.442695, %v554_v11 }
 0x1b3   :  { %v4049_v51 = vpop.eup %4048  ;;  %v636_v53 = vmul.f32 %v4047_v13, %v4041_v48  ;;  %v3228_v2 = vmul.f32 -1.442695, %v553_v12  ;;  %v653_v13 = vld [vmem:[#allocation2 + $0x88] sm:$0xff] }
 0x1b4   :  { %v4051_v3 = vpop.eup %4050  ;;  %4068 = vrcp.f32 %v593_v56  ;;  %v652_v56 = vld [vmem:[#allocation2 + $0x80] sm:$0xff] }
 0x1b5   :  { %v4053_v58 = vpop.eup %4052  ;;  %4070 = vpow2.f32 %v3229_v57 }
 0x1b6   :  { %v4055_v59 = vpop.eup %4054  ;;  %v635_v4 = vmul.f32 %v4053_v58, %v4043_v10  ;;  %4072 = vpow2.f32 %v3228_v2 }
 0x1b7   :  { %v4057_v5 = vpop.eup %4056  ;;  %v638_v50 = vmul.f32 %v4055_v59, %v4049_v51  ;;  %v654_v59 = vld [vmem:[#allocation2 + $0x90] sm:$0xff] }
 0x1b8   :  { %v4059_v52 = vpop.eup %4058  ;;  %v632_v60 = vmul.f32 0.0, %v4057_v5 }
 0x1b9   :  { %v4061_v61 = vpop.eup %4060  ;;  %v631_v6 = vmul.f32 0.0, %v4059_v52 }
 0x1ba   :  { %v4063_v7 = vpop.eup %4062  ;;  %v5012_v9 = vadd.f32 %v636_v53, %v632_v60  ;;  %v637_v8 = vmul.f32 %v4061_v61, %v4051_v3  ;;  %v655_v3 = vld [vmem:[#allocation2 + $0x98] sm:$0xff]  ;;  %v657_v61 = vld [vmem:[#allocation2 + $0xa8] sm:$0xff] }
 0x1bb   :  { %v4065_v1 = vpop.eup %4064  ;;  %v5014_v14 = vadd.f32 %v635_v4, %v631_v6  ;;  %v620_v15 = vadd.f32 1.0, %v4063_v7  ;;  %v656_v7 = vld [vmem:[#allocation2 + $0xa0] sm:$0xff] }
 0x1bc   :  { %v4067_v16 = vpop.eup %4066  ;;  %v634_v33 = vmul.f32 0.0, %v4065_v1  ;;  %4074 = vtanh.f32 %v5012_v9 }
 0x1bd   :  { %4076 = vrcp.f32 %v620_v15  ;;  %v619_v34 = vadd.f32 1.0, %v4067_v16 }
 0x1be   :  { %v4069_v35 = vpop.eup %4068  ;;  %v5017_v36 = vadd.f32 %v638_v50, %v634_v33  ;;  %4078 = vtanh.f32 %v5014_v14 }
 0x1bf   :  { %v4071_v37 = vpop.eup %4070  ;;  %v633_v38 = vmul.f32 0.0, %v4069_v35  ;;  %4080 = vrcp.f32 %v619_v34  ;;  %v659_v34 = vld [vmem:[#allocation2 + $0xb8] sm:$0xff] }
 0x1c0   :  { %v4073_v39 = vpop.eup %4072  ;;  %4082 = vtanh.f32 %v5017_v36  ;;  %v622_v40 = vadd.f32 1.0, %v4071_v37  ;;  %v658_v37 = vld [vmem:[#allocation2 + $0xb0] sm:$0xff] }
 0x1c1   :  { %v5021_v41 = vadd.f32 %v637_v8, %v633_v38  ;;  %v621_v42 = vadd.f32 1.0, %v4073_v39 }
 0x1c2   :  { %4084 = vrcp.f32 %v622_v40 }
 0x1c3   :  { %4086 = vtanh.f32 %v5021_v41 }
 0x1c4   :  { %4088 = vrcp.f32 %v621_v42 }
 0x1c6   :  { %v4075_v43 = vpop.eup %4074 }
 0x1c7   :  { %v4077_v44 = vpop.eup %4076 }
 0x1c8   :  { %v4079_v45 = vpop.eup %4078  ;;  %v648_v46 = vmul.f32 %v4077_v44, %v4075_v43  ;;  %v661_v44 = vld [vmem:[#allocation2 + $0xc8] sm:$0xff] }
 0x1c9   :  { %v4081_v47 = vpop.eup %4080 }
 0x1ca   :  { %v4083_v48 = vpop.eup %4082  ;;  %v647_v63 = vmul.f32 %v4081_v47, %v4079_v45 }
 0x1cc   :  { %v4085_v0 = vpop.eup %4084  ;;  %v3917_v49 = vpack.c.bf16 %v648_v46, %v647_v63 }
 0x1cd   :  { %v4087_v10 = vpop.eup %4086  ;;  %v650_v11 = vmul.f32 %v4085_v0, %v4083_v48 }
 0x1ce   :  { %v4089_v54 = vpop.eup %4088  ;;  %3918 = vmatprep.subr.bf16.mxu1 %v3917_v49 }
 0x1cf   :  { %3920 = vmatpush3.bf16.msra.mxu1 %v3917_v49  ;;  %v649_v55 = vmul.f32 %v4089_v54, %v4087_v10 }
 0x1d1   :  { %v3921_v12 = vpack.c.bf16 %v650_v11, %v649_v55  ;;  %v660_v11 = vld [vmem:[#allocation2 + $0xc0] sm:$0xff]  ;;  %v663_v55 = vld [vmem:[#allocation2 + $0xd8] sm:$0xff] }
 0x1d3   :  { %3922 = vmatprep.subr.bf16.mxu1 %v3921_v12 }
 0x1d4   :  { %3924 = vmatpush3.bf16.msra.mxu1 %v3921_v12 }
 0x1d7   :  { %3656 = vmatmul.mubr.msk.f32.vlgmr.msra.gmra.mrb[0].mxu1 %vm345_vm0, %v4759_v18 }
 0x1d8   :  { %3658 = vmatprep.mubr.msk.f32.mxu1 %vm345_vm0, %v4764_v19 }
 0x1db   :  { %3659 = vmatmul.mubr.msk.f32.gmra.mrb[2].mxu1 %vm345_vm0, %v4769_v20 }
 0x1dc   :  { %3661 = vmatprep.mubr.msk.f32.mxu1 %vm345_vm0, %v4774_v21 }
 0x1df   :  { %3662 = vmatmul.mubr.msk.f32.gmra.mrb[4].mxu1 %vm345_vm0, %v4779_v22 }
 0x1e0   :  { %3664 = vmatprep.mubr.msk.f32.mxu1 %vm345_vm0, %v4784_v23 }
 0x1e3   :  { %3665 = vmatmul.mubr.msk.f32.gmra.mrb[6].mxu1 %vm345_vm0, %v4789_v24 }
 0x1e4   :  { %3667 = vmatprep.mubr.msk.f32.mxu1 %vm345_vm0, %v4794_v25 }
 0x1e7   :  { %3668 = vmatmul.mubr.msk.f32.gmra.mrb[8].mxu1 %vm345_vm0, %v4799_v26 }
 0x1e8   :  { %3670 = vmatprep.mubr.msk.f32.mxu1 %vm345_vm0, %v4804_v27 }
 0x1eb   :  { %3671 = vmatmul.mubr.msk.f32.gmra.mrb[10].mxu1 %vm345_vm0, %v4809_v28 }
 0x1ec   :  { %3673 = vmatprep.mubr.msk.f32.mxu1 %vm345_vm0, %v4814_v29 }
 0x1ef   :  { %3674 = vmatmul.mubr.msk.f32.gmra.mrb[12].mxu1 %vm345_vm0, %v4819_v30 }
 0x1f0   :  { %3676 = vmatprep.mubr.msk.f32.mxu1 %vm345_vm0, %v4824_v31 }
 0x1f3   :  { %3677 = vmatmul.mubr.msk.f32.gmra.mrb[14].mxu1 %vm345_vm0, %v4829_v32 }
 0x1f4   :  { %3719 = vmatprep.mubr.msk.f32.mxu1 %vm345_vm0, %v4754_v17 }
 0x2aa   :  { %v3657_v57 = vpop.f32.mrb[0].mxu1 }
 0x2ab   :  { %v814_v51 = vadd.f32 %v3657_v57, %v653_v13  ;;  %v734_v53 = vpop.f32.mrb[1].mxu1 }
 0x2ac   :  { %v813_v2 = vadd.f32 %v734_v53, %v652_v56 }
 0x2ad   :  { %v3247_v58 = vmul.f32 -1.442695, %v814_v51 }
 0x2ae   :  { %v3246_v4 = vmul.f32 -1.442695, %v813_v2  ;;  %v3660_v5 = vpop.f32.mrb[2].mxu1 }
 0x2af   :  { %4090 = vpow2.f32 %v3247_v58  ;;  %v816_v50 = vadd.f32 %v3660_v5, %v655_v3  ;;  %v744_v52 = vpop.f32.mrb[3].mxu1  ;;  %v662_v3 = vld [vmem:[#allocation2 + $0xd0] sm:$0xff]  ;;  %v664_v5 = vld [vmem:[#allocation2 + $0xe0] sm:$0xff] }
 0x2b0   :  { %4092 = vpow2.f32 %v3246_v4  ;;  %v815_v60 = vadd.f32 %v744_v52, %v654_v59  ;;  %v665_v59 = vld [vmem:[#allocation2 + $0xe8] sm:$0xff] }
 0x2b1   :  { %v3249_v6 = vmul.f32 -1.442695, %v816_v50 }
 0x2b2   :  { %v3248_v8 = vmul.f32 -1.442695, %v815_v60  ;;  %v3663_v1 = vpop.f32.mrb[4].mxu1 }
 0x2b3   :  { %4094 = vpow2.f32 %v3249_v6  ;;  %v818_v15 = vadd.f32 %v3663_v1, %v657_v61  ;;  %v754_v16 = vpop.f32.mrb[5].mxu1 }
 0x2b4   :  { %4096 = vpow2.f32 %v3248_v8  ;;  %v817_v33 = vadd.f32 %v754_v16, %v656_v7 }
 0x2b5   :  { %v3251_v35 = vmul.f32 -1.442695, %v818_v15  ;;  %v667_v15 = vld [vmem:[#allocation2 + $0xf8] sm:$0xff] }
 0x2b6   :  { %v3250_v38 = vmul.f32 -1.442695, %v817_v33  ;;  %v3666_v39 = vpop.f32.mrb[6].mxu1 }
 0x2b7   :  { %4098 = vpow2.f32 %v3251_v35  ;;  %v820_v40 = vadd.f32 %v3666_v39, %v659_v34  ;;  %v764_v42 = vpop.f32.mrb[7].mxu1  ;;  %v666_v34 = vld [vmem:[#allocation2 + $0xf0] sm:$0xff] }
 0x2b8   :  { %4100 = vpow2.f32 %v3250_v38  ;;  %v819_v43 = vadd.f32 %v764_v42, %v658_v37 }
 0x2b9   :  { %v4091_v45 = vpop.eup %4090  ;;  %v3253_v46 = vmul.f32 -1.442695, %v820_v40 }
 0x2ba   :  { %v4093_v47 = vpop.eup %4092  ;;  %v842_v48 = vadd.f32 1.0, %v4091_v45  ;;  %v3252_v63 = vmul.f32 -1.442695, %v819_v43  ;;  %v3669_v0 = vpop.f32.mrb[8].mxu1 }
 0x2bb   :  { %v841_v49 = vadd.f32 1.0, %v4093_v47  ;;  %4102 = vpow2.f32 %v3253_v46  ;;  %v822_v10 = vadd.f32 %v3669_v0, %v661_v44  ;;  %v774_v54 = vpop.f32.mrb[9].mxu1 }
 0x2bc   :  { %4104 = vrcp.f32 %v842_v48  ;;  %v821_v57 = vadd.f32 %v774_v54, %v660_v11 }
 0x2bd   :  { %v4095_v12 = vpop.eup %4094  ;;  %4106 = vrcp.f32 %v841_v49 }
 0x2be   :  { %v4097_v13 = vpop.eup %4096  ;;  %v844_v56 = vadd.f32 1.0, %v4095_v12  ;;  %4108 = vpow2.f32 %v3252_v63  ;;  %v3672_v51 = vpop.f32.mrb[10].mxu1 }
 0x2bf   :  { %v843_v53 = vadd.f32 1.0, %v4097_v13  ;;  %4110 = vtanh.f32 %v822_v10  ;;  %v824_v2 = vadd.f32 %v3672_v51, %v663_v55  ;;  %v784_v58 = vpop.f32.mrb[11].mxu1 }
 0x2c0   :  { %4112 = vrcp.f32 %v844_v56  ;;  %v823_v60 = vadd.f32 %v784_v58, %v662_v3 }
 0x2c1   :  { %v4099_v4 = vpop.eup %4098  ;;  %4114 = vrcp.f32 %v843_v53 }
 0x2c2   :  { %v4101_v50 = vpop.eup %4100  ;;  %v866_v52 = vadd.f32 1.0, %v4099_v4  ;;  %4116 = vtanh.f32 %v821_v57  ;;  %v3675_v61 = vpop.f32.mrb[12].mxu1 }
 0x2c3   :  { %v865_v6 = vadd.f32 1.0, %v4101_v50  ;;  %4118 = vtanh.f32 %v824_v2  ;;  %v826_v7 = vadd.f32 %v3675_v61, %v665_v59  ;;  %v794_v8 = vpop.f32.mrb[13].mxu1 }
 0x2c4   :  { %4120 = vrcp.f32 %v866_v52  ;;  %v825_v1 = vadd.f32 %v794_v8, %v664_v5 }
 0x2c5   :  { %v4103_v16 = vpop.eup %4102  ;;  %4122 = vrcp.f32 %v865_v6  ;;  %v3255_v33 = vmul.f32 -1.442695, %v826_v7 }
 0x2c6   :  { %v4105_v35 = vpop.eup %4104  ;;  %v868_v37 = vadd.f32 1.0, %v4103_v16  ;;  %4124 = vtanh.f32 %v823_v60  ;;  %v3254_v38 = vmul.f32 -1.442695, %v825_v1  ;;  %v3678_v39 = vpop.f32.mrb[14].mxu1 }
 0x2c7   :  { %v4107_v40 = vpop.eup %4106  ;;  %4126 = vpow2.f32 %v3255_v33  ;;  %v828_v42 = vadd.f32 %v3678_v39, %v667_v15  ;;  %v804_v43 = vpop.f32.mrb[15].mxu1 }
 0x2c8   :  { %v4109_v44 = vpop.eup %4108  ;;  %4128 = vrcp.f32 %v868_v37  ;;  %v827_v45 = vadd.f32 %v804_v43, %v666_v34 }
 0x2c9   :  { %v4111_v46 = vpop.eup %4110  ;;  %v867_v47 = vadd.f32 1.0, %v4109_v44  ;;  %4130 = vpow2.f32 %v3254_v38  ;;  %v3257_v48 = vmul.f32 -1.442695, %v828_v42 }
 0x2ca   :  { %v4113_v63 = vpop.eup %4112  ;;  %v910_v0 = vmul.f32 %v4111_v46, %v4105_v35  ;;  %v3256_v49 = vmul.f32 -1.442695, %v827_v45  ;;  %v927_v46 = vld [vmem:[#allocation2 + $0x108] sm:$0xff] }
 0x2cb   :  { %v4115_v10 = vpop.eup %4114  ;;  %4132 = vrcp.f32 %v867_v47  ;;  %v926_v47 = vld [vmem:[#allocation2 + $0x100] sm:$0xff] }
 0x2cc   :  { %v4117_v11 = vpop.eup %4116  ;;  %4134 = vpow2.f32 %v3257_v48 }
 0x2cd   :  { %v4119_v54 = vpop.eup %4118  ;;  %v909_v55 = vmul.f32 %v4117_v11, %v4107_v40  ;;  %4136 = vpow2.f32 %v3256_v49 }
 0x2ce   :  { %v4121_v12 = vpop.eup %4120  ;;  %v912_v13 = vmul.f32 %v4119_v54, %v4113_v63  ;;  %v928_v54 = vld [vmem:[#allocation2 + $0x110] sm:$0xff] }
 0x2cf   :  { %v4123_v56 = vpop.eup %4122  ;;  %v906_v57 = vmul.f32 %v4121_v12, %v5012_v9 }
 0x2d0   :  { %v4125_v51 = vpop.eup %4124  ;;  %v905_v53 = vmul.f32 %v4123_v56, %v5014_v14 }
 0x2d1   :  { %v4127_v2 = vpop.eup %4126  ;;  %v5058_v3 = vadd.f32 %v910_v0, %v906_v57  ;;  %v911_v58 = vmul.f32 %v4125_v51, %v4115_v10  ;;  %v929_v10 = vld [vmem:[#allocation2 + $0x118] sm:$0xff]  ;;  %v931_v51 = vld [vmem:[#allocation2 + $0x128] sm:$0xff] }
 0x2d2   :  { %v4129_v59 = vpop.eup %4128  ;;  %v5060_v4 = vadd.f32 %v909_v55, %v905_v53  ;;  %v894_v5 = vadd.f32 1.0, %v4127_v2  ;;  %v930_v2 = vld [vmem:[#allocation2 + $0x120] sm:$0xff] }
 0x2d3   :  { %v4131_v50 = vpop.eup %4130  ;;  %v908_v52 = vmul.f32 %v4129_v59, %v5017_v36  ;;  %4138 = vtanh.f32 %v5058_v3 }
 0x2d4   :  { %4140 = vtanh.f32 %v5060_v4  ;;  %v893_v60 = vadd.f32 1.0, %v4131_v50 }
 0x2d5   :  { %v4133_v9 = vpop.eup %4132  ;;  %v5065_v61 = vadd.f32 %v912_v13, %v908_v52  ;;  %4142 = vrcp.f32 %v894_v5 }
 0x2d6   :  { %v4135_v14 = vpop.eup %4134  ;;  %v907_v6 = vmul.f32 %v4133_v9, %v5021_v41  ;;  %4144 = vrcp.f32 %v893_v60  ;;  %v933_v60 = vld [vmem:[#allocation2 + $0x138] sm:$0xff] }
 0x2d7   :  { %v4137_v7 = vpop.eup %4136  ;;  %4146 = vtanh.f32 %v5065_v61  ;;  %v896_v8 = vadd.f32 1.0, %v4135_v14  ;;  %v932_v14 = vld [vmem:[#allocation2 + $0x130] sm:$0xff] }
 0x2d8   :  { %v5069_v1 = vadd.f32 %v911_v58, %v907_v6  ;;  %v895_v36 = vadd.f32 1.0, %v4137_v7 }
 0x2d9   :  { %4148 = vrcp.f32 %v896_v8 }
 0x2da   :  { %4150 = vtanh.f32 %v5069_v1 }
 0x2db   :  { %4152 = vrcp.f32 %v895_v36 }
 0x2dd   :  { %v4139_v15 = vpop.eup %4138 }
 0x2de   :  { %v4141_v16 = vpop.eup %4140 }
 0x2df   :  { %v4143_v33 = vpop.eup %4142 }
 0x2e0   :  { %v4145_v34 = vpop.eup %4144  ;;  %v922_v35 = vmul.f32 %v4143_v33, %v4139_v15 }
 0x2e1   :  { %v4147_v37 = vpop.eup %4146  ;;  %v921_v38 = vmul.f32 %v4145_v34, %v4141_v16  ;;  %v935_v16 = vld [vmem:[#allocation2 + $0x148] sm:$0xff] }
 0x2e3   :  { %v4149_v41 = vpop.eup %4148  ;;  %v3925_v39 = vpack.c.bf16 %v922_v35, %v921_v38 }
 0x2e4   :  { %v4151_v40 = vpop.eup %4150  ;;  %v924_v42 = vmul.f32 %v4149_v41, %v4147_v37 }
 0x2e5   :  { %v4153_v43 = vpop.eup %4152  ;;  %3926 = vmatprep.subr.bf16.mxu0 %v3925_v39 }
 0x2e6   :  { %3928 = vmatpush3.bf16.msra.mxu0 %v3925_v39  ;;  %v923_v44 = vmul.f32 %v4153_v43, %v4151_v40 }
 0x2e8   :  { %v3929_v45 = vpack.c.bf16 %v924_v42, %v923_v44  ;;  %v934_v42 = vld [vmem:[#allocation2 + $0x140] sm:$0xff]  ;;  %v937_v44 = vld [vmem:[#allocation2 + $0x158] sm:$0xff] }
 0x2ea   :  { %3930 = vmatprep.subr.bf16.mxu0 %v3929_v45 }
 0x2eb   :  { %3932 = vmatpush3.bf16.msra.mxu0 %v3929_v45 }
 0x2ee   :  { %3688 = vmatmul.mubr.msk.f32.vlgmr.msra.gmra.mrb[16].mxu0 %vm345_vm0, %v4759_v18 }
 0x2ef   :  { %3690 = vmatprep.mubr.msk.f32.mxu0 %vm345_vm0, %v4764_v19 }
 0x2f2   :  { %3691 = vmatmul.mubr.msk.f32.gmra.mrb[18].mxu0 %vm345_vm0, %v4769_v20 }
 0x2f3   :  { %3693 = vmatprep.mubr.msk.f32.mxu0 %vm345_vm0, %v4774_v21 }
 0x2f6   :  { %3694 = vmatmul.mubr.msk.f32.gmra.mrb[20].mxu0 %vm345_vm0, %v4779_v22 }
 0x2f7   :  { %3696 = vmatprep.mubr.msk.f32.mxu0 %vm345_vm0, %v4784_v23 }
 0x2fa   :  { %3697 = vmatmul.mubr.msk.f32.gmra.mrb[22].mxu0 %vm345_vm0, %v4789_v24 }
 0x2fb   :  { %3699 = vmatprep.mubr.msk.f32.mxu0 %vm345_vm0, %v4794_v25 }
 0x2fe   :  { %3700 = vmatmul.mubr.msk.f32.gmra.mrb[24].mxu0 %vm345_vm0, %v4799_v26 }
 0x2ff   :  { %3702 = vmatprep.mubr.msk.f32.mxu0 %vm345_vm0, %v4804_v27 }
 0x302   :  { %3703 = vmatmul.mubr.msk.f32.gmra.mrb[26].mxu0 %vm345_vm0, %v4809_v28 }
 0x303   :  { %3705 = vmatprep.mubr.msk.f32.mxu0 %vm345_vm0, %v4814_v29 }
 0x306   :  { %3706 = vmatmul.mubr.msk.f32.gmra.mrb[28].mxu0 %vm345_vm0, %v4819_v30 }
 0x307   :  { %3708 = vmatprep.mubr.msk.f32.mxu0 %vm345_vm0, %v4824_v31 }
 0x30a   :  { %3709 = vmatmul.mubr.msk.f32.gmra.mrb[30].mxu0 %vm345_vm0, %v4829_v32 }
 0x30b   :  { %3751 = vmatprep.mubr.msk.f32.mxu0 %vm345_vm0, %v4754_v17 }
 0x3c1   :  { %v3689_v48 = vpop.f32.mrb[16].mxu0 }
 0x3c2   :  { %v1088_v63 = vadd.f32 %v3689_v48, %v927_v46  ;;  %v1008_v0 = vpop.f32.mrb[17].mxu0 }
 0x3c3   :  { %v1087_v49 = vadd.f32 %v1008_v0, %v926_v47 }
 0x3c4   :  { %v3275_v11 = vmul.f32 -1.442695, %v1088_v63 }
 0x3c5   :  { %v3274_v55 = vmul.f32 -1.442695, %v1087_v49  ;;  %v3692_v12 = vpop.f32.mrb[18].mxu0 }
 0x3c6   :  { %4154 = vpow2.f32 %v3275_v11  ;;  %v1090_v13 = vadd.f32 %v3692_v12, %v929_v10  ;;  %v1018_v56 = vpop.f32.mrb[19].mxu0  ;;  %v936_v10 = vld [vmem:[#allocation2 + $0x150] sm:$0xff]  ;;  %v938_v12 = vld [vmem:[#allocation2 + $0x160] sm:$0xff] }
 0x3c7   :  { %4156 = vpow2.f32 %v3274_v55  ;;  %v1089_v57 = vadd.f32 %v1018_v56, %v928_v54  ;;  %v939_v54 = vld [vmem:[#allocation2 + $0x168] sm:$0xff] }
 0x3c8   :  { %v3277_v53 = vmul.f32 -1.442695, %v1090_v13 }
 0x3c9   :  { %v3276_v58 = vmul.f32 -1.442695, %v1089_v57  ;;  %v3695_v59 = vpop.f32.mrb[20].mxu0 }
 0x3ca   :  { %4158 = vpow2.f32 %v3277_v53  ;;  %v1092_v5 = vadd.f32 %v3695_v59, %v931_v51  ;;  %v1028_v50 = vpop.f32.mrb[21].mxu0 }
 0x3cb   :  { %4160 = vpow2.f32 %v3276_v58  ;;  %v1091_v52 = vadd.f32 %v1028_v50, %v930_v2 }
 0x3cc   :  { %v3279_v9 = vmul.f32 -1.442695, %v1092_v5  ;;  %v941_v5 = vld [vmem:[#allocation2 + $0x178] sm:$0xff] }
 0x3cd   :  { %v3278_v6 = vmul.f32 -1.442695, %v1091_v52  ;;  %v3698_v7 = vpop.f32.mrb[22].mxu0 }
 0x3ce   :  { %4162 = vpow2.f32 %v3279_v9  ;;  %v1094_v8 = vadd.f32 %v3698_v7, %v933_v60  ;;  %v1038_v36 = vpop.f32.mrb[23].mxu0  ;;  %v940_v60 = vld [vmem:[#allocation2 + $0x170] sm:$0xff] }
 0x3cf   :  { %4164 = vpow2.f32 %v3278_v6  ;;  %v1093_v15 = vadd.f32 %v1038_v36, %v932_v14 }
 0x3d0   :  { %v4155_v33 = vpop.eup %4154  ;;  %v3281_v34 = vmul.f32 -1.442695, %v1094_v8 }
 0x3d1   :  { %v4157_v35 = vpop.eup %4156  ;;  %v1116_v37 = vadd.f32 1.0, %v4155_v33  ;;  %v3280_v38 = vmul.f32 -1.442695, %v1093_v15  ;;  %v3701_v41 = vpop.f32.mrb[24].mxu0 }
 0x3d2   :  { %v1115_v39 = vadd.f32 1.0, %v4157_v35  ;;  %4166 = vpow2.f32 %v3281_v34  ;;  %v1096_v40 = vadd.f32 %v3701_v41, %v935_v16  ;;  %v1048_v43 = vpop.f32.mrb[25].mxu0 }
 0x3d3   :  { %4168 = vrcp.f32 %v1116_v37  ;;  %v1095_v48 = vadd.f32 %v1048_v43, %v934_v42 }
 0x3d4   :  { %v4159_v45 = vpop.eup %4158  ;;  %4170 = vrcp.f32 %v1115_v39 }
 0x3d5   :  { %v4161_v46 = vpop.eup %4160  ;;  %v1118_v47 = vadd.f32 1.0, %v4159_v45  ;;  %4172 = vpow2.f32 %v3280_v38  ;;  %v3704_v63 = vpop.f32.mrb[26].mxu0 }
 0x3d6   :  { %v1117_v0 = vadd.f32 1.0, %v4161_v46  ;;  %4174 = vtanh.f32 %v1096_v40  ;;  %v1098_v49 = vadd.f32 %v3704_v63, %v937_v44  ;;  %v1058_v11 = vpop.f32.mrb[27].mxu0 }
 0x3d7   :  { %4176 = vrcp.f32 %v1118_v47  ;;  %v1097_v57 = vadd.f32 %v1058_v11, %v936_v10 }
 0x3d8   :  { %v4163_v55 = vpop.eup %4162  ;;  %4178 = vrcp.f32 %v1117_v0 }
 0x3d9   :  { %v4165_v13 = vpop.eup %4164  ;;  %v1140_v56 = vadd.f32 1.0, %v4163_v55  ;;  %4180 = vtanh.f32 %v1095_v48  ;;  %v3707_v51 = vpop.f32.mrb[28].mxu0 }
 0x3da   :  { %v1139_v53 = vadd.f32 1.0, %v4165_v13  ;;  %4182 = vtanh.f32 %v1098_v49  ;;  %v1100_v2 = vadd.f32 %v3707_v51, %v939_v54  ;;  %v1068_v58 = vpop.f32.mrb[29].mxu0 }
 0x3db   :  { %4184 = vrcp.f32 %v1140_v56  ;;  %v1099_v59 = vadd.f32 %v1068_v58, %v938_v12 }
 0x3dc   :  { %v4167_v50 = vpop.eup %4166  ;;  %4186 = vrcp.f32 %v1139_v53  ;;  %v3283_v52 = vmul.f32 -1.442695, %v1100_v2 }
 0x3dd   :  { %v4169_v9 = vpop.eup %4168  ;;  %v1142_v14 = vadd.f32 1.0, %v4167_v50  ;;  %4188 = vtanh.f32 %v1097_v57  ;;  %v3282_v6 = vmul.f32 -1.442695, %v1099_v59  ;;  %v3710_v7 = vpop.f32.mrb[30].mxu0 }
 0x3de   :  { %v4171_v8 = vpop.eup %4170  ;;  %4190 = vpow2.f32 %v3283_v52  ;;  %v1102_v36 = vadd.f32 %v3710_v7, %v941_v5  ;;  %v1078_v15 = vpop.f32.mrb[31].mxu0 }
 0x3df   :  { %v4173_v16 = vpop.eup %4172  ;;  %4192 = vrcp.f32 %v1142_v14  ;;  %v1101_v33 = vadd.f32 %v1078_v15, %v940_v60 }
 0x3e0   :  { %v4175_v34 = vpop.eup %4174  ;;  %v1141_v35 = vadd.f32 1.0, %v4173_v16  ;;  %4194 = vpow2.f32 %v3282_v6  ;;  %v3285_v37 = vmul.f32 -1.442695, %v1102_v36 }
 0x3e1   :  { %v4177_v38 = vpop.eup %4176  ;;  %v1184_v41 = vmul.f32 %v4175_v34, %v4169_v9  ;;  %v3284_v39 = vmul.f32 -1.442695, %v1101_v33  ;;  %v1201_v34 = vld [vmem:[#allocation2 + $0x188] sm:$0xff] }
 0x3e2   :  { %v4179_v40 = vpop.eup %4178  ;;  %4196 = vrcp.f32 %v1141_v35  ;;  %v1200_v35 = vld [vmem:[#allocation2 + $0x180] sm:$0xff] }
 0x3e3   :  { %v4181_v42 = vpop.eup %4180  ;;  %4198 = vpow2.f32 %v3285_v37 }
 0x3e4   :  { %v4183_v43 = vpop.eup %4182  ;;  %v1183_v44 = vmul.f32 %v4181_v42, %v4171_v8  ;;  %4200 = vpow2.f32 %v3284_v39 }
 0x3e5   :  { %v4185_v45 = vpop.eup %4184  ;;  %v1186_v46 = vmul.f32 %v4183_v43, %v4177_v38  ;;  %v1202_v43 = vld [vmem:[#allocation2 + $0x190] sm:$0xff] }
 0x3e6   :  { %v4187_v47 = vpop.eup %4186  ;;  %v1180_v48 = vmul.f32 %v4185_v45, %v5058_v3 }
 0x3e7   :  { %v4189_v63 = vpop.eup %4188  ;;  %v1179_v0 = vmul.f32 %v4187_v47, %v5060_v4 }
 0x3e8   :  { %v4191_v49 = vpop.eup %4190  ;;  %v5106_v10 = vadd.f32 %v1184_v41, %v1180_v48  ;;  %v1185_v11 = vmul.f32 %v4189_v63, %v4179_v40  ;;  %v1203_v40 = vld [vmem:[#allocation2 + $0x198] sm:$0xff]  ;;  %v1205_v63 = vld [vmem:[#allocation2 + $0x1a8] sm:$0xff] }
 0x3e9   :  { %v4193_v54 = vpop.eup %4192  ;;  %v5108_v55 = vadd.f32 %v1183_v44, %v1179_v0  ;;  %v1168_v12 = vadd.f32 1.0, %v4191_v49  ;;  %v1204_v49 = vld [vmem:[#allocation2 + $0x1a0] sm:$0xff] }
 0x3ea   :  { %v4195_v13 = vpop.eup %4194  ;;  %v1182_v56 = vmul.f32 %v4193_v54, %v5065_v61  ;;  %4202 = vtanh.f32 %v5106_v10 }
 0x3eb   :  { %4204 = vtanh.f32 %v5108_v55  ;;  %v1167_v57 = vadd.f32 1.0, %v4195_v13 }
 0x3ec   :  { %v4197_v3 = vpop.eup %4196  ;;  %v5113_v51 = vadd.f32 %v1186_v46, %v1182_v56  ;;  %4206 = vrcp.f32 %v1168_v12 }
 0x3ed   :  { %v4199_v4 = vpop.eup %4198  ;;  %v1181_v53 = vmul.f32 %v4197_v3, %v5069_v1  ;;  %4208 = vrcp.f32 %v1167_v57  ;;  %v1207_v57 = vld [vmem:[#allocation2 + $0x1b8] sm:$0xff] }
 0x3ee   :  { %v4201_v2 = vpop.eup %4200  ;;  %4210 = vtanh.f32 %v5113_v51  ;;  %v1170_v58 = vadd.f32 1.0, %v4199_v4  ;;  %v1206_v4 = vld [vmem:[#allocation2 + $0x1b0] sm:$0xff] }
 0x3ef   :  { %v5117_v59 = vadd.f32 %v1185_v11, %v1181_v53  ;;  %v1169_v61 = vadd.f32 1.0, %v4201_v2 }
 0x3f0   :  { %4212 = vrcp.f32 %v1170_v58 }
 0x3f1   :  { %4214 = vtanh.f32 %v5117_v59 }
 0x3f2   :  { %4216 = vrcp.f32 %v1169_v61 }
 0x3f4   :  { %v4203_v5 = vpop.eup %4202 }
 0x3f5   :  { %v4205_v50 = vpop.eup %4204 }
 0x3f6   :  { %v4207_v52 = vpop.eup %4206 }
 0x3f7   :  { %v4209_v60 = vpop.eup %4208  ;;  %v1196_v9 = vmul.f32 %v4207_v52, %v4203_v5 }
 0x3f8   :  { %v4211_v14 = vpop.eup %4210  ;;  %v1195_v6 = vmul.f32 %v4209_v60, %v4205_v50  ;;  %v1209_v50 = vld [vmem:[#allocation2 + $0x1c8] sm:$0xff] }
 0x3fa   :  { %v4213_v1 = vpop.eup %4212  ;;  %v3933_v7 = vpack.c.bf16 %v1196_v9, %v1195_v6 }
 0x3fb   :  { %v4215_v8 = vpop.eup %4214  ;;  %v1198_v36 = vmul.f32 %v4213_v1, %v4211_v14 }
 0x3fc   :  { %v4217_v15 = vpop.eup %4216  ;;  %3934 = vmatprep.subr.bf16.mxu1 %v3933_v7 }
 0x3fd   :  { %3936 = vmatpush3.bf16.msra.mxu1 %v3933_v7  ;;  %v1197_v16 = vmul.f32 %v4217_v15, %v4215_v8 }
 0x3ff   :  { %v3937_v33 = vpack.c.bf16 %v1198_v36, %v1197_v16  ;;  %v1208_v36 = vld [vmem:[#allocation2 + $0x1c0] sm:$0xff]  ;;  %v1211_v16 = vld [vmem:[#allocation2 + $0x1d8] sm:$0xff] }
 0x401   :  { %3938 = vmatprep.subr.bf16.mxu1 %v3937_v33 }
 0x402   :  { %3940 = vmatpush3.bf16.msra.mxu1 %v3937_v33 }
 0x405   :  { %3720 = vmatmul.mubr.msk.f32.vlgmr.msra.gmra.mrb[16].mxu1 %vm345_vm0, %v4759_v18 }
 0x406   :  { %3722 = vmatprep.mubr.msk.f32.mxu1 %vm345_vm0, %v4764_v19 }
 0x409   :  { %3723 = vmatmul.mubr.msk.f32.gmra.mrb[18].mxu1 %vm345_vm0, %v4769_v20 }
 0x40a   :  { %3725 = vmatprep.mubr.msk.f32.mxu1 %vm345_vm0, %v4774_v21 }
 0x40d   :  { %3726 = vmatmul.mubr.msk.f32.gmra.mrb[20].mxu1 %vm345_vm0, %v4779_v22 }
 0x40e   :  { %3728 = vmatprep.mubr.msk.f32.mxu1 %vm345_vm0, %v4784_v23 }
 0x411   :  { %3729 = vmatmul.mubr.msk.f32.gmra.mrb[22].mxu1 %vm345_vm0, %v4789_v24 }
 0x412   :  { %3731 = vmatprep.mubr.msk.f32.mxu1 %vm345_vm0, %v4794_v25 }
 0x415   :  { %3732 = vmatmul.mubr.msk.f32.gmra.mrb[24].mxu1 %vm345_vm0, %v4799_v26 }
 0x416   :  { %3734 = vmatprep.mubr.msk.f32.mxu1 %vm345_vm0, %v4804_v27 }
 0x419   :  { %3735 = vmatmul.mubr.msk.f32.gmra.mrb[26].mxu1 %vm345_vm0, %v4809_v28 }
 0x41a   :  { %3737 = vmatprep.mubr.msk.f32.mxu1 %vm345_vm0, %v4814_v29 }
 0x41d   :  { %3738 = vmatmul.mubr.msk.f32.gmra.mrb[28].mxu1 %vm345_vm0, %v4819_v30 }
 0x41e   :  { %3740 = vmatprep.mubr.msk.f32.mxu1 %vm345_vm0, %v4824_v31 }
 0x421   :  { %3741 = vmatmul.mubr.msk.f32.gmra.mrb[30].mxu1 %vm345_vm0, %v4829_v32 }
 0x422   :  { %3783 = vmatprep.mubr.msk.f32.mxu1 %vm345_vm0, %v4754_v17 }
 0x4d8   :  { %v3721_v37 = vpop.f32.mrb[16].mxu1 }
 0x4d9   :  { %v1362_v38 = vadd.f32 %v3721_v37, %v1201_v34  ;;  %v1282_v41 = vpop.f32.mrb[17].mxu1 }
 0x4da   :  { %v1361_v39 = vadd.f32 %v1282_v41, %v1200_v35 }
 0x4db   :  { %v3303_v42 = vmul.f32 -1.442695, %v1362_v38 }
 0x4dc   :  { %v3302_v44 = vmul.f32 -1.442695, %v1361_v39  ;;  %v3724_v45 = vpop.f32.mrb[18].mxu1 }
 0x4dd   :  { %4218 = vpow2.f32 %v3303_v42  ;;  %v1364_v46 = vadd.f32 %v3724_v45, %v1203_v40  ;;  %v1292_v47 = vpop.f32.mrb[19].mxu1  ;;  %v1210_v40 = vld [vmem:[#allocation2 + $0x1d0] sm:$0xff]  ;;  %v1212_v45 = vld [vmem:[#allocation2 + $0x1e0] sm:$0xff] }
 0x4de   :  { %4220 = vpow2.f32 %v3302_v44  ;;  %v1363_v48 = vadd.f32 %v1292_v47, %v1202_v43  ;;  %v1213_v43 = vld [vmem:[#allocation2 + $0x1e8] sm:$0xff] }
 0x4df   :  { %v3305_v0 = vmul.f32 -1.442695, %v1364_v46 }
 0x4e0   :  { %v3304_v11 = vmul.f32 -1.442695, %v1363_v48  ;;  %v3727_v54 = vpop.f32.mrb[20].mxu1 }
 0x4e1   :  { %4222 = vpow2.f32 %v3305_v0  ;;  %v1366_v12 = vadd.f32 %v3727_v54, %v1205_v63  ;;  %v1302_v13 = vpop.f32.mrb[21].mxu1 }
 0x4e2   :  { %4224 = vpow2.f32 %v3304_v11  ;;  %v1365_v56 = vadd.f32 %v1302_v13, %v1204_v49 }
 0x4e3   :  { %v3307_v3 = vmul.f32 -1.442695, %v1366_v12  ;;  %v1215_v12 = vld [vmem:[#allocation2 + $0x1f8] sm:$0xff] }
 0x4e4   :  { %v3306_v53 = vmul.f32 -1.442695, %v1365_v56  ;;  %v3730_v2 = vpop.f32.mrb[22].mxu1 }
 0x4e5   :  { %4226 = vpow2.f32 %v3307_v3  ;;  %v1368_v58 = vadd.f32 %v3730_v2, %v1207_v57  ;;  %v1312_v61 = vpop.f32.mrb[23].mxu1  ;;  %v1214_v57 = vld [vmem:[#allocation2 + $0x1f0] sm:$0xff] }
 0x4e6   :  { %4228 = vpow2.f32 %v3306_v53  ;;  %v1367_v5 = vadd.f32 %v1312_v61, %v1206_v4 }
 0x4e7   :  { %v4219_v52 = vpop.eup %4218  ;;  %v3309_v60 = vmul.f32 -1.442695, %v1368_v58 }
 0x4e8   :  { %v4221_v9 = vpop.eup %4220  ;;  %v1390_v14 = vadd.f32 1.0, %v4219_v52  ;;  %v3308_v6 = vmul.f32 -1.442695, %v1367_v5  ;;  %v3733_v1 = vpop.f32.mrb[24].mxu1 }
 0x4e9   :  { %v1389_v7 = vadd.f32 1.0, %v4221_v9  ;;  %4230 = vpow2.f32 %v3309_v60  ;;  %v1370_v8 = vadd.f32 %v3733_v1, %v1209_v50  ;;  %v1322_v15 = vpop.f32.mrb[25].mxu1 }
 0x4ea   :  { %4232 = vrcp.f32 %v1390_v14  ;;  %v1369_v37 = vadd.f32 %v1322_v15, %v1208_v36 }
 0x4eb   :  { %v4223_v33 = vpop.eup %4222  ;;  %4234 = vrcp.f32 %v1389_v7 }
 0x4ec   :  { %v4225_v34 = vpop.eup %4224  ;;  %v1392_v35 = vadd.f32 1.0, %v4223_v33  ;;  %4236 = vpow2.f32 %v3308_v6  ;;  %v3736_v38 = vpop.f32.mrb[26].mxu1 }
 0x4ed   :  { %v1391_v41 = vadd.f32 1.0, %v4225_v34  ;;  %4238 = vtanh.f32 %v1370_v8  ;;  %v1372_v39 = vadd.f32 %v3736_v38, %v1211_v16  ;;  %v1332_v42 = vpop.f32.mrb[27].mxu1 }
 0x4ee   :  { %4240 = vrcp.f32 %v1392_v35  ;;  %v1371_v48 = vadd.f32 %v1332_v42, %v1210_v40 }
 0x4ef   :  { %v4227_v44 = vpop.eup %4226  ;;  %4242 = vrcp.f32 %v1391_v41 }
 0x4f0   :  { %v4229_v46 = vpop.eup %4228  ;;  %v1414_v47 = vadd.f32 1.0, %v4227_v44  ;;  %4244 = vtanh.f32 %v1369_v37  ;;  %v3739_v63 = vpop.f32.mrb[28].mxu1 }
 0x4f1   :  { %v1413_v0 = vadd.f32 1.0, %v4229_v46  ;;  %4246 = vtanh.f32 %v1372_v39  ;;  %v1374_v49 = vadd.f32 %v3739_v63, %v1213_v43  ;;  %v1342_v11 = vpop.f32.mrb[29].mxu1 }
 0x4f2   :  { %4248 = vrcp.f32 %v1414_v47  ;;  %v1373_v54 = vadd.f32 %v1342_v11, %v1212_v45 }
 0x4f3   :  { %v4231_v13 = vpop.eup %4230  ;;  %4250 = vrcp.f32 %v1413_v0  ;;  %v3311_v56 = vmul.f32 -1.442695, %v1374_v49 }
 0x4f4   :  { %v4233_v3 = vpop.eup %4232  ;;  %v1416_v4 = vadd.f32 1.0, %v4231_v13  ;;  %4252 = vtanh.f32 %v1371_v48  ;;  %v3310_v53 = vmul.f32 -1.442695, %v1373_v54  ;;  %v3742_v2 = vpop.f32.mrb[30].mxu1 }
 0x4f5   :  { %v4235_v58 = vpop.eup %4234  ;;  %4254 = vpow2.f32 %v3311_v56  ;;  %v1376_v61 = vadd.f32 %v3742_v2, %v1215_v12  ;;  %v1352_v5 = vpop.f32.mrb[31].mxu1 }
 0x4f6   :  { %v4237_v50 = vpop.eup %4236  ;;  %4256 = vrcp.f32 %v1416_v4  ;;  %v1375_v52 = vadd.f32 %v1352_v5, %v1214_v57 }
 0x4f7   :  { %v4239_v60 = vpop.eup %4238  ;;  %v1415_v9 = vadd.f32 1.0, %v4237_v50  ;;  %4258 = vpow2.f32 %v3310_v53  ;;  %v3313_v14 = vmul.f32 -1.442695, %v1376_v61 }
 0x4f8   :  { %v4241_v6 = vpop.eup %4240  ;;  %v1458_v1 = vmul.f32 %v4239_v60, %v4233_v3  ;;  %v3312_v7 = vmul.f32 -1.442695, %v1375_v52  ;;  %v1475_v60 = vld [vmem:[#allocation2 + $0x208] sm:$0xff] }
 0x4f9   :  { %v4243_v8 = vpop.eup %4242  ;;  %4260 = vrcp.f32 %v1415_v9  ;;  %v1474_v9 = vld [vmem:[#allocation2 + $0x200] sm:$0xff] }
 0x4fa   :  { %v4245_v36 = vpop.eup %4244  ;;  %4262 = vpow2.f32 %v3313_v14 }
 0x4fb   :  { %v4247_v15 = vpop.eup %4246  ;;  %v1457_v16 = vmul.f32 %v4245_v36, %v4235_v58  ;;  %4264 = vpow2.f32 %v3312_v7 }
 0x4fc   :  { %v4249_v33 = vpop.eup %4248  ;;  %v1460_v34 = vmul.f32 %v4247_v15, %v4241_v6  ;;  %v1476_v15 = vld [vmem:[#allocation2 + $0x210] sm:$0xff] }
 0x4fd   :  { %v4251_v35 = vpop.eup %4250  ;;  %v1454_v37 = vmul.f32 %v4249_v33, %v5106_v10 }
 0x4fe   :  { %v4253_v38 = vpop.eup %4252  ;;  %v1453_v41 = vmul.f32 %v4251_v35, %v5108_v55 }
 0x4ff   :  { %v4255_v39 = vpop.eup %4254  ;;  %v5154_v40 = vadd.f32 %v1458_v1, %v1454_v37  ;;  %v1459_v42 = vmul.f32 %v4253_v38, %v4243_v8  ;;  %v1477_v8 = vld [vmem:[#allocation2 + $0x218] sm:$0xff]  ;;  %v1479_v38 = vld [vmem:[#allocation2 + $0x228] sm:$0xff] }
 0x500   :  { %v4257_v43 = vpop.eup %4256  ;;  %v5156_v44 = vadd.f32 %v1457_v16, %v1453_v41  ;;  %v1442_v45 = vadd.f32 1.0, %v4255_v39  ;;  %v1478_v39 = vld [vmem:[#allocation2 + $0x220] sm:$0xff] }
 0x501   :  { %v4259_v46 = vpop.eup %4258  ;;  %v1456_v47 = vmul.f32 %v4257_v43, %v5113_v51  ;;  %4266 = vtanh.f32 %v5154_v40 }
 0x502   :  { %4268 = vtanh.f32 %v5156_v44  ;;  %v1441_v48 = vadd.f32 1.0, %v4259_v46 }
 0x503   :  { %v4261_v10 = vpop.eup %4260  ;;  %v5161_v63 = vadd.f32 %v1460_v34, %v1456_v47  ;;  %4270 = vrcp.f32 %v1442_v45 }
 0x504   :  { %v4263_v55 = vpop.eup %4262  ;;  %v1455_v0 = vmul.f32 %v4261_v10, %v5117_v59  ;;  %4272 = vrcp.f32 %v1441_v48  ;;  %v1481_v48 = vld [vmem:[#allocation2 + $0x238] sm:$0xff] }
 0x505   :  { %v4265_v49 = vpop.eup %4264  ;;  %4274 = vtanh.f32 %v5161_v63  ;;  %v1444_v11 = vadd.f32 1.0, %v4263_v55  ;;  %v1480_v55 = vld [vmem:[#allocation2 + $0x230] sm:$0xff] }
 0x506   :  { %v5165_v54 = vadd.f32 %v1459_v42, %v1455_v0  ;;  %v1443_v51 = vadd.f32 1.0, %v4265_v49 }
 0x507   :  { %4276 = vrcp.f32 %v1444_v11 }
 0x508   :  { %4278 = vtanh.f32 %v5165_v54 }
 0x509   :  { %4280 = vrcp.f32 %v1443_v51 }
 0x50b   :  { %v4267_v12 = vpop.eup %4266 }
 0x50c   :  { %v4269_v13 = vpop.eup %4268 }
 0x50d   :  { %v4271_v56 = vpop.eup %4270 }
 0x50e   :  { %v4273_v57 = vpop.eup %4272  ;;  %v1470_v3 = vmul.f32 %v4271_v56, %v4267_v12 }
 0x50f   :  { %v4275_v4 = vpop.eup %4274  ;;  %v1469_v53 = vmul.f32 %v4273_v57, %v4269_v13  ;;  %v1483_v13 = vld [vmem:[#allocation2 + $0x248] sm:$0xff] }
 0x511   :  { %v4277_v59 = vpop.eup %4276  ;;  %v3941_v2 = vpack.c.bf16 %v1470_v3, %v1469_v53 }
 0x512   :  { %v4279_v58 = vpop.eup %4278  ;;  %v1472_v61 = vmul.f32 %v4277_v59, %v4275_v4 }
 0x513   :  { %v4281_v5 = vpop.eup %4280  ;;  %3942 = vmatprep.subr.bf16.mxu0 %v3941_v2 }
 0x514   :  { %3944 = vmatpush3.bf16.msra.mxu0 %v3941_v2  ;;  %v1471_v50 = vmul.f32 %v4281_v5, %v4279_v58 }
 0x516   :  { %v3945_v52 = vpack.c.bf16 %v1472_v61, %v1471_v50  ;;  %v1482_v61 = vld [vmem:[#allocation2 + $0x240] sm:$0xff]  ;;  %v1485_v50 = vld [vmem:[#allocation2 + $0x258] sm:$0xff] }
 0x518   :  { %3946 = vmatprep.subr.bf16.mxu0 %v3945_v52 }
 0x519   :  { %3948 = vmatpush3.bf16.msra.mxu0 %v3945_v52 }
 0x51c   :  { %3752 = vmatmul.mubr.msk.f32.vlgmr.msra.gmra.mrb[32].mxu0 %vm345_vm0, %v4759_v18 }
 0x51d   :  { %3754 = vmatprep.mubr.msk.f32.mxu0 %vm345_vm0, %v4764_v19 }
 0x520   :  { %3755 = vmatmul.mubr.msk.f32.gmra.mrb[34].mxu0 %vm345_vm0, %v4769_v20 }
 0x521   :  { %3757 = vmatprep.mubr.msk.f32.mxu0 %vm345_vm0, %v4774_v21 }
 0x524   :  { %3758 = vmatmul.mubr.msk.f32.gmra.mrb[36].mxu0 %vm345_vm0, %v4779_v22 }
 0x525   :  { %3760 = vmatprep.mubr.msk.f32.mxu0 %vm345_vm0, %v4784_v23 }
 0x528   :  { %3761 = vmatmul.mubr.msk.f32.gmra.mrb[38].mxu0 %vm345_vm0, %v4789_v24 }
 0x529   :  { %3763 = vmatprep.mubr.msk.f32.mxu0 %vm345_vm0, %v4794_v25 }
 0x52c   :  { %3764 = vmatmul.mubr.msk.f32.gmra.mrb[40].mxu0 %vm345_vm0, %v4799_v26 }
 0x52d   :  { %3766 = vmatprep.mubr.msk.f32.mxu0 %vm345_vm0, %v4804_v27 }
 0x530   :  { %3767 = vmatmul.mubr.msk.f32.gmra.mrb[42].mxu0 %vm345_vm0, %v4809_v28 }
 0x531   :  { %3769 = vmatprep.mubr.msk.f32.mxu0 %vm345_vm0, %v4814_v29 }
 0x534   :  { %3770 = vmatmul.mubr.msk.f32.gmra.mrb[44].mxu0 %vm345_vm0, %v4819_v30 }
 0x535   :  { %3772 = vmatprep.mubr.msk.f32.mxu0 %vm345_vm0, %v4824_v31 }
 0x538   :  { %3773 = vmatmul.mubr.msk.f32.gmra.mrb[46].mxu0 %vm345_vm0, %v4829_v32 }
 0x539   :  { %3815 = vmatprep.mubr.msk.f32.mxu0 %vm345_vm0, %v4754_v17 }
 0x5ef   :  { %v3753_v14 = vpop.f32.mrb[32].mxu0 }
 0x5f0   :  { %v1636_v6 = vadd.f32 %v3753_v14, %v1475_v60  ;;  %v1556_v1 = vpop.f32.mrb[33].mxu0 }
 0x5f1   :  { %v1635_v7 = vadd.f32 %v1556_v1, %v1474_v9 }
 0x5f2   :  { %v3331_v36 = vmul.f32 -1.442695, %v1636_v6 }
 0x5f3   :  { %v3330_v16 = vmul.f32 -1.442695, %v1635_v7  ;;  %v3756_v33 = vpop.f32.mrb[34].mxu0 }
 0x5f4   :  { %4282 = vpow2.f32 %v3331_v36  ;;  %v1638_v34 = vadd.f32 %v3756_v33, %v1477_v8  ;;  %v1566_v35 = vpop.f32.mrb[35].mxu0  ;;  %v1484_v8 = vld [vmem:[#allocation2 + $0x250] sm:$0xff]  ;;  %v1486_v33 = vld [vmem:[#allocation2 + $0x260] sm:$0xff] }
 0x5f5   :  { %4284 = vpow2.f32 %v3330_v16  ;;  %v1637_v37 = vadd.f32 %v1566_v35, %v1476_v15  ;;  %v1487_v15 = vld [vmem:[#allocation2 + $0x268] sm:$0xff] }
 0x5f6   :  { %v3333_v41 = vmul.f32 -1.442695, %v1638_v34 }
 0x5f7   :  { %v3332_v42 = vmul.f32 -1.442695, %v1637_v37  ;;  %v3759_v43 = vpop.f32.mrb[36].mxu0 }
 0x5f8   :  { %4286 = vpow2.f32 %v3333_v41  ;;  %v1640_v45 = vadd.f32 %v3759_v43, %v1479_v38  ;;  %v1576_v46 = vpop.f32.mrb[37].mxu0 }
 0x5f9   :  { %4288 = vpow2.f32 %v3332_v42  ;;  %v1639_v47 = vadd.f32 %v1576_v46, %v1478_v39 }
 0x5fa   :  { %v3335_v10 = vmul.f32 -1.442695, %v1640_v45  ;;  %v1489_v45 = vld [vmem:[#allocation2 + $0x278] sm:$0xff] }
 0x5fb   :  { %v3334_v0 = vmul.f32 -1.442695, %v1639_v47  ;;  %v3762_v49 = vpop.f32.mrb[38].mxu0 }
 0x5fc   :  { %4290 = vpow2.f32 %v3335_v10  ;;  %v1642_v11 = vadd.f32 %v3762_v49, %v1481_v48  ;;  %v1586_v51 = vpop.f32.mrb[39].mxu0  ;;  %v1488_v48 = vld [vmem:[#allocation2 + $0x270] sm:$0xff] }
 0x5fd   :  { %4292 = vpow2.f32 %v3334_v0  ;;  %v1641_v12 = vadd.f32 %v1586_v51, %v1480_v55 }
 0x5fe   :  { %v4283_v56 = vpop.eup %4282  ;;  %v3337_v57 = vmul.f32 -1.442695, %v1642_v11 }
 0x5ff   :  { %v4285_v3 = vpop.eup %4284  ;;  %v1664_v4 = vadd.f32 1.0, %v4283_v56  ;;  %v3336_v53 = vmul.f32 -1.442695, %v1641_v12  ;;  %v3765_v59 = vpop.f32.mrb[40].mxu0 }
 0x600   :  { %v1663_v2 = vadd.f32 1.0, %v4285_v3  ;;  %4294 = vpow2.f32 %v3337_v57  ;;  %v1644_v58 = vadd.f32 %v3765_v59, %v1483_v13  ;;  %v1596_v5 = vpop.f32.mrb[41].mxu0 }
 0x601   :  { %4296 = vrcp.f32 %v1664_v4  ;;  %v1643_v14 = vadd.f32 %v1596_v5, %v1482_v61 }
 0x602   :  { %v4287_v52 = vpop.eup %4286  ;;  %4298 = vrcp.f32 %v1663_v2 }
 0x603   :  { %v4289_v60 = vpop.eup %4288  ;;  %v1666_v9 = vadd.f32 1.0, %v4287_v52  ;;  %4300 = vpow2.f32 %v3336_v53  ;;  %v3768_v6 = vpop.f32.mrb[42].mxu0 }
 0x604   :  { %v1665_v1 = vadd.f32 1.0, %v4289_v60  ;;  %4302 = vtanh.f32 %v1644_v58  ;;  %v1646_v7 = vadd.f32 %v3768_v6, %v1485_v50  ;;  %v1606_v36 = vpop.f32.mrb[43].mxu0 }
 0x605   :  { %4304 = vrcp.f32 %v1666_v9  ;;  %v1645_v37 = vadd.f32 %v1606_v36, %v1484_v8 }
 0x606   :  { %v4291_v16 = vpop.eup %4290  ;;  %4306 = vrcp.f32 %v1665_v1 }
 0x607   :  { %v4293_v34 = vpop.eup %4292  ;;  %v1688_v35 = vadd.f32 1.0, %v4291_v16  ;;  %4308 = vtanh.f32 %v1643_v14  ;;  %v3771_v38 = vpop.f32.mrb[44].mxu0 }
 0x608   :  { %v1687_v41 = vadd.f32 1.0, %v4293_v34  ;;  %4310 = vtanh.f32 %v1646_v7  ;;  %v1648_v39 = vadd.f32 %v3771_v38, %v1487_v15  ;;  %v1616_v42 = vpop.f32.mrb[45].mxu0 }
 0x609   :  { %4312 = vrcp.f32 %v1688_v35  ;;  %v1647_v43 = vadd.f32 %v1616_v42, %v1486_v33 }
 0x60a   :  { %v4295_v46 = vpop.eup %4294  ;;  %4314 = vrcp.f32 %v1687_v41  ;;  %v3339_v47 = vmul.f32 -1.442695, %v1648_v39 }
 0x60b   :  { %v4297_v10 = vpop.eup %4296  ;;  %v1690_v55 = vadd.f32 1.0, %v4295_v46  ;;  %4316 = vtanh.f32 %v1645_v37  ;;  %v3338_v0 = vmul.f32 -1.442695, %v1647_v43  ;;  %v3774_v49 = vpop.f32.mrb[46].mxu0 }
 0x60c   :  { %v4299_v11 = vpop.eup %4298  ;;  %4318 = vpow2.f32 %v3339_v47  ;;  %v1650_v51 = vadd.f32 %v3774_v49, %v1489_v45  ;;  %v1626_v12 = vpop.f32.mrb[47].mxu0 }
 0x60d   :  { %v4301_v13 = vpop.eup %4300  ;;  %4320 = vrcp.f32 %v1690_v55  ;;  %v1649_v56 = vadd.f32 %v1626_v12, %v1488_v48 }
 0x60e   :  { %v4303_v57 = vpop.eup %4302  ;;  %v1689_v3 = vadd.f32 1.0, %v4301_v13  ;;  %4322 = vpow2.f32 %v3338_v0  ;;  %v3341_v4 = vmul.f32 -1.442695, %v1650_v51 }
 0x60f   :  { %v4305_v53 = vpop.eup %4304  ;;  %v1732_v59 = vmul.f32 %v4303_v57, %v4297_v10  ;;  %v3340_v2 = vmul.f32 -1.442695, %v1649_v56  ;;  %v1749_v57 = vld [vmem:[#allocation2 + $0x288] sm:$0xff] }
 0x610   :  { %v4307_v58 = vpop.eup %4306  ;;  %4324 = vrcp.f32 %v1689_v3  ;;  %v1748_v3 = vld [vmem:[#allocation2 + $0x280] sm:$0xff] }
 0x611   :  { %v4309_v61 = vpop.eup %4308  ;;  %4326 = vpow2.f32 %v3341_v4 }
 0x612   :  { %v4311_v5 = vpop.eup %4310  ;;  %v1731_v50 = vmul.f32 %v4309_v61, %v4299_v11  ;;  %4328 = vpow2.f32 %v3340_v2 }
 0x613   :  { %v4313_v52 = vpop.eup %4312  ;;  %v1734_v60 = vmul.f32 %v4311_v5, %v4305_v53  ;;  %v1750_v5 = vld [vmem:[#allocation2 + $0x290] sm:$0xff] }
 0x614   :  { %v4315_v9 = vpop.eup %4314  ;;  %v1728_v14 = vmul.f32 %v4313_v52, %v5154_v40 }
 0x615   :  { %v4317_v6 = vpop.eup %4316  ;;  %v1727_v1 = vmul.f32 %v4315_v9, %v5156_v44 }
 0x616   :  { %v4319_v7 = vpop.eup %4318  ;;  %v5202_v8 = vadd.f32 %v1732_v59, %v1728_v14  ;;  %v1733_v36 = vmul.f32 %v4317_v6, %v4307_v58  ;;  %v1751_v58 = vld [vmem:[#allocation2 + $0x298] sm:$0xff]  ;;  %v1753_v6 = vld [vmem:[#allocation2 + $0x2a8] sm:$0xff] }
 0x617   :  { %v4321_v15 = vpop.eup %4320  ;;  %v5204_v16 = vadd.f32 %v1731_v50, %v1727_v1  ;;  %v1716_v33 = vadd.f32 1.0, %v4319_v7  ;;  %v1752_v7 = vld [vmem:[#allocation2 + $0x2a0] sm:$0xff] }
 0x618   :  { %v4323_v34 = vpop.eup %4322  ;;  %v1730_v35 = vmul.f32 %v4321_v15, %v5161_v63  ;;  %4330 = vtanh.f32 %v5202_v8 }
 0x619   :  { %4332 = vtanh.f32 %v5204_v16  ;;  %v1715_v37 = vadd.f32 1.0, %v4323_v34 }
 0x61a   :  { %v4325_v40 = vpop.eup %4324  ;;  %v5209_v38 = vadd.f32 %v1734_v60, %v1730_v35  ;;  %4334 = vrcp.f32 %v1716_v33  ;;  %v1755_v35 = vld [vmem:[#allocation2 + $0x2b8] sm:$0xff] }
 0x61b   :  { %v4327_v44 = vpop.eup %4326  ;;  %v1729_v41 = vmul.f32 %v4325_v40, %v5165_v54  ;;  %4336 = vrcp.f32 %v1715_v37  ;;  %v1754_v40 = vld [vmem:[#allocation2 + $0x2b0] sm:$0xff] }
 0x61c   :  { %v4329_v39 = vpop.eup %4328  ;;  %4338 = vtanh.f32 %v5209_v38  ;;  %v1718_v42 = vadd.f32 1.0, %v4327_v44 }
 0x61d   :  { %v5213_v43 = vadd.f32 %v1733_v36, %v1729_v41  ;;  %v1717_v63 = vadd.f32 1.0, %v4329_v39 }
 0x61e   :  { %4340 = vrcp.f32 %v1718_v42 }
 0x61f   :  { %4342 = vtanh.f32 %v5213_v43 }
 0x620   :  { %4344 = vrcp.f32 %v1717_v63 }
 0x622   :  { %v4331_v45 = vpop.eup %4330 }
 0x623   :  { %v4333_v46 = vpop.eup %4332 }
 0x624   :  { %v4335_v47 = vpop.eup %4334 }
 0x625   :  { %v4337_v48 = vpop.eup %4336  ;;  %v1744_v10 = vmul.f32 %v4335_v47, %v4331_v45  ;;  %v1757_v45 = vld [vmem:[#allocation2 + $0x2c8] sm:$0xff] }
 0x626   :  { %v4339_v55 = vpop.eup %4338  ;;  %v1743_v0 = vmul.f32 %v4337_v48, %v4333_v46 }
 0x628   :  { %v4341_v54 = vpop.eup %4340  ;;  %v3949_v49 = vpack.c.bf16 %v1744_v10, %v1743_v0 }
 0x629   :  { %v4343_v11 = vpop.eup %4342  ;;  %v1746_v51 = vmul.f32 %v4341_v54, %v4339_v55 }
 0x62a   :  { %v4345_v12 = vpop.eup %4344  ;;  %3950 = vmatprep.subr.bf16.mxu1 %v3949_v49 }
 0x62b   :  { %3952 = vmatpush3.bf16.msra.mxu1 %v3949_v49  ;;  %v1745_v13 = vmul.f32 %v4345_v12, %v4343_v11  ;;  %v1756_v11 = vld [vmem:[#allocation2 + $0x2c0] sm:$0xff]  ;;  %v1759_v12 = vld [vmem:[#allocation2 + $0x2d8] sm:$0xff] }
 0x62d   :  { %v3953_v56 = vpack.c.bf16 %v1746_v51, %v1745_v13 }
 0x62f   :  { %3954 = vmatprep.subr.bf16.mxu1 %v3953_v56 }
 0x630   :  { %3956 = vmatpush3.bf16.msra.mxu1 %v3953_v56 }
 0x633   :  { %3784 = vmatmul.mubr.msk.f32.vlgmr.msra.gmra.mrb[32].mxu1 %vm345_vm0, %v4759_v18 }
 0x634   :  { %3786 = vmatprep.mubr.msk.f32.mxu1 %vm345_vm0, %v4764_v19 }
 0x637   :  { %3787 = vmatmul.mubr.msk.f32.gmra.mrb[34].mxu1 %vm345_vm0, %v4769_v20 }
 0x638   :  { %3789 = vmatprep.mubr.msk.f32.mxu1 %vm345_vm0, %v4774_v21 }
 0x63b   :  { %3790 = vmatmul.mubr.msk.f32.gmra.mrb[36].mxu1 %vm345_vm0, %v4779_v22 }
 0x63c   :  { %3792 = vmatprep.mubr.msk.f32.mxu1 %vm345_vm0, %v4784_v23 }
 0x63f   :  { %3793 = vmatmul.mubr.msk.f32.gmra.mrb[38].mxu1 %vm345_vm0, %v4789_v24 }
 0x640   :  { %3795 = vmatprep.mubr.msk.f32.mxu1 %vm345_vm0, %v4794_v25 }
 0x643   :  { %3796 = vmatmul.mubr.msk.f32.gmra.mrb[40].mxu1 %vm345_vm0, %v4799_v26 }
 0x644   :  { %3798 = vmatprep.mubr.msk.f32.mxu1 %vm345_vm0, %v4804_v27 }
 0x647   :  { %3799 = vmatmul.mubr.msk.f32.gmra.mrb[42].mxu1 %vm345_vm0, %v4809_v28 }
 0x648   :  { %3801 = vmatprep.mubr.msk.f32.mxu1 %vm345_vm0, %v4814_v29 }
 0x64b   :  { %3802 = vmatmul.mubr.msk.f32.gmra.mrb[44].mxu1 %vm345_vm0, %v4819_v30 }
 0x64c   :  { %3804 = vmatprep.mubr.msk.f32.mxu1 %vm345_vm0, %v4824_v31 }
 0x64f   :  { %3805 = vmatmul.mubr.msk.f32.gmra.mrb[46].mxu1 %vm345_vm0, %v4829_v32 }
 0x650   :  { %3847 = vmatprep.mubr.msk.f32.mxu1 %vm345_vm0, %v4754_v17 }
 0x706   :  { %v3785_v4 = vpop.f32.mrb[32].mxu1 }
 0x707   :  { %v1910_v53 = vadd.f32 %v3785_v4, %v1749_v57  ;;  %v1830_v59 = vpop.f32.mrb[33].mxu1 }
 0x708   :  { %v1909_v2 = vadd.f32 %v1830_v59, %v1748_v3 }
 0x709   :  { %v3359_v61 = vmul.f32 -1.442695, %v1910_v53 }
 0x70a   :  { %v3358_v50 = vmul.f32 -1.442695, %v1909_v2  ;;  %v3788_v52 = vpop.f32.mrb[34].mxu1  ;;  %v1758_v2 = vld [vmem:[#allocation2 + $0x2d0] sm:$0xff] }
 0x70b   :  { %4346 = vpow2.f32 %v3359_v61  ;;  %v1912_v60 = vadd.f32 %v3788_v52, %v1751_v58  ;;  %v1840_v9 = vpop.f32.mrb[35].mxu1  ;;  %v1761_v61 = vld [vmem:[#allocation2 + $0x2e8] sm:$0xff] }
 0x70c   :  { %4348 = vpow2.f32 %v3358_v50  ;;  %v1911_v14 = vadd.f32 %v1840_v9, %v1750_v5  ;;  %v1760_v50 = vld [vmem:[#allocation2 + $0x2e0] sm:$0xff] }
 0x70d   :  { %v3361_v1 = vmul.f32 -1.442695, %v1912_v60 }
 0x70e   :  { %v3360_v17 = vmul.f32 -1.442695, %v1911_v14  ;;  %v3791_v36 = vpop.f32.mrb[36].mxu1 }
 0x70f   :  { %4350 = vpow2.f32 %v3361_v1  ;;  %v1914_v15 = vadd.f32 %v3791_v36, %v1753_v6  ;;  %v1850_v33 = vpop.f32.mrb[37].mxu1  ;;  %v1763_v36 = vld [vmem:[#allocation2 + $0x2f8] sm:$0xff] }
 0x710   :  { %4352 = vpow2.f32 %v3360_v17  ;;  %v1913_v34 = vadd.f32 %v1850_v33, %v1752_v7 }
 0x711   :  { %v3363_v37 = vmul.f32 -1.442695, %v1914_v15 }
 0x712   :  { %v3362_v44 = vmul.f32 -1.442695, %v1913_v34  ;;  %v3794_v41 = vpop.f32.mrb[38].mxu1  ;;  %v1762_v34 = vld [vmem:[#allocation2 + $0x2f0] sm:$0xff] }
 0x713   :  { %4354 = vpow2.f32 %v3363_v37  ;;  %v1916_v39 = vadd.f32 %v3794_v41, %v1755_v35  ;;  %v1860_v42 = vpop.f32.mrb[39].mxu1 }
 0x714   :  { %4356 = vpow2.f32 %v3362_v44  ;;  %v1915_v63 = vadd.f32 %v1860_v42, %v1754_v40 }
 0x715   :  { %v4347_v46 = vpop.eup %4346  ;;  %v3365_v47 = vmul.f32 -1.442695, %v1916_v39 }
 0x716   :  { %v4349_v48 = vpop.eup %4348  ;;  %v1938_v10 = vadd.f32 1.0, %v4347_v46  ;;  %v3364_v55 = vmul.f32 -1.442695, %v1915_v63  ;;  %v3797_v0 = vpop.f32.mrb[40].mxu1 }
 0x717   :  { %v1937_v54 = vadd.f32 1.0, %v4349_v48  ;;  %4358 = vpow2.f32 %v3365_v47  ;;  %v1918_v49 = vadd.f32 %v3797_v0, %v1757_v45  ;;  %v1870_v51 = vpop.f32.mrb[41].mxu1 }
 0x718   :  { %4360 = vrcp.f32 %v1938_v10  ;;  %v1917_v3 = vadd.f32 %v1870_v51, %v1756_v11 }
 0x719   :  { %v4351_v13 = vpop.eup %4350  ;;  %4362 = vrcp.f32 %v1937_v54 }
 0x71a   :  { %v4353_v56 = vpop.eup %4352  ;;  %v1940_v57 = vadd.f32 1.0, %v4351_v13  ;;  %4364 = vpow2.f32 %v3364_v55  ;;  %v3800_v4 = vpop.f32.mrb[42].mxu1 }
 0x71b   :  { %v1939_v53 = vadd.f32 1.0, %v4353_v56  ;;  %4366 = vtanh.f32 %v1918_v49  ;;  %v1920_v59 = vadd.f32 %v3800_v4, %v1759_v12  ;;  %v1880_v58 = vpop.f32.mrb[43].mxu1 }
 0x71c   :  { %4368 = vrcp.f32 %v1940_v57  ;;  %v1919_v9 = vadd.f32 %v1880_v58, %v1758_v2 }
 0x71d   :  { %v4355_v5 = vpop.eup %4354  ;;  %4370 = vrcp.f32 %v1939_v53 }
 0x71e   :  { %v4357_v52 = vpop.eup %4356  ;;  %v1962_v60 = vadd.f32 1.0, %v4355_v5  ;;  %4372 = vtanh.f32 %v1917_v3  ;;  %v3803_v14 = vpop.f32.mrb[44].mxu1 }
 0x71f   :  { %v1961_v6 = vadd.f32 1.0, %v4357_v52  ;;  %4374 = vtanh.f32 %v1920_v59  ;;  %v1922_v1 = vadd.f32 %v3803_v14, %v1761_v61  ;;  %v1890_v7 = vpop.f32.mrb[45].mxu1 }
 0x720   :  { %4376 = vrcp.f32 %v1962_v60  ;;  %v1921_v17 = vadd.f32 %v1890_v7, %v1760_v50 }
 0x721   :  { %v4359_v15 = vpop.eup %4358  ;;  %4378 = vrcp.f32 %v1961_v6  ;;  %v3367_v33 = vmul.f32 -1.442695, %v1922_v1 }
 0x722   :  { %v4361_v35 = vpop.eup %4360  ;;  %v1964_v37 = vadd.f32 1.0, %v4359_v15  ;;  %4380 = vtanh.f32 %v1919_v9  ;;  %v3366_v40 = vmul.f32 -1.442695, %v1921_v17  ;;  %v3806_v44 = vpop.f32.mrb[46].mxu1 }
 0x723   :  { %v4363_v41 = vpop.eup %4362  ;;  %4382 = vpow2.f32 %v3367_v33  ;;  %v1924_v39 = vadd.f32 %v3806_v44, %v1763_v36  ;;  %v1900_v42 = vpop.f32.mrb[47].mxu1 }
 0x724   :  { %v4365_v63 = vpop.eup %4364  ;;  %4384 = vrcp.f32 %v1964_v37  ;;  %v1923_v45 = vadd.f32 %v1900_v42, %v1762_v34 }
 0x725   :  { %v4367_v46 = vpop.eup %4366  ;;  %v1963_v47 = vadd.f32 1.0, %v4365_v63  ;;  %4386 = vpow2.f32 %v3366_v40  ;;  %v3369_v48 = vmul.f32 -1.442695, %v1924_v39 }
 0x726   :  { %v4369_v10 = vpop.eup %4368  ;;  %v2006_v55 = vmul.f32 %v4367_v46, %v4361_v35  ;;  %v3368_v0 = vmul.f32 -1.442695, %v1923_v45  ;;  %v2023_v45 = vld [vmem:[#allocation2 + $0x308] sm:$0xff]  ;;  %v2022_v46 = vld [vmem:[#allocation2 + $0x300] sm:$0xff] }
 0x727   :  { %v4371_v54 = vpop.eup %4370  ;;  %4388 = vrcp.f32 %v1963_v47 }
 0x728   :  { %v4373_v49 = vpop.eup %4372  ;;  %4390 = vpow2.f32 %v3369_v48 }
 0x729   :  { %v4375_v11 = vpop.eup %4374  ;;  %v2005_v51 = vmul.f32 %v4373_v49, %v4363_v41  ;;  %4392 = vpow2.f32 %v3368_v0  ;;  %v2025_v0 = vld [vmem:[#allocation2 + $0x318] sm:$0xff]  ;;  %v2024_v49 = vld [vmem:[#allocation2 + $0x310] sm:$0xff] }
 0x72a   :  { %v4377_v12 = vpop.eup %4376  ;;  %v2008_v13 = vmul.f32 %v4375_v11, %v4369_v10 }
 0x72b   :  { %v4379_v56 = vpop.eup %4378  ;;  %v2002_v57 = vmul.f32 %v4377_v12, %v5202_v8 }
 0x72c   :  { %v4381_v3 = vpop.eup %4380  ;;  %v2001_v4 = vmul.f32 %v4379_v56, %v5204_v16 }
 0x72d   :  { %v4383_v53 = vpop.eup %4382  ;;  %v5250_v59 = vadd.f32 %v2006_v55, %v2002_v57  ;;  %v2007_v2 = vmul.f32 %v4381_v3, %v4371_v54  ;;  %v2027_v57 = vld [vmem:[#allocation2 + $0x328] sm:$0xff] }
 0x72e   :  { %v4385_v58 = vpop.eup %4384  ;;  %v5252_v61 = vadd.f32 %v2005_v51, %v2001_v4  ;;  %v1990_v5 = vadd.f32 1.0, %v4383_v53  ;;  %v2026_v4 = vld [vmem:[#allocation2 + $0x320] sm:$0xff] }
 0x72f   :  { %v4387_v50 = vpop.eup %4386  ;;  %v2004_v52 = vmul.f32 %v4385_v58, %v5209_v38  ;;  %4394 = vtanh.f32 %v5250_v59 }
 0x730   :  { %4396 = vtanh.f32 %v5252_v61  ;;  %v1989_v60 = vadd.f32 1.0, %v4387_v50 }
 0x731   :  { %v4389_v8 = vpop.eup %4388  ;;  %v5257_v9 = vadd.f32 %v2008_v13, %v2004_v52  ;;  %4398 = vrcp.f32 %v1990_v5  ;;  %v2029_v52 = vld [vmem:[#allocation2 + $0x338] sm:$0xff] }
 0x732   :  { %v4391_v16 = vpop.eup %4390  ;;  %v2003_v14 = vmul.f32 %v4389_v8, %v5213_v43  ;;  %4400 = vrcp.f32 %v1989_v60  ;;  %v2028_v8 = vld [vmem:[#allocation2 + $0x330] sm:$0xff] }
 0x733   :  { %v4393_v6 = vpop.eup %4392  ;;  %4402 = vtanh.f32 %v5257_v9  ;;  %v1992_v1 = vadd.f32 1.0, %v4391_v16 }
 0x734   :  { %v5261_v7 = vadd.f32 %v2007_v2, %v2003_v14  ;;  %v1991_v38 = vadd.f32 1.0, %v4393_v6 }
 0x735   :  { %4404 = vrcp.f32 %v1992_v1 }
 0x736   :  { %4406 = vtanh.f32 %v5261_v7 }
 0x737   :  { %4408 = vrcp.f32 %v1991_v38 }
 0x739   :  { %v4395_v17 = vpop.eup %4394 }
 0x73a   :  { %v4397_v36 = vpop.eup %4396 }
 0x73b   :  { %v4399_v15 = vpop.eup %4398 }
 0x73c   :  { %v4401_v33 = vpop.eup %4400  ;;  %v2018_v34 = vmul.f32 %v4399_v15, %v4395_v17  ;;  %v2031_v17 = vld [vmem:[#allocation2 + $0x348] sm:$0xff] }
 0x73d   :  { %v4403_v35 = vpop.eup %4402  ;;  %v2017_v37 = vmul.f32 %v4401_v33, %v4397_v36 }
 0x73f   :  { %v4405_v43 = vpop.eup %4404  ;;  %v3957_v40 = vpack.c.bf16 %v2018_v34, %v2017_v37 }
 0x740   :  { %v4407_v44 = vpop.eup %4406  ;;  %v2020_v41 = vmul.f32 %v4405_v43, %v4403_v35 }
 0x741   :  { %v4409_v39 = vpop.eup %4408  ;;  %3958 = vmatprep.subr.bf16.mxu0 %v3957_v40 }
 0x742   :  { %3960 = vmatpush3.bf16.msra.mxu0 %v3957_v40  ;;  %v2019_v42 = vmul.f32 %v4409_v39, %v4407_v44  ;;  %v2030_v44 = vld [vmem:[#allocation2 + $0x340] sm:$0xff]  ;;  %v2033_v39 = vld [vmem:[#allocation2 + $0x358] sm:$0xff] }
 0x744   :  { %v3961_v63 = vpack.c.bf16 %v2020_v41, %v2019_v42 }
 0x746   :  { %3962 = vmatprep.subr.bf16.mxu0 %v3961_v63 }
 0x747   :  { %3964 = vmatpush3.bf16.msra.mxu0 %v3961_v63 }
 0x74a   :  { %3816 = vmatmul.mubr.msk.f32.vlgmr.msra.gmra.mrb[48].mxu0 %vm345_vm0, %v4759_v18 }
 0x74b   :  { %3818 = vmatprep.mubr.msk.f32.mxu0 %vm345_vm0, %v4764_v19 }
 0x74e   :  { %3819 = vmatmul.mubr.msk.f32.gmra.mrb[50].mxu0 %vm345_vm0, %v4769_v20 }
 0x74f   :  { %3821 = vmatprep.mubr.msk.f32.mxu0 %vm345_vm0, %v4774_v21 }
 0x752   :  { %3822 = vmatmul.mubr.msk.f32.gmra.mrb[52].mxu0 %vm345_vm0, %v4779_v22 }
 0x753   :  { %3824 = vmatprep.mubr.msk.f32.mxu0 %vm345_vm0, %v4784_v23 }
 0x756   :  { %3825 = vmatmul.mubr.msk.f32.gmra.mrb[54].mxu0 %vm345_vm0, %v4789_v24 }
 0x757   :  { %3827 = vmatprep.mubr.msk.f32.mxu0 %vm345_vm0, %v4794_v25 }
 0x75a   :  { %3828 = vmatmul.mubr.msk.f32.gmra.mrb[56].mxu0 %vm345_vm0, %v4799_v26 }
 0x75b   :  { %3830 = vmatprep.mubr.msk.f32.mxu0 %vm345_vm0, %v4804_v27 }
 0x75e   :  { %3831 = vmatmul.mubr.msk.f32.gmra.mrb[58].mxu0 %vm345_vm0, %v4809_v28 }
 0x75f   :  { %3833 = vmatprep.mubr.msk.f32.mxu0 %vm345_vm0, %v4814_v29 }
 0x762   :  { %3834 = vmatmul.mubr.msk.f32.gmra.mrb[60].mxu0 %vm345_vm0, %v4819_v30 }
 0x763   :  { %3836 = vmatprep.mubr.msk.f32.mxu0 %vm345_vm0, %v4824_v31 }
 0x766   :  { %3837 = vmatmul.mubr.msk.f32.gmra.mrb[62].mxu0 %vm345_vm0, %v4829_v32 }
 0x81d   :  { %v3817_v47 = vpop.f32.mrb[48].mxu0 }
 0x81e   :  { %v2184_v48 = vadd.f32 %v3817_v47, %v2023_v45  ;;  %v2104_v10 = vpop.f32.mrb[49].mxu0 }
 0x81f   :  { %v2183_v55 = vadd.f32 %v2104_v10, %v2022_v46 }
 0x820   :  { %v3387_v54 = vmul.f32 -1.442695, %v2184_v48 }
 0x821   :  { %v3386_v11 = vmul.f32 -1.442695, %v2183_v55  ;;  %v3820_v51 = vpop.f32.mrb[50].mxu0  ;;  %v2032_v55 = vld [vmem:[#allocation2 + $0x350] sm:$0xff] }
 0x822   :  { %4410 = vpow2.f32 %v3387_v54  ;;  %v2186_v12 = vadd.f32 %v3820_v51, %v2025_v0  ;;  %v2114_v13 = vpop.f32.mrb[51].mxu0  ;;  %v2035_v54 = vld [vmem:[#allocation2 + $0x368] sm:$0xff] }
 0x823   :  { %4412 = vpow2.f32 %v3386_v11  ;;  %v2185_v56 = vadd.f32 %v2114_v13, %v2024_v49  ;;  %v2034_v11 = vld [vmem:[#allocation2 + $0x360] sm:$0xff] }
 0x824   :  { %v3389_v3 = vmul.f32 -1.442695, %v2186_v12 }
 0x825   :  { %v3388_v53 = vmul.f32 -1.442695, %v2185_v56  ;;  %v3823_v2 = vpop.f32.mrb[52].mxu0 }
 0x826   :  { %4414 = vpow2.f32 %v3389_v3  ;;  %v2188_v58 = vadd.f32 %v3823_v2, %v2027_v57  ;;  %v2124_v5 = vpop.f32.mrb[53].mxu0  ;;  %v2037_v2 = vld [vmem:[#allocation2 + $0x378] sm:$0xff] }
 0x827   :  { %4416 = vpow2.f32 %v3388_v53  ;;  %v2187_v50 = vadd.f32 %v2124_v5, %v2026_v4 }
 0x828   :  { %v3391_v60 = vmul.f32 -1.442695, %v2188_v58 }
 0x829   :  { %v3390_v16 = vmul.f32 -1.442695, %v2187_v50  ;;  %v3826_v14 = vpop.f32.mrb[54].mxu0  ;;  %v2036_v50 = vld [vmem:[#allocation2 + $0x370] sm:$0xff] }
 0x82a   :  { %4418 = vpow2.f32 %v3391_v60  ;;  %v2190_v6 = vadd.f32 %v3826_v14, %v2029_v52  ;;  %v2134_v1 = vpop.f32.mrb[55].mxu0 }
 0x82b   :  { %4420 = vpow2.f32 %v3390_v16  ;;  %v2189_v38 = vadd.f32 %v2134_v1, %v2028_v8 }
 0x82c   :  { %v4411_v36 = vpop.eup %4410  ;;  %v3393_v15 = vmul.f32 -1.442695, %v2190_v6 }
 0x82d   :  { %v4413_v33 = vpop.eup %4412  ;;  %v2212_v34 = vadd.f32 1.0, %v4411_v36  ;;  %v3392_v35 = vmul.f32 -1.442695, %v2189_v38  ;;  %v3829_v37 = vpop.f32.mrb[56].mxu0 }
 0x82e   :  { %v2211_v43 = vadd.f32 1.0, %v4413_v33  ;;  %4422 = vpow2.f32 %v3393_v15  ;;  %v2192_v40 = vadd.f32 %v3829_v37, %v2031_v17  ;;  %v2144_v41 = vpop.f32.mrb[57].mxu0 }
 0x82f   :  { %4424 = vrcp.f32 %v2212_v34  ;;  %v2191_v46 = vadd.f32 %v2144_v41, %v2030_v44 }
 0x830   :  { %v4415_v42 = vpop.eup %4414  ;;  %4426 = vrcp.f32 %v2211_v43 }
 0x831   :  { %v4417_v63 = vpop.eup %4416  ;;  %v2214_v45 = vadd.f32 1.0, %v4415_v42  ;;  %4428 = vpow2.f32 %v3392_v35  ;;  %v3832_v47 = vpop.f32.mrb[58].mxu0 }
 0x832   :  { %v2213_v48 = vadd.f32 1.0, %v4417_v63  ;;  %4430 = vtanh.f32 %v2192_v40  ;;  %v2194_v10 = vadd.f32 %v3832_v47, %v2033_v39  ;;  %v2154_v0 = vpop.f32.mrb[59].mxu0 }
 0x833   :  { %4432 = vrcp.f32 %v2214_v45  ;;  %v2193_v13 = vadd.f32 %v2154_v0, %v2032_v55 }
 0x834   :  { %v4419_v49 = vpop.eup %4418  ;;  %4434 = vrcp.f32 %v2213_v48 }
 0x835   :  { %v4421_v51 = vpop.eup %4420  ;;  %v2236_v12 = vadd.f32 1.0, %v4419_v49  ;;  %4436 = vtanh.f32 %v2191_v46  ;;  %v3835_v56 = vpop.f32.mrb[60].mxu0 }
 0x836   :  { %v2235_v57 = vadd.f32 1.0, %v4421_v51  ;;  %4438 = vtanh.f32 %v2194_v10  ;;  %v2196_v3 = vadd.f32 %v3835_v56, %v2035_v54  ;;  %v2164_v4 = vpop.f32.mrb[61].mxu0 }
 0x837   :  { %4440 = vrcp.f32 %v2236_v12  ;;  %v2195_v53 = vadd.f32 %v2164_v4, %v2034_v11 }
 0x838   :  { %v4423_v58 = vpop.eup %4422  ;;  %4442 = vrcp.f32 %v2235_v57  ;;  %v3395_v5 = vmul.f32 -1.442695, %v2196_v3 }
 0x839   :  { %v4425_v52 = vpop.eup %4424  ;;  %v2238_v60 = vadd.f32 1.0, %v4423_v58  ;;  %4444 = vtanh.f32 %v2193_v13  ;;  %v3394_v8 = vmul.f32 -1.442695, %v2195_v53  ;;  %v3838_v16 = vpop.f32.mrb[62].mxu0 }
 0x83a   :  { %v4427_v14 = vpop.eup %4426  ;;  %4446 = vpow2.f32 %v3395_v5  ;;  %v2198_v6 = vadd.f32 %v3838_v16, %v2037_v2  ;;  %v2174_v1 = vpop.f32.mrb[63].mxu0 }
 0x83b   :  { %v4429_v38 = vpop.eup %4428  ;;  %4448 = vrcp.f32 %v2238_v60  ;;  %v2197_v17 = vadd.f32 %v2174_v1, %v2036_v50 }
 0x83c   :  { %v4431_v36 = vpop.eup %4430  ;;  %v2237_v15 = vadd.f32 1.0, %v4429_v38  ;;  %4450 = vpow2.f32 %v3394_v8  ;;  %v3397_v33 = vmul.f32 -1.442695, %v2198_v6 }
 0x83d   :  { %v4433_v34 = vpop.eup %4432  ;;  %v2280_v35 = vmul.f32 %v4431_v36, %v4425_v52  ;;  %v3396_v37 = vmul.f32 -1.442695, %v2197_v17 }
 0x83e   :  { %v4435_v43 = vpop.eup %4434  ;;  %4452 = vrcp.f32 %v2237_v15 }
 0x83f   :  { %v4437_v40 = vpop.eup %4436  ;;  %4454 = vpow2.f32 %v3397_v33 }
 0x840   :  { %v4439_v44 = vpop.eup %4438  ;;  %v2279_v41 = vmul.f32 %v4437_v40, %v4427_v14  ;;  %4456 = vpow2.f32 %v3396_v37  ;;  %v2300_v37 = vld [vmem:[#allocation2 + $0x3a0] sm:$0xff] }
 0x841   :  { %v4441_v39 = vpop.eup %4440  ;;  %v2282_v42 = vmul.f32 %v4439_v44, %v4433_v34  ;;  %v2301_v34 = vld [vmem:[#allocation2 + $0x3a8] sm:$0xff] }
 0x842   :  { %v4443_v63 = vpop.eup %4442  ;;  %v2276_v45 = vmul.f32 %v4441_v39, %v5250_v59 }
 0x843   :  { %v4445_v46 = vpop.eup %4444  ;;  %v2275_v47 = vmul.f32 %v4443_v63, %v5252_v61 }
 0x844   :  { %v4447_v48 = vpop.eup %4446  ;;  %v5296_v10 = vadd.f32 %v2280_v35, %v2276_v45  ;;  %v2281_v55 = vmul.f32 %v4445_v46, %v4435_v43  ;;  %v2302_v45 = vld [vmem:[#allocation2 + $0x3b0] sm:$0xff] }
 0x845   :  { %v4449_v0 = vpop.eup %4448  ;;  %v5298_v54 = vadd.f32 %v2279_v41, %v2275_v47  ;;  %v2264_v49 = vadd.f32 1.0, %v4447_v48 }
 0x846   :  { %v4451_v11 = vpop.eup %4450  ;;  %v2278_v51 = vmul.f32 %v4449_v0, %v5257_v9  ;;  %4458 = vtanh.f32 %v5296_v10 }
 0x847   :  { %4460 = vtanh.f32 %v5298_v54  ;;  %v2263_v12 = vadd.f32 1.0, %v4451_v11 }
 0x848   :  { %v4453_v59 = vpop.eup %4452  ;;  %v5303_v13 = vadd.f32 %v2282_v42, %v2278_v51  ;;  %4462 = vrcp.f32 %v2264_v49  ;;  %v2303_v42 = vld [vmem:[#allocation2 + $0x3b8] sm:$0xff]  ;;  %v2305_v49 = vld [vmem:[#allocation2 + $0x3c8] sm:$0xff] }
 0x849   :  { %v4455_v61 = vpop.eup %4454  ;;  %v2277_v56 = vmul.f32 %v4453_v59, %v5261_v7  ;;  %4464 = vrcp.f32 %v2263_v12 }
 0x84a   :  { %v4457_v57 = vpop.eup %4456  ;;  %4466 = vtanh.f32 %v5303_v13  ;;  %v2266_v3 = vadd.f32 1.0, %v4455_v61 }
 0x84b   :  { %v5307_v4 = vadd.f32 %v2281_v55, %v2277_v56  ;;  %v2265_v9 = vadd.f32 1.0, %v4457_v57 }
 0x84c   :  { %4468 = vrcp.f32 %v2266_v3 }
 0x84d   :  { %4470 = vtanh.f32 %v5307_v4 }
 0x84e   :  { %4472 = vrcp.f32 %v2265_v9  ;;  %v2304_v9 = vld [vmem:[#allocation2 + $0x3c0] sm:$0xff] }
 0x850   :  { %v4459_v53 = vpop.eup %4458 }
 0x851   :  { %v4461_v2 = vpop.eup %4460 }
 0x852   :  { %v4463_v58 = vpop.eup %4462 }
 0x853   :  { %v4465_v5 = vpop.eup %4464  ;;  %v2292_v50 = vmul.f32 %v4463_v58, %v4459_v53 }
 0x854   :  { %v4467_v52 = vpop.eup %4466  ;;  %v2291_v60 = vmul.f32 %v4465_v5, %v4461_v2  ;;  %v2307_v2 = vld [vmem:[#allocation2 + $0x3d8] sm:$0xff] }
 0x856   :  { %v4469_v7 = vpop.eup %4468  ;;  %v3965_v8 = vpack.c.bf16 %v2292_v50, %v2291_v60 }
 0x857   :  { %v4471_v16 = vpop.eup %4470  ;;  %v2294_v14 = vmul.f32 %v4469_v7, %v4467_v52 }
 0x858   :  { %v4473_v6 = vpop.eup %4472  ;;  %3966 = vmatprep.subr.bf16.mxu1 %v3965_v8 }
 0x859   :  { %3968 = vmatpush3.bf16.msra.mxu1 %v3965_v8  ;;  %v2293_v1 = vmul.f32 %v4473_v6, %v4471_v16  ;;  %v2306_v16 = vld [vmem:[#allocation2 + $0x3d0] sm:$0xff]  ;;  %v2309_v6 = vld [vmem:[#allocation2 + $0x3e8] sm:$0xff] }
 0x85b   :  { %v3969_v38 = vpack.c.bf16 %v2294_v14, %v2293_v1 }
 0x85d   :  { %3970 = vmatprep.subr.bf16.mxu1 %v3969_v38 }
 0x85e   :  { %3972 = vmatpush3.bf16.msra.mxu1 %v3969_v38  ;;  %v2308_v38 = vld [vmem:[#allocation2 + $0x3e0] sm:$0xff] }
 0x861   :  { %3848 = vmatmul.mubr.msk.f32.vlgmr.msra.gmra.mrb[48].mxu1 %vm345_vm0, %v4759_v18  ;;  %v2569_v18 = vld [vmem:[%s5443_s5] sm:$0xff] }
 0x862   :  { %3850 = vmatprep.mubr.msk.f32.mxu1 %vm345_vm0, %v4764_v19  ;;  %3879 = vmatprep.mubr.msk.f32.mxu0 %vm345_vm0, %v2569_v18  ;;  %v2571_v19 = vld [vmem:[%s5444_s6] sm:$0xff] }
 0x865   :  { %3851 = vmatmul.mubr.msk.f32.gmra.mrb[50].mxu1 %vm345_vm0, %v4769_v20  ;;  %v4572_v20 = vmov 0  }
 0x866   :  { %3853 = vmatprep.mubr.msk.f32.mxu1 %vm345_vm0, %v4774_v21  ;;  %4020 = vset.pattern.permute.xlu0 %v4572_v20  ;;  %v2572_v21 = vld [vmem:[%s5444_s6 + $0x8] sm:$0xff] }
 0x867   :  { %4021 = vset.pattern.permute.xlu1 %v4572_v20  ;;  %2575 = vperm.xlu0 %4020, %v2571_v19  }
 0x869   :  { %3854 = vmatmul.mubr.msk.f32.gmra.mrb[52].mxu1 %vm345_vm0, %v4779_v22  ;;  %v2774_v22 = vld [vmem:[%s5448_s10] sm:$0xff] }
 0x86a   :  { %3856 = vmatprep.mubr.msk.f32.mxu1 %vm345_vm0, %v4784_v23  ;;  %v2297_v23 = vld [vmem:[#allocation2 + $0x388] sm:$0xff] }
 0x86b   :  { %2580 = vperm.xlu0 %4020, %v2572_v21  }
 0x86d   :  { %3857 = vmatmul.mubr.msk.f32.gmra.mrb[54].mxu1 %vm345_vm0, %v4789_v24  ;;  %v2296_v24 = vld [vmem:[#allocation2 + $0x380] sm:$0xff] }
 0x86e   :  { %3859 = vmatprep.mubr.msk.f32.mxu1 %vm345_vm0, %v4794_v25 }
 0x86f   :  { %2778 = vperm.xlu0 %4020, %v2774_v22  }
 0x871   :  { %3860 = vmatmul.mubr.msk.f32.gmra.mrb[56].mxu1 %vm345_vm0, %v4799_v26 }
 0x872   :  { %3862 = vmatprep.mubr.msk.f32.mxu1 %vm345_vm0, %v4804_v27 }
 0x875   :  { %3863 = vmatmul.mubr.msk.f32.gmra.mrb[58].mxu1 %vm345_vm0, %v4809_v28 }
 0x876   :  { %3865 = vmatprep.mubr.msk.f32.mxu1 %vm345_vm0, %v4814_v29  ;;  %v2299_v29 = vld [vmem:[#allocation2 + $0x398] sm:$0xff] }
 0x879   :  { %3866 = vmatmul.mubr.msk.f32.gmra.mrb[60].mxu1 %vm345_vm0, %v4819_v30 }
 0x87a   :  { %3868 = vmatprep.mubr.msk.f32.mxu1 %vm345_vm0, %v4824_v31  ;;  %v2298_v31 = vld [vmem:[#allocation2 + $0x390] sm:$0xff] }
 0x87d   :  { %3869 = vmatmul.mubr.msk.f32.gmra.mrb[62].mxu1 %vm345_vm0, %v4829_v32 }
 0x934   :  { %v3849_v25 = vpop.f32.mrb[48].mxu1 }
 0x935   :  { %v2458_v26 = vadd.f32 %v3849_v25, %v2297_v23  ;;  %v2378_v27 = vpop.f32.mrb[49].mxu1 }
 0x936   :  { %v2457_v28 = vadd.f32 %v2378_v27, %v2296_v24  ;;  %v2311_v27 = vld [vmem:[#allocation2 + $0x3f8] sm:$0xff] }
 0x937   :  { %v3415_v30 = vmul.f32 -1.442695, %v2458_v26 }
 0x938   :  { %v3414_v32 = vmul.f32 -1.442695, %v2457_v28  ;;  %v3852_v17 = vpop.f32.mrb[50].mxu1 }
 0x939   :  { %4474 = vpow2.f32 %v3415_v30  ;;  %v2460_v36 = vadd.f32 %v3852_v17, %v2299_v29  ;;  %v2388_v15 = vpop.f32.mrb[51].mxu1  ;;  %v2310_v30 = vld [vmem:[#allocation2 + $0x3f0] sm:$0xff] }
 0x93a   :  { %4476 = vpow2.f32 %v3414_v32  ;;  %v2459_v33 = vadd.f32 %v2388_v15, %v2298_v31 }
 0x93b   :  { %v3417_v35 = vmul.f32 -1.442695, %v2460_v36 }
 0x93c   :  { %v3416_v43 = vmul.f32 -1.442695, %v2459_v33  ;;  %v3855_v40 = vpop.f32.mrb[52].mxu1 }
 0x93d   :  { %4478 = vpow2.f32 %v3417_v35  ;;  %v2462_v44 = vadd.f32 %v3855_v40, %v2301_v34  ;;  %v2398_v41 = vpop.f32.mrb[53].mxu1 }
 0x93e   :  { %4480 = vpow2.f32 %v3416_v43  ;;  %v2461_v39 = vadd.f32 %v2398_v41, %v2300_v37 }
 0x93f   :  { %v3419_v63 = vmul.f32 -1.442695, %v2462_v44 }
 0x940   :  { %v3418_v46 = vmul.f32 -1.442695, %v2461_v39  ;;  %v3858_v47 = vpop.f32.mrb[54].mxu1 }
 0x941   :  { %4482 = vpow2.f32 %v3419_v63  ;;  %v2464_v48 = vadd.f32 %v3858_v47, %v2303_v42  ;;  %v2408_v55 = vpop.f32.mrb[55].mxu1 }
 0x942   :  { %4484 = vpow2.f32 %v3418_v46  ;;  %v2463_v0 = vadd.f32 %v2408_v55, %v2302_v45 }
 0x943   :  { %v4475_v11 = vpop.eup %4474  ;;  %v3421_v51 = vmul.f32 -1.442695, %v2464_v48 }
 0x944   :  { %v4477_v12 = vpop.eup %4476  ;;  %v2486_v59 = vadd.f32 1.0, %v4475_v11  ;;  %v3420_v61 = vmul.f32 -1.442695, %v2463_v0  ;;  %v3861_v56 = vpop.f32.mrb[56].mxu1 }
 0x945   :  { %v2485_v57 = vadd.f32 1.0, %v4477_v12  ;;  %4486 = vpow2.f32 %v3421_v51  ;;  %v2466_v3 = vadd.f32 %v3861_v56, %v2305_v49  ;;  %v2418_v53 = vpop.f32.mrb[57].mxu1 }
 0x946   :  { %4488 = vrcp.f32 %v2486_v59  ;;  %v2465_v52 = vadd.f32 %v2418_v53, %v2304_v9 }
 0x947   :  { %v4479_v58 = vpop.eup %4478  ;;  %4490 = vrcp.f32 %v2485_v57 }
 0x948   :  { %v4481_v5 = vpop.eup %4480  ;;  %v2488_v50 = vadd.f32 1.0, %v4479_v58  ;;  %4492 = vpow2.f32 %v3420_v61  ;;  %v3864_v60 = vpop.f32.mrb[58].mxu1 }
 0x949   :  { %v2487_v7 = vadd.f32 1.0, %v4481_v5  ;;  %4494 = vtanh.f32 %v2466_v3  ;;  %v2468_v8 = vadd.f32 %v3864_v60, %v2307_v2  ;;  %v2428_v14 = vpop.f32.mrb[59].mxu1 }
 0x94a   :  { %4496 = vrcp.f32 %v2488_v50  ;;  %v2467_v21 = vadd.f32 %v2428_v14, %v2306_v16 }
 0x94b   :  { %v4483_v1 = vpop.eup %4482  ;;  %4498 = vrcp.f32 %v2487_v7 }
 0x94c   :  { %v4485_v18 = vpop.eup %4484  ;;  %v2510_v19 = vadd.f32 1.0, %v4483_v1  ;;  %4500 = vtanh.f32 %v2465_v52  ;;  %v3867_v22 = vpop.f32.mrb[60].mxu1 }
 0x94d   :  { %v2509_v23 = vadd.f32 1.0, %v4485_v18  ;;  %4502 = vtanh.f32 %v2468_v8  ;;  %v2470_v24 = vadd.f32 %v3867_v22, %v2309_v6  ;;  %v2438_v25 = vpop.f32.mrb[61].mxu1 }
 0x94e   :  { %4504 = vrcp.f32 %v2510_v19  ;;  %v2469_v26 = vadd.f32 %v2438_v25, %v2308_v38  ;;  %v2570_v25 = vld [vmem:[%s5443_s5 + $0x8] sm:$0xff]  ;;  %s4577_s5 = smov [#allocation4]  }
 0x94f   :  { %v4487_v28 = vpop.eup %4486  ;;  %4506 = vrcp.f32 %v2509_v23  ;;  %v3423_v29 = vmul.f32 -1.442695, %v2470_v24  ;;  %s3184_s22 = sshll.u32 %s4577_s5, 4  ;;  %s3185_s22 = int_to_ptr.vmem [resolvable:$true] %s3184_s22 }
 0x950   :  { %v4489_v31 = vpop.eup %4488  ;;  %v2512_v32 = vadd.f32 1.0, %v4487_v28  ;;  %4508 = vtanh.f32 %v2467_v21  ;;  %v3422_v17 = vmul.f32 -1.442695, %v2469_v26  ;;  %v3870_v36 = vpop.f32.mrb[62].mxu1  ;;  %v2670_v26 = vld [vmem:[%s5445_s7] sm:$0xff]  ;;  %v2673_v28 = vld [vmem:[%s5446_s8 + $0x8] sm:$0xff]  ;;  %p4543_p2 = scmp.lt.s32.totalorder %s3185_s22, %s3185_s22 }
 0x951   :  { %v4491_v15 = vpop.eup %4490  ;;  %4510 = vpow2.f32 %v3423_v29  ;;  %v2472_v33 = vadd.f32 %v3870_v36, %v2311_v27  ;;  %v2448_v34 = vpop.f32.mrb[63].mxu1  ;;  %v2672_v27 = vld [vmem:[%s5446_s8] sm:$0xff]  ;;  %v2775_v29 = vld [vmem:[%s5448_s10 + $0x8] sm:$0x7f]  ;;  %s4538_s8 = scalar_lea.vmem %s3185_s22, 16  ;;  %s4542_s23 = scalar_lea.vmem %s3185_s22, 32 }
 0x952   :  { %v4493_v35 = vpop.eup %4492  ;;  %4512 = vrcp.f32 %v2512_v32  ;;  %v2471_v37 = vadd.f32 %v2448_v34, %v2310_v30  ;;  %2676 = vperm.xlu1 %4021, %v2672_v27   ;;  %v2576_v30 = vpop.permute.xlu0 %2575  ;;  %v4575_v27 = vmov 0.0|0.0   ;;  %p4539_p1 = scmp.ne.s32.totalorder %s3185_s22, %s4538_s8  ;;  %p4544_p3 = scmp.lt.s32.totalorder %s4542_s23, %s4538_s8 }
 0x953   :  { %v4495_v43 = vpop.eup %4494  ;;  %v2511_v40 = vadd.f32 1.0, %v4493_v35  ;;  %4514 = vpow2.f32 %v3422_v17  ;;  %v3425_v44 = vmul.f32 -1.442695, %v2472_v33 }
 0x954   :  { %v4497_v41 = vpop.eup %4496  ;;  %v2554_v39 = vmul.f32 %v4495_v43, %v4489_v31  ;;  %v3424_v42 = vmul.f32 -1.442695, %v2471_v37  ;;  %p4545_p4 = por %p4544_p3, %p4543_p2 }
 0x955   :  { %v4499_v63 = vpop.eup %4498  ;;  %4516 = vrcp.f32 %v2511_v40  ;;  %v2671_v40 = vld [vmem:[%s5445_s7 + $0x8] sm:$0xff] }
 0x956   :  { %v4501_v45 = vpop.eup %4500  ;;  %4518 = vpow2.f32 %v3425_v44  ;;  %2681 = vperm.xlu1 %4021, %v2673_v28   ;;  %v2581_v31 = vpop.permute.xlu0 %2580  ;;  %v2772_v44 = vld [vmem:[%s5447_s9] sm:$0xff]  ;;  %p4546_p5 = pnand %p4545_p4, %p4539_p1 }
 0x957   :  { %v4503_v46 = vpop.eup %4502  ;;  %v2553_v47 = vmul.f32 %v4501_v45, %v4491_v15  ;;  %4520 = vpow2.f32 %v3424_v42  ;;  %3893 = vmatprep.mubr.msk.f32.mxu1 %vm2684_vm1, %v2772_v44 }
 0x958   :  { %v4505_v48 = vpop.eup %4504  ;;  %v2556_v55 = vmul.f32 %v4503_v46, %v4497_v41 }
 0x959   :  { %v4507_v0 = vpop.eup %4506  ;;  %v2550_v49 = vmul.f32 %v4505_v48, %v5296_v10 }
 0x95a   :  { %v4509_v11 = vpop.eup %4508  ;;  %v2549_v51 = vmul.f32 %v4507_v0, %v5298_v54  ;;  %2783 = vperm.xlu1 %4021, %v2775_v29  }
 0x95b   :  { %v4511_v12 = vpop.eup %4510  ;;  %v2558_v59 = vadd.f32 %v2554_v39, %v2550_v49  ;;  %v2555_v61 = vmul.f32 %v4509_v11, %v4499_v63  ;;  %v2773_v11 = vld [vmem:[%s5447_s9 + $0x8] sm:$0x7f] }
 0x95c   :  { %v4513_v56 = vpop.eup %4512  ;;  %v2557_v57 = vadd.f32 %v2553_v47, %v2549_v51  ;;  %v2538_v3 = vadd.f32 1.0, %v4511_v12  ;;  %v2868_v51 = vld [vmem:[%s5449_s11] sm:$0xff]  ;;  %v2869_v12 = vld [vmem:[%s5449_s11 + $0x8] sm:$0xff] }
 0x95d   :  { %v4515_v9 = vpop.eup %4514  ;;  %v2552_v53 = vmul.f32 %v4513_v56, %v5303_v13  ;;  %4522 = vtanh.f32 %v2558_v59  ;;  %v4573_v59 = vmov 15   ;;  %v2973_v56 = vld [vmem:[%s5450_s12 + $0x8] sm:$0xff] }
 0x95e   :  { %4524 = vtanh.f32 %v2557_v57  ;;  %v2537_v2 = vadd.f32 1.0, %v4515_v9  ;;  %4023 = vset.pattern.permute.xlu1 %v4573_v59  ;;  %4022 = vset.pattern.permute.xlu0 %v4573_v59  ;;  %v2994_v57 = vld [vmem:[%s5452_s14] sm:$0xff]  ;;  %v2995_v9 = vld [vmem:[%s5452_s14 + $0x8] sm:$0xff] }
 0x95f   :  { %v4517_v58 = vpop.eup %4516  ;;  %v2560_v5 = vadd.f32 %v2556_v55, %v2552_v53  ;;  %4526 = vrcp.f32 %v2538_v3  ;;  %2877 = vperm.xlu1 %4023, %v2869_v12   ;;  %2872 = vperm.xlu0 %4022, %v2868_v51   ;;  %v3094_v3 = vld [vmem:[#allocation3] sm:$0x1] }
 0x960   :  { %v4519_v50 = vpop.eup %4518  ;;  %v2551_v10 = vmul.f32 %v4517_v58, %v5307_v4  ;;  %4528 = vrcp.f32 %v2537_v2  ;;  %v2779_v58 = vpop.permute.xlu0 %2778 }
 0x961   :  { %v4521_v54 = vpop.eup %4520  ;;  %4530 = vtanh.f32 %v2560_v5  ;;  %v2540_v52 = vadd.f32 1.0, %v4519_v50 }
 0x962   :  { %v2559_v60 = vadd.f32 %v2555_v61, %v2551_v10  ;;  %v2539_v7 = vadd.f32 1.0, %v4521_v54  ;;  %v2972_v61 = vld [vmem:[%s5450_s12] sm:$0xff] }
 0x963   :  { %4532 = vrcp.f32 %v2540_v52  ;;  %4024 = vset.pattern.permute.xlu1 %v4572_v20  ;;  %4025 = vset.pattern.permute.xlu0 %v4572_v20  ;;  %v2992_v54 = vld [vmem:[%s5451_s13] sm:$0xff] }
 0x964   :  { %4534 = vtanh.f32 %v2559_v60  ;;  %2976 = vperm.xlu1 %4024, %v2972_v61   ;;  %2981 = vperm.xlu0 %4025, %v2973_v56   ;;  %v3432_v52 = vld [vmem:[%s5485_s1] ss:$0 sm:$0xff] }
 0x965   :  { %4536 = vrcp.f32 %v2539_v7 }
 0x967   :  { %v4523_v8 = vpop.eup %4522 }
 0x968   :  { %v4525_v13 = vpop.eup %4524  ;;  %2998 = vperm.xlu1 %4024, %v2994_v57   ;;  %3097 = vperm.xlu0 %4025, %v3094_v3  }
 0x969   :  { %v4527_v16 = vpop.eup %4526 }
 0x96a   :  { %v4529_v14 = vpop.eup %4528  ;;  %v2566_v6 = vmul.f32 %v4527_v16, %v4523_v8 }
 0x96b   :  { %v4531_v1 = vpop.eup %4530  ;;  %v2565_v38 = vmul.f32 %v4529_v14, %v4525_v13 }
 0x96c   :  { %3003 = vperm.xlu1 %4024, %v2995_v9  }
 0x96d   :  { %v4533_v18 = vpop.eup %4532  ;;  %v3973_v19 = vpack.c.bf16 %v2566_v6, %v2565_v38 }
 0x96e   :  { %v4535_v21 = vpop.eup %4534  ;;  %v2568_v4 = vmul.f32 %v4533_v18, %v4531_v1 }
 0x96f   :  { %v4537_v22 = vpop.eup %4536  ;;  %3974 = vmatprep.subr.bf16.mxu0 %v3973_v19 }
 0x970   :  { %3976 = vmatpush3.bf16.msra.mxu0 %v3973_v19  ;;  %v2567_v23 = vmul.f32 %v4537_v22, %v4535_v21 }
 0x972   :  { %v3977_v24 = vpack.c.bf16 %v2568_v4, %v2567_v23 }
 0x974   :  { %3978 = vmatprep.subr.bf16.mxu0 %v3977_v24 }
 0x975   :  { %3980 = vmatpush3.bf16.msra.mxu0 %v3977_v24 }
 0x978   :  { %3880 = vmatmul.mubr.msk.f32.vlgmr.msra.gmra.mrb[64].mxu0 %vm345_vm0, %v2570_v25 }
 0x979   :  { %3886 = vmatprep.mubr.msk.f32.mxu0 %vm2684_vm1, %v2670_v26  ;;  %v2993_v26 = vld [vmem:[%s5451_s13 + $0x8] sm:$0xff] }
 0x9d1   :  { %v2677_v41 = vpop.permute.xlu1 %2676 }
 0x9d5   :  { %v2682_v39 = vpop.permute.xlu1 %2681 }
 0x9d9   :  { %v2784_v53 = vpop.permute.xlu1 %2783 }
 0x9de   :  { %v2878_v60 = vpop.permute.xlu1 %2877  ;;  %v2873_v7 = vpop.permute.xlu0 %2872 }
 0x9df   :  { %v2887_v8 = vmul.f32 %v3432_v52, %v2878_v60  ;;  %v2886_v13 = vmul.f32 %v3432_v52, %v2873_v7 }
 0x9e3   :  { %v2982_v38 = vpop.permute.xlu0 %2981  ;;  %v2977_v18 = vpop.permute.xlu1 %2976 }
 0x9e7   :  { %v2999_v28 = vpop.permute.xlu1 %2998  ;;  %v3098_v44 = vpop.permute.xlu0 %3097 }
 0x9eb   :  { %v3004_v29 = vpop.permute.xlu1 %3003 }
 0xa4b   :  { %v3881_v32 = vpop.f32.mrb[64].mxu0 }
 0xa4c   :  { %v2661_v17 = vadd.f32 %v3881_v32, %v2581_v31  ;;  %v2655_v36 = vpop.f32.mrb[65].mxu0 }
 0xa4d   :  { %v2656_v15 = vadd.f32 %v2655_v36, %v2576_v30 }
 0xa4e   :  { %vm2665_vm2 = vcmp.ge.f32.partialorder %v2661_v17, 0.0  ;;  %v2667_v33 = vmul.f32 0.2, %v2661_v17 }
 0xa4f   :  { %vm2664_vm3 = vcmp.ge.f32.partialorder %v2656_v15, 0.0  ;;  %v2666_v34 = vmul.f32 0.2, %v2656_v15 }
 0xa50   :  { %v2669_v35 = vsel %vm2665_vm2, %v2661_v17, %v2667_v33 }
 0xa51   :  { %v2668_v37 = vsel %vm2664_vm3, %v2656_v15, %v2666_v34 }
 0xa52   :  { %v3981_v43 = vpack.c.bf16 %v2669_v35, %v2668_v37  ;;  %v3093_v37 = vld [vmem:[%s5453_s15] sm:$0x1] }
 0xa54   :  { %3982 = vmatprep.subr.bf16.mxu0 %v3981_v43 }
 0xa55   :  { %3984 = vmatpush3.bf16.msra.mxu0 %v3981_v43 }
 0xa58   :  { %3887 = vmatmul.mubr.msk.f32.vlgmr.msra.gmra.mrb[66].mxu0 %vm2684_vm1, %v2671_v40 }
 0xa59   :  { %3900 = vmatprep.mubr.msk.f32.mxu0 %vm2888_vm6, %v2868_v51 }
 0xb2b   :  { %v3888_v42 = vpop.f32.mrb[66].mxu0 }
 0xb2c   :  { %v2763_v63 = vadd.f32 %v3888_v42, %v2682_v39  ;;  %v2757_v45 = vpop.f32.mrb[67].mxu0 }
 0xb2d   :  { %v2758_v46 = vadd.f32 %v2757_v45, %v2677_v41 }
 0xb2e   :  { %vm2767_vm4 = vcmp.ge.f32.partialorder %v2763_v63, 0.0  ;;  %v2769_v47 = vmul.f32 0.2, %v2763_v63 }
 0xb2f   :  { %vm2766_vm5 = vcmp.ge.f32.partialorder %v2758_v46, 0.0  ;;  %v2768_v48 = vmul.f32 0.2, %v2758_v46 }
 0xb30   :  { %v2771_v55 = vsel %vm2767_vm4, %v2763_v63, %v2769_v47 }
 0xb31   :  { %v2770_v0 = vsel %vm2766_vm5, %v2758_v46, %v2768_v48 }
 0xb32   :  { %v3985_v49 = vpack.c.bf16 %v2771_v55, %v2770_v0 }
 0xb34   :  { %3986 = vmatprep.subr.bf16.mxu1 %v3985_v49 }
 0xb35   :  { %3988 = vmatpush3.bf16.msra.mxu1 %v3985_v49 }
 0xb38   :  { %3894 = vmatmul.mubr.msk.f32.vlgmr.msra.gmra.mrb[64].mxu1 %vm2684_vm1, %v2773_v11 }
 0xb39   :  { %3907 = vmatprep.mubr.msk.f32.mxu1 %vm2684_vm1, %v2992_v54 }
 0xc0b   :  { %v3895_v2 = vpop.f32.mrb[64].mxu1 }
 0xc0c   :  { %v2864_v5 = vadd.f32 %v3895_v2, %v2784_v53  ;;  %v2858_v20 = vpop.f32.mrb[65].mxu1 }
 0xc0d   :  { %v2859_v50 = vadd.f32 %v2858_v20, %v2779_v58 }
 0xc0f   :  { %v3989_v10 = vpack.c.bf16 %v2864_v5, %v2859_v50 }
 0xc11   :  { %3991 = vmatprep.subr.msk.bf16.mxu0 %vm3990_vm9, %v3989_v10 }
 0xc12   :  { %3994 = vmatpush3.bf16.msk.msra.mxu0 %vm3990_vm9, %v3989_v10 }
 0xc13   :  { %3999 = vmatprep.subr.bf16.mxu0 %v4575_v27 }
 0xc15   :  { %3901 = vmatmul.mubr.msk.f32.vlgmr.msra.gmra.mrb[68].mxu0 %vm2888_vm6, %v2869_v12 }
 0xc16   :  { %3914 = vmatprep.mubr.msk.f32.mxu0 %vm4576_vm12, %v4571_v62  ;;  %v3100_v62 = vlaneseq }
 0xc18   :  { %v3101_v43 = vshrl.u32 %v3100_v62, 7 }
 0xc1a   :  { %v3102_v40 = vsub.s32 0, %v3101_v43 }
 0xc1c   :  { %v3103_v41 = vrot.slane %v3098_v44, %v3102_v40 }
 0xce8   :  { %v3902_v16 = vpop.f32.mrb[68].mxu0 }
 0xce9   :  { %v2969_v14 = vadd.f32 %v3902_v16, %v2887_v8  ;;  %v2963_v6 = vpop.f32.mrb[69].mxu0 }
 0xcea   :  { %v2964_v1 = vadd.f32 %v2963_v6, %v2886_v13 }
 0xceb   :  { %v2985_v19 = vadd.f32 %v2982_v38, %v2969_v14 }
 0xcec   :  { %v2984_v21 = vadd.f32 %v2977_v18, %v2964_v1 }
 0xced   :  { %vm2987_vm10 = vcmp.ge.f32.partialorder %v2985_v19, 0.0  ;;  %v2989_v4 = vmul.f32 0.2, %v2985_v19 }
 0xcee   :  { %vm2986_vm11 = vcmp.ge.f32.partialorder %v2984_v21, 0.0  ;;  %v2988_v22 = vmul.f32 0.2, %v2984_v21 }
 0xcef   :  { %v2991_v23 = vsel %vm2987_vm10, %v2985_v19, %v2989_v4 }
 0xcf0   :  { %v2990_v24 = vsel %vm2986_vm11, %v2984_v21, %v2988_v22 }
 0xcf1   :  { %v3995_v25 = vpack.c.bf16 %v2991_v23, %v2990_v24 }
 0xcf3   :  { %3996 = vmatprep.subr.bf16.mxu1 %v3995_v25 }
 0xcf4   :  { %3998 = vmatpush3.bf16.msra.mxu1 %v3995_v25 }
 0xcf7   :  { %3908 = vmatmul.mubr.msk.f32.vlgmr.msra.gmra.mrb[66].mxu1 %vm2684_vm1, %v2993_v26 }
 0xdca   :  { %v3909_v30 = vpop.f32.mrb[66].mxu1 }
 0xdcb   :  { %v3084_v31 = vadd.f32 %v3909_v30, %v3004_v29  ;;  %v3078_v32 = vpop.f32.mrb[67].mxu1 }
 0xdcc   :  { %v3079_v17 = vadd.f32 %v3078_v32, %v2999_v28 }
 0xdcd   :  { %vm3088_vm13 = vcmp.ge.f32.partialorder %v3084_v31, 0.0  ;;  %v3090_v36 = vmul.f32 0.2, %v3084_v31 }
 0xdce   :  { %vm3087_vm14 = vcmp.ge.f32.partialorder %v3079_v17, 0.0  ;;  %v3089_v15 = vmul.f32 0.2, %v3079_v17 }
 0xdcf   :  { %v3092_v33 = vsel %vm3088_vm13, %v3084_v31, %v3090_v36 }
 0xdd0   :  { %v3091_v34 = vsel %vm3087_vm14, %v3079_v17, %v3089_v15 }
 0xdd1   :  { %v4000_v35 = vpack.c.bf16 %v3092_v33, %v3091_v34 }
 0xdd3   :  { %4001 = vmatpush3.bf16.msra.mxu0 %v4000_v35 }
 0xdd6   :  { %3915 = vmatmul.mubr.msk.f32.vlgmr.msra.gmra.mrb[70].mxu0 %vm2684_vm1, %v3093_v37 }
 0xea9   :  { %v3173_v39 = vpop.f32.mrb[70].mxu0 }
 0xeaa   :  { %v3174_v42 = vadd.f32 %v3173_v39, %v3103_v41  ;;  %v3916_v63 = vpop.f32.mrb[71].mxu0 }
 0xeac   :  { %3177 = vst [vmem:[#allocation4] sm:$0x1] %v3174_v42 }
 0xead   :  { %4549 = shalt.err (!%p4546_p5)
}
 0xeae   :  { %s4550_s24 = scalar_lea.hbm %s5455_s17, 16 }
 0xeaf   :  { %p4551_p6 = scmp.ne.s32.totalorder %s5455_s17, %s4550_s24  ;;  %p4554_p7 = scmp.lt.u32.totalorder %s4550_s24, %s5455_s17 }
 0xeb1   :  { %p4556_p8 = pnand %p4554_p7, %p4551_p6 }
 0xeb3   :  { %4559 = shalt.err (!%p4556_p8)
}
 0xeb4   :  { %3187 = dma.vmem_to_hbm [thread:$0]  %s3185_s22, 16, %s5455_s17, [#allocation5]  }
 0xeb5   :  { %4564 = dma.done.wait [#allocation5], 16  }
 0xeb6   :  { %4565 = vsyncadd [#allocation5], 4294967280 }
 0xeb7   :  { %3191 = vsyncpa [#allocation5], 1 }

</bundles_post_ra>
